<compile_context>
chip_gen: v7x
topology: tpu7x:2x2x1
jax: 0.10.0
libtpu: 0.0.40
codegen_flags: <defaults>
</compile_context>

<pallas_src>
import jax
import jax.numpy as jnp
from jax.experimental import pallas as pl
from jax.experimental.pallas import tpu as pltpu

H = 768          # bert_hidden_dim_size in the PyTorch module
N_IOB = 3        # iob_head output dim
N_BIN = 2        # binary head output dim
NPAD = 128       # lane-dense padded head output width (>= N_IOB + N_BIN)


def _encoder_heads_kernel(x_ref, mask_ref,
                          wqkv_ref, wo_ref,
                          gamma_ref, beta_ref,
                          whead_ref, bhead_ref,
                          out_ref):
    # One grid step == Bt batch elements.
    Bt, S, Hd = x_ref.shape
    M = Bt * S

    x = x_ref[...]                                   # [Bt, S, H] f32
    xf = x.reshape(M, Hd)                            # flattened row slab
    x_bf = xf.astype(jnp.bfloat16)

    # --- fused QKV projection: one [M, H] x [H, 3H] MXU pass (bf16 operands) ---
    qkv = jnp.dot(x_bf, wqkv_ref[...], preferred_element_type=jnp.float32)   # [M, 3H]
    q = qkv[:, :Hd].reshape(Bt, S, Hd).astype(jnp.bfloat16)
    k = qkv[:, Hd:2 * Hd].reshape(Bt, S, Hd).astype(jnp.bfloat16)
    v = qkv[:, 2 * Hd:].reshape(Bt, S, Hd).astype(jnp.bfloat16)

    # --- attention scores: contract on last dim of both operands (no k.T) ---
    scale = 1.0 / jnp.sqrt(jnp.float32(Hd))
    addm = mask_ref[...][:, None, :]                 # [Bt, 1, S] additive mask
    scores = jnp.einsum('bqd,bkd->bqk', q, k,
                        preferred_element_type=jnp.float32) * scale + addm    # [Bt, S, S]

    # --- softmax in f32; reciprocal on the EUP slot ---
    m = jnp.max(scores, axis=-1, keepdims=True)
    p = jnp.exp(scores - m)
    l = jnp.sum(p, axis=-1, keepdims=True)
    p = p * pl.reciprocal(l, approx=True)

    attn = jnp.einsum('bqk,bkd->bqd', p.astype(jnp.bfloat16), v,
                      preferred_element_type=jnp.float32)                     # [Bt, S, H]

    # --- output projection + residual (f32 accumulate) ---
    y = xf + jnp.dot(attn.reshape(M, Hd).astype(jnp.bfloat16), wo_ref[...],
                     preferred_element_type=jnp.float32)                      # [M, H]

    # --- LayerNorm over hidden dim (f32, eps = 1e-5 like nn.LayerNorm) ---
    mu = jnp.mean(y, axis=-1, keepdims=True)
    var = jnp.mean((y - mu) ** 2, axis=-1, keepdims=True)
    h = (y - mu) * jax.lax.rsqrt(var + 1e-5) * gamma_ref[...] + beta_ref[...]  # [M, H]

    # --- fused classification heads: single lane-dense [M, 128] matmul ---
    logits = jnp.dot(h.astype(jnp.bfloat16), whead_ref[...],
                     preferred_element_type=jnp.float32) + bhead_ref[...]      # [M, NPAD]
    out_ref[...] = logits.reshape(Bt, S, NPAD)


def _choose_bt(B, S, target_rows=256):
    """Largest divisor of B with Bt*S close to target_rows (MXU row fill)."""
    bt = max(1, min(B, target_rows // max(S, 1)))
    while B % bt != 0:
        bt -= 1
    return bt


def my_model_forward(input_ids, token_type_ids, attention_mask, params):
    """Mirrors myModel.forward: returns (iob_output, bin_output).

    token_type_ids is accepted but unused, exactly as in the PyTorch forward.
    """
    del token_type_ids  # unused (the PyTorch module never passes it to the model)

    B, S = input_ids.shape
    Bt = _choose_bt(B, S)

    # Glue in plain JAX: embedding gather + additive-mask construction.
    emb = params["emb_table"][input_ids].astype(jnp.float32)          # [B, S, H]
    add_mask = (1.0 - attention_mask.astype(jnp.float32)) * -1e9      # [B, S]

    # Fused bf16 MXU weights (f32 masters kept in params).
    wqkv = jnp.concatenate(
        [params["wq"], params["wk"], params["wv"]], axis=1).astype(jnp.bfloat16)   # [H, 3H]
    wo = params["wo"].astype(jnp.bfloat16)                                          # [H, H]

    w_head = jnp.zeros((H, NPAD), jnp.float32)
    w_head = w_head.at[:, :N_IOB].set(params["w_iob"])
    w_head = w_head.at[:, N_IOB:N_IOB + N_BIN].set(params["w_bin"])
    w_head = w_head.astype(jnp.bfloat16)                                            # [H, 128]

    b_head = jnp.zeros((1, NPAD), jnp.float32)
    b_head = b_head.at[:, :N_IOB].set(params["b_iob"])
    b_head = b_head.at[:, N_IOB:N_IOB + N_BIN].set(params["b_bin"])                 # [1, 128]

    const_spec = lambda shape: pl.BlockSpec(shape, lambda b: (0,) * len(shape))

    grid_spec = pltpu.PrefetchScalarGridSpec(
        num_scalar_prefetch=0,
        grid=(B // Bt,),
        in_specs=[
            pl.BlockSpec((Bt, S, H), lambda b: (b, 0, 0)),   # embeddings
            pl.BlockSpec((Bt, S), lambda b: (b, 0)),         # additive mask
            const_spec((H, 3 * H)),                          # fused Wqkv (bf16)
            const_spec((H, H)),                              # Wo (bf16)
            const_spec((1, H)),                              # ln gamma
            const_spec((1, H)),                              # ln beta
            const_spec((H, NPAD)),                           # fused head weight (bf16)
            const_spec((1, NPAD)),                           # fused head bias
        ],
        out_specs=[
            pl.BlockSpec((Bt, S, NPAD), lambda b: (b, 0, 0)),  # lane-dense output
        ],
    )

    # Advisory scheduling hint for XLA.
    flops = 2 * B * S * H * (3 * H + H + NPAD) + 2 * 2 * B * S * S * H
    bytes_accessed = (emb.size * 4 + add_mask.size * 4
                      + wqkv.size * 2 + wo.size * 2 + w_head.size * 2
                      + (H + H + NPAD) * 4
                      + B * S * NPAD * 4)
    cost = pl.CostEstimate(flops=flops,
                           transcendentals=B * S * S,
                           bytes_accessed=bytes_accessed)

    (head_out,) = pl.pallas_call(
        _encoder_heads_kernel,
        out_shape=(jax.ShapeDtypeStruct((B, S, NPAD), jnp.float32),),
        grid_spec=grid_spec,
        compiler_params=pltpu.CompilerParams(
            dimension_semantics=("parallel",),
            vmem_limit_bytes=32 << 20,        # valid on v7x (64 MiB VMEM) too
        ),
        cost_estimate=cost,
    )(
        emb, add_mask,
        wqkv, wo,
        params["gamma"], params["beta"],
        w_head, b_head,
    )

    # Slice the padded lane-dense block back to the module's head widths.
    iob_out = head_out[..., :N_IOB]
    bin_out = head_out[..., N_IOB:N_IOB + N_BIN]
    return iob_out, bin_out


def init_params(key, vocab_size):
    ks = jax.random.split(key, 8)
    s = 0.02
    return {
        "emb_table": s * jax.random.normal(ks[0], (vocab_size, H), jnp.float32),
        "wq": s * jax.random.normal(ks[1], (H, H), jnp.float32),
        "wk": s * jax.random.normal(ks[2], (H, H), jnp.float32),
        "wv": s * jax.random.normal(ks[3], (H, H), jnp.float32),
        "wo": s * jax.random.normal(ks[4], (H, H), jnp.float32),
        "gamma": jnp.ones((1, H), jnp.float32),
        "beta": jnp.zeros((1, H), jnp.float32),
        "w_iob": s * jax.random.normal(ks[5], (H, N_IOB), jnp.float32),
        "b_iob": jnp.zeros((1, N_IOB), jnp.float32),
        "w_bin": s * jax.random.normal(ks[6], (H, N_BIN), jnp.float32),
        "b_bin": jnp.zeros((1, N_BIN), jnp.float32),
    }


if __name__ == "__main__":
    B, S, VOCAB = 2, 8, 128
    key = jax.random.PRNGKey(0)
    k_ids, k_params = jax.random.split(key)

    input_ids = jax.random.randint(k_ids, (B, S), 0, VOCAB, dtype=jnp.int32)
    token_type_ids = jnp.zeros((B, S), jnp.int32)
    attention_mask = jnp.ones((B, S), jnp.int32).at[1, 6:].set(0)  # pad tail of 2nd seq

    params = init_params(k_params, VOCAB)

    iob_out, bin_out = jax.jit(my_model_forward)(
        input_ids, token_type_ids, attention_mask, params
    )
    jax.block_until_ready((iob_out, bin_out))

    assert iob_out.shape == (B, S, N_IOB) and bin_out.shape == (B, S, N_BIN)
    assert bool(jnp.all(jnp.isfinite(iob_out))) and bool(jnp.all(jnp.isfinite(bin_out)))
    print("KERNEL_OK")
</pallas_src>

<mosaic_0001>
module attributes {stable_mosaic.version = 11 : i64} {
  func.func @_encoder_heads_kernel(%arg0: i32, %arg1: memref<2x8x768xf32, #tpu.memory_space<vmem>>, %arg2: memref<2x8xf32, #tpu.memory_space<vmem>>, %arg3: memref<768x2304xbf16, #tpu.memory_space<vmem>>, %arg4: memref<768x768xbf16, #tpu.memory_space<vmem>>, %arg5: memref<1x768xf32, #tpu.memory_space<vmem>>, %arg6: memref<1x768xf32, #tpu.memory_space<vmem>>, %arg7: memref<768x128xbf16, #tpu.memory_space<vmem>>, %arg8: memref<1x128xf32, #tpu.memory_space<vmem>>, %arg9: memref<2x8x128xf32, #tpu.memory_space<vmem>>) attributes {dimension_semantics = [#tpu.dimension_semantics<parallel>], iteration_bounds = array<i64: 1>, scalar_prefetch = 0 : i64, scratch_operands = 0 : i64, tpu.core_type = #tpu.core_type<tc>, window_params = [{transform_indices = @transform_0, window_bounds = array<i64: 2, 8, 768>}, {transform_indices = @transform_1, window_bounds = array<i64: 2, 8>}, {pipeline_mode = #tpu.pipeline_mode<synchronous>, transform_indices = @transform_2, window_bounds = array<i64: 768, 2304>}, {pipeline_mode = #tpu.pipeline_mode<synchronous>, transform_indices = @transform_3, window_bounds = array<i64: 768, 768>}, {pipeline_mode = #tpu.pipeline_mode<synchronous>, transform_indices = @transform_4, window_bounds = array<i64: 1, 768>}, {pipeline_mode = #tpu.pipeline_mode<synchronous>, transform_indices = @transform_5, window_bounds = array<i64: 1, 768>}, {pipeline_mode = #tpu.pipeline_mode<synchronous>, transform_indices = @transform_6, window_bounds = array<i64: 768, 128>}, {pipeline_mode = #tpu.pipeline_mode<synchronous>, transform_indices = @transform_7, window_bounds = array<i64: 1, 128>}, {transform_indices = @transform_8, window_bounds = array<i64: 2, 8, 128>}]} {
    %c0 = arith.constant 0 : index
    %c0_0 = arith.constant 0 : index
    %c0_1 = arith.constant 0 : index
    %0 = vector.load %arg1[%c0, %c0_0, %c0_1] : memref<2x8x768xf32, #tpu.memory_space<vmem>>, vector<2x8x768xf32>
    %1 = vector.shape_cast %0 : vector<2x8x768xf32> to vector<16x768xf32>
    %2 = arith.truncf %1 : vector<16x768xf32> to vector<16x768xbf16>
    %c0_2 = arith.constant 0 : index
    %c0_3 = arith.constant 0 : index
    %3 = vector.load %arg3[%c0_2, %c0_3] : memref<768x2304xbf16, #tpu.memory_space<vmem>>, vector<768x2304xbf16>
    %cst = arith.constant dense<0.000000e+00> : vector<16x2304xf32>
    %4 = tpu.matmul %2, %3, %cst {dimension_numbers = #tpu.dot_dimension_numbers<[1], [0], [0], [1], [0, 0, 1, 1], [], []>} : vector<16x768xbf16>, vector<768x2304xbf16>, vector<16x2304xf32> -> vector<16x2304xf32>
    %5 = vector.extract_strided_slice %4 {offsets = [0, 0], sizes = [16, 768], strides = [1, 1]} : vector<16x2304xf32> to vector<16x768xf32>
    %6 = vector.shape_cast %5 : vector<16x768xf32> to vector<2x8x768xf32>
    %7 = arith.truncf %6 : vector<2x8x768xf32> to vector<2x8x768xbf16>
    %8 = vector.extract_strided_slice %4 {offsets = [0, 768], sizes = [16, 768], strides = [1, 1]} : vector<16x2304xf32> to vector<16x768xf32>
    %9 = vector.shape_cast %8 : vector<16x768xf32> to vector<2x8x768xf32>
    %10 = arith.truncf %9 : vector<2x8x768xf32> to vector<2x8x768xbf16>
    %11 = vector.extract_strided_slice %4 {offsets = [0, 1536], sizes = [16, 768], strides = [1, 1]} : vector<16x2304xf32> to vector<16x768xf32>
    %12 = vector.shape_cast %11 : vector<16x768xf32> to vector<2x8x768xf32>
    %13 = arith.truncf %12 : vector<2x8x768xf32> to vector<2x8x768xbf16>
    %cst_4 = arith.constant 7.680000e+02 : f32
    %14 = math.sqrt %cst_4 : f32
    %cst_5 = arith.constant 1.000000e+00 : f32
    %15 = arith.divf %cst_5, %14 : f32
    %c0_6 = arith.constant 0 : index
    %c0_7 = arith.constant 0 : index
    %16 = vector.load %arg2[%c0_6, %c0_7] : memref<2x8xf32, #tpu.memory_space<vmem>>, vector<2x8xf32>
    %17 = vector.shape_cast %16 : vector<2x8xf32> to vector<2x1x8xf32>
    "tpu.trace_start"() <{level = 10 : i32, message = "bqd,bkd->bqk"}> : () -> ()
    %cst_8 = arith.constant dense<0.000000e+00> : vector<2x8x8xf32>
    %18 = tpu.matmul %7, %10, %cst_8 {dimension_numbers = #tpu.dot_dimension_numbers<[2], [2], [1], [1], [0, 0, 0, 1, 1, 1], [0], [0]>} : vector<2x8x768xbf16>, vector<2x8x768xbf16>, vector<2x8x8xf32> -> vector<2x8x8xf32>
    "tpu.trace_stop"() : () -> ()
    %19 = vector.broadcast %15 : f32 to vector<2x8x8xf32>
    %20 = arith.mulf %18, %19 : vector<2x8x8xf32>
    %21 = vector.broadcast %17 : vector<2x1x8xf32> to vector<2x8x8xf32>
    %22 = arith.addf %20, %21 : vector<2x8x8xf32>
    %cst_9 = arith.constant dense<0xFF800000> : vector<2x8xf32>
    %23 = vector.multi_reduction <maximumf>, %22, %cst_9 [2] : vector<2x8x8xf32> to vector<2x8xf32>
    %24 = vector.shape_cast %23 : vector<2x8xf32> to vector<2x8x1xf32>
    %25 = vector.broadcast %24 : vector<2x8x1xf32> to vector<2x8x8xf32>
    %26 = arith.subf %22, %25 : vector<2x8x8xf32>
    %27 = math.exp %26 : vector<2x8x8xf32>
    %cst_10 = arith.constant dense<0.000000e+00> : vector<2x8xf32>
    %28 = vector.multi_reduction <add>, %27, %cst_10 [2] : vector<2x8x8xf32> to vector<2x8xf32>
    %29 = vector.shape_cast %28 : vector<2x8xf32> to vector<2x8x1xf32>
    %30 = tpu.reciprocal %29 {approx = true} : vector<2x8x1xf32> -> vector<2x8x1xf32>
    %31 = vector.broadcast %30 : vector<2x8x1xf32> to vector<2x8x8xf32>
    %32 = arith.mulf %27, %31 : vector<2x8x8xf32>
    %33 = arith.truncf %32 : vector<2x8x8xf32> to vector<2x8x8xbf16>
    "tpu.trace_start"() <{level = 10 : i32, message = "bqk,bkd->bqd"}> : () -> ()
    %cst_11 = arith.constant dense<0.000000e+00> : vector<2x8x768xf32>
    %34 = tpu.matmul %33, %13, %cst_11 {dimension_numbers = #tpu.dot_dimension_numbers<[2], [1], [1], [2], [0, 0, 0, 1, 1, 2], [0], [0]>} : vector<2x8x8xbf16>, vector<2x8x768xbf16>, vector<2x8x768xf32> -> vector<2x8x768xf32>
    "tpu.trace_stop"() : () -> ()
    %35 = vector.shape_cast %34 : vector<2x8x768xf32> to vector<16x768xf32>
    %36 = arith.truncf %35 : vector<16x768xf32> to vector<16x768xbf16>
    %c0_12 = arith.constant 0 : index
    %c0_13 = arith.constant 0 : index
    %37 = vector.load %arg4[%c0_12, %c0_13] : memref<768x768xbf16, #tpu.memory_space<vmem>>, vector<768x768xbf16>
    %cst_14 = arith.constant dense<0.000000e+00> : vector<16x768xf32>
    %38 = tpu.matmul %36, %37, %cst_14 {dimension_numbers = #tpu.dot_dimension_numbers<[1], [0], [0], [1], [0, 0, 1, 1], [], []>} : vector<16x768xbf16>, vector<768x768xbf16>, vector<16x768xf32> -> vector<16x768xf32>
    %39 = arith.addf %1, %38 : vector<16x768xf32>
    %cst_15 = arith.constant dense<0.000000e+00> : vector<16xf32>
    %40 = vector.multi_reduction <add>, %39, %cst_15 [1] : vector<16x768xf32> to vector<16xf32>
    %41 = vector.shape_cast %40 : vector<16xf32> to vector<16x1xf32>
    %cst_16 = arith.constant 7.680000e+02 : f32
    %42 = vector.broadcast %cst_16 : f32 to vector<16x1xf32>
    %43 = arith.divf %41, %42 : vector<16x1xf32>
    %44 = vector.broadcast %43 : vector<16x1xf32> to vector<16x768xf32>
    %45 = arith.subf %39, %44 : vector<16x768xf32>
    %46 = arith.mulf %45, %45 : vector<16x768xf32>
    %cst_17 = arith.constant dense<0.000000e+00> : vector<16xf32>
    %47 = vector.multi_reduction <add>, %46, %cst_17 [1] : vector<16x768xf32> to vector<16xf32>
    %48 = vector.shape_cast %47 : vector<16xf32> to vector<16x1xf32>
    %cst_18 = arith.constant 7.680000e+02 : f32
    %49 = vector.broadcast %cst_18 : f32 to vector<16x1xf32>
    %50 = arith.divf %48, %49 : vector<16x1xf32>
    %51 = vector.broadcast %43 : vector<16x1xf32> to vector<16x768xf32>
    %52 = arith.subf %39, %51 : vector<16x768xf32>
    %cst_19 = arith.constant 9.99999974E-6 : f32
    %53 = vector.broadcast %cst_19 : f32 to vector<16x1xf32>
    %54 = arith.addf %50, %53 : vector<16x1xf32>
    %55 = math.rsqrt %54 : vector<16x1xf32>
    %56 = vector.broadcast %55 : vector<16x1xf32> to vector<16x768xf32>
    %57 = arith.mulf %52, %56 : vector<16x768xf32>
    %c0_20 = arith.constant 0 : index
    %c0_21 = arith.constant 0 : index
    %58 = vector.load %arg5[%c0_20, %c0_21] : memref<1x768xf32, #tpu.memory_space<vmem>>, vector<1x768xf32>
    %59 = vector.broadcast %58 : vector<1x768xf32> to vector<16x768xf32>
    %60 = arith.mulf %57, %59 : vector<16x768xf32>
    %c0_22 = arith.constant 0 : index
    %c0_23 = arith.constant 0 : index
    %61 = vector.load %arg6[%c0_22, %c0_23] : memref<1x768xf32, #tpu.memory_space<vmem>>, vector<1x768xf32>
    %62 = vector.broadcast %61 : vector<1x768xf32> to vector<16x768xf32>
    %63 = arith.addf %60, %62 : vector<16x768xf32>
    %64 = arith.truncf %63 : vector<16x768xf32> to vector<16x768xbf16>
    %c0_24 = arith.constant 0 : index
    %c0_25 = arith.constant 0 : index
    %65 = vector.load %arg7[%c0_24, %c0_25] : memref<768x128xbf16, #tpu.memory_space<vmem>>, vector<768x128xbf16>
    %cst_26 = arith.constant dense<0.000000e+00> : vector<16x128xf32>
    %66 = tpu.matmul %64, %65, %cst_26 {dimension_numbers = #tpu.dot_dimension_numbers<[1], [0], [0], [1], [0, 0, 1, 1], [], []>} : vector<16x768xbf16>, vector<768x128xbf16>, vector<16x128xf32> -> vector<16x128xf32>
    %c0_27 = arith.constant 0 : index
    %c0_28 = arith.constant 0 : index
    %67 = vector.load %arg8[%c0_27, %c0_28] : memref<1x128xf32, #tpu.memory_space<vmem>>, vector<1x128xf32>
    %68 = vector.broadcast %67 : vector<1x128xf32> to vector<16x128xf32>
    %69 = arith.addf %66, %68 : vector<16x128xf32>
    %70 = vector.shape_cast %69 : vector<16x128xf32> to vector<2x8x128xf32>
    %c0_29 = arith.constant 0 : index
    %c0_30 = arith.constant 0 : index
    %c0_31 = arith.constant 0 : index
    %71 = vector.load %arg9[%c0_29, %c0_30, %c0_31] : memref<2x8x128xf32, #tpu.memory_space<vmem>>, vector<2x8x128xf32>
    tpu.vector_store %arg9[%c0_29, %c0_30, %c0_31], %70 {strides = array<i32>} : memref<2x8x128xf32, #tpu.memory_space<vmem>>, vector<2x8x128xf32>,
    return
  }
  func.func @transform_0(%arg0: i32) -> (i32, i32, i32) {
    %c0_i32 = arith.constant 0 : i32
    %c0_i32_0 = arith.constant 0 : i32
    %c0_i32_1 = arith.constant 0 : i32
    return %arg0, %c0_i32, %c0_i32_0 : i32, i32, i32
  }
  func.func @transform_1(%arg0: i32) -> (i32, i32) {
    %c0_i32 = arith.constant 0 : i32
    %c0_i32_0 = arith.constant 0 : i32
    return %arg0, %c0_i32 : i32, i32
  }
  func.func @transform_2(%arg0: i32) -> (i32, i32) {
    %c0_i32 = arith.constant 0 : i32
    %c0_i32_0 = arith.constant 0 : i32
    %c0_i32_1 = arith.constant 0 : i32
    return %c0_i32, %c0_i32_0 : i32, i32
  }
  func.func @transform_3(%arg0: i32) -> (i32, i32) {
    %c0_i32 = arith.constant 0 : i32
    %c0_i32_0 = arith.constant 0 : i32
    %c0_i32_1 = arith.constant 0 : i32
    return %c0_i32, %c0_i32_0 : i32, i32
  }
  func.func @transform_4(%arg0: i32) -> (i32, i32) {
    %c0_i32 = arith.constant 0 : i32
    %c0_i32_0 = arith.constant 0 : i32
    %c0_i32_1 = arith.constant 0 : i32
    return %c0_i32, %c0_i32_0 : i32, i32
  }
  func.func @transform_5(%arg0: i32) -> (i32, i32) {
    %c0_i32 = arith.constant 0 : i32
    %c0_i32_0 = arith.constant 0 : i32
    %c0_i32_1 = arith.constant 0 : i32
    return %c0_i32, %c0_i32_0 : i32, i32
  }
  func.func @transform_6(%arg0: i32) -> (i32, i32) {
    %c0_i32 = arith.constant 0 : i32
    %c0_i32_0 = arith.constant 0 : i32
    %c0_i32_1 = arith.constant 0 : i32
    return %c0_i32, %c0_i32_0 : i32, i32
  }
  func.func @transform_7(%arg0: i32) -> (i32, i32) {
    %c0_i32 = arith.constant 0 : i32
    %c0_i32_0 = arith.constant 0 : i32
    %c0_i32_1 = arith.constant 0 : i32
    return %c0_i32, %c0_i32_0 : i32, i32
  }
  func.func @transform_8(%arg0: i32) -> (i32, i32, i32) {
    %c0_i32 = arith.constant 0 : i32
    %c0_i32_0 = arith.constant 0 : i32
    %c0_i32_1 = arith.constant 0 : i32
    return %arg0, %c0_i32, %c0_i32_0 : i32, i32, i32
  }
}

</mosaic_0001>

<bundles_post_ra>
// kernel: my_model_forward.1
= control target key start
LH: loop header
LB: loop body
LE: loop exit
PB: predicated region body
PF: predicated region fallthrough
CT: control target
= control target key end

     0   :  { %vm6735_vm0 = vcmask 1043456   ;;  %vm6707_vm1 = vcmask 64512   ;;  %s17100_s2 = inlined_call_operand.vmem [shape: bf16[768,2304], index: 2, kind: input, shape index: {}]   ;;  %s17101_s0 = inlined_call_operand.vmem [shape: f32[2,8,768], index: 0, kind: input, shape index: {}]   ;;  %s17102_s1 = inlined_call_operand.vmem [shape: f32[2,8], index: 1, kind: input, shape index: {}]   ;;  %s17103_s3 = inlined_call_operand.vmem [shape: bf16[768,768], index: 3, kind: input, shape index: {}]   ;;  %s17104_s6 = inlined_call_operand.vmem [shape: bf16[768,128], index: 6, kind: input, shape index: {}]   ;;  %s17105_s4 = inlined_call_operand.vmem [shape: f32[1,768], index: 4, kind: input, shape index: {}]   ;;  %s17106_s5 = inlined_call_operand.vmem [shape: f32[1,768], index: 5, kind: input, shape index: {}]   ;;  %s17107_s7 = inlined_call_operand.vmem [shape: f32[1,128], index: 7, kind: input, shape index: {}]   ;;  %s17108_s8 = inlined_call_operand.vmem [shape: f32[2,8,128], index: 8, kind: output, shape index: {}]  }
   0x1   :  { %v11235_v0 = vld [vmem:[%s17100_s2 + $0x4] ss:$72 sps:$4 sm:$0xff]   ;;  %v11239_v2 = vld [vmem:[%s17100_s2] ss:$72 sps:$4 sm:$0xff]   ;;  %v11241_v4 = vld [vmem:[%s17100_s2 + $0x94] ss:$72 sps:$4 sm:$0xff]  }
   0x2   :  { %v11237_v1 = vld [vmem:[%s17100_s2 + $0xc] ss:$72 sps:$4 sm:$0xff]   ;;  %5232 = vmatprep.subr.bf16.mxu0 %v11235_v0  ;;  %v11240_v3 = vld [vmem:[%s17100_s2 + $0x8] ss:$72 sps:$4 sm:$0xff]   ;;  %v11243_v5 = vld [vmem:[%s17100_s2 + $0x9c] ss:$72 sps:$4 sm:$0xff]  }
   0x3   :  { %5361 = vmatprep.subr.bf16.mxu1 %v11237_v1  ;;  %5233 = vmatpush1.bf16.msra.mxu0 %v11239_v2  ;;  %v11245_v6 = vld [vmem:[%s17100_s2 + $0x90] ss:$72 sps:$4 sm:$0xff]   ;;  %v11247_v8 = vld [vmem:[%s17100_s2 + $0x124] ss:$72 sps:$4 sm:$0xff]   ;;  %v11251_v10 = vld [vmem:[%s17100_s2 + $0x120] ss:$72 sps:$4 sm:$0xff]  }
   0x4   :  { %5362 = vmatpush1.bf16.msra.mxu1 %v11240_v3  ;;  %5234 = vmatprep.subr.bf16.mxu0 %v11241_v4  ;;  %v11246_v7 = vld [vmem:[%s17100_s2 + $0x98] ss:$72 sps:$4 sm:$0xff]   ;;  %v11249_v9 = vld [vmem:[%s17100_s2 + $0x12c] ss:$72 sps:$4 sm:$0xff]   ;;  %v11252_v11 = vld [vmem:[%s17100_s2 + $0x128] ss:$72 sps:$4 sm:$0xff]  }
   0x5   :  { %5363 = vmatprep.subr.bf16.mxu1 %v11243_v5  ;;  %v11253_v12 = vld [vmem:[%s17100_s2 + $0x1b4] ss:$72 sps:$4 sm:$0xff]   ;;  %v11257_v14 = vld [vmem:[%s17100_s2 + $0x1b0] ss:$72 sps:$4 sm:$0xff]   ;;  %v11259_v16 = vld [vmem:[%s17100_s2 + $0x244] ss:$72 sps:$4 sm:$0xff]  }
   0x6   :  { %v11255_v13 = vld [vmem:[%s17100_s2 + $0x1bc] ss:$72 sps:$4 sm:$0xff]   ;;  %v11258_v15 = vld [vmem:[%s17100_s2 + $0x1b8] ss:$72 sps:$4 sm:$0xff]   ;;  %v11261_v17 = vld [vmem:[%s17100_s2 + $0x24c] ss:$72 sps:$4 sm:$0xff]  }
   0x7   :  { %5235 = vmatpush1.bf16.msra.mxu0 %v11245_v6  ;;  %v11263_v18 = vld [vmem:[%s17100_s2 + $0x240] ss:$72 sps:$4 sm:$0xff]   ;;  %v11265_v20 = vld [vmem:[%s17100_s2 + $0x2d4] ss:$72 sps:$4 sm:$0xff]   ;;  %v11269_v22 = vld [vmem:[%s17100_s2 + $0x2d0] ss:$72 sps:$4 sm:$0xff]  }
   0x8   :  { %5364 = vmatpush1.bf16.msra.mxu1 %v11246_v7  ;;  %5236 = vmatprep.subr.bf16.mxu0 %v11247_v8  ;;  %v11264_v19 = vld [vmem:[%s17100_s2 + $0x248] ss:$72 sps:$4 sm:$0xff]   ;;  %v11267_v21 = vld [vmem:[%s17100_s2 + $0x2dc] ss:$72 sps:$4 sm:$0xff]   ;;  %v11270_v23 = vld [vmem:[%s17100_s2 + $0x2d8] ss:$72 sps:$4 sm:$0xff]  }
   0x9   :  { %5365 = vmatprep.subr.bf16.mxu1 %v11249_v9  ;;  %v11271_v24 = vld [vmem:[%s17100_s2 + $0x364] ss:$72 sps:$4 sm:$0xff]   ;;  %v11275_v26 = vld [vmem:[%s17100_s2 + $0x360] ss:$72 sps:$4 sm:$0xff]   ;;  %v11277_v28 = vld [vmem:[%s17100_s2 + $0x3f4] ss:$72 sps:$4 sm:$0xff]  }
   0xa   :  { %v11273_v25 = vld [vmem:[%s17100_s2 + $0x36c] ss:$72 sps:$4 sm:$0xff]   ;;  %v11276_v27 = vld [vmem:[%s17100_s2 + $0x368] ss:$72 sps:$4 sm:$0xff]   ;;  %v11279_v29 = vld [vmem:[%s17100_s2 + $0x3fc] ss:$72 sps:$4 sm:$0xff]  }
   0xb   :  { %5237 = vmatpush1.bf16.msra.mxu0 %v11251_v10  ;;  %v11281_v30 = vld [vmem:[%s17100_s2 + $0x3f0] ss:$72 sps:$4 sm:$0xff]   ;;  %v11283_v32 = vld [vmem:[%s17100_s2 + $0x484] ss:$72 sps:$4 sm:$0xff]   ;;  %v11287_v34 = vld [vmem:[%s17100_s2 + $0x480] ss:$72 sps:$4 sm:$0xff]  }
   0xc   :  { %5366 = vmatpush1.bf16.msra.mxu1 %v11252_v11  ;;  %5238 = vmatprep.subr.bf16.mxu0 %v11253_v12  ;;  %v11282_v31 = vld [vmem:[%s17100_s2 + $0x3f8] ss:$72 sps:$4 sm:$0xff]   ;;  %v11285_v33 = vld [vmem:[%s17100_s2 + $0x48c] ss:$72 sps:$4 sm:$0xff]   ;;  %v11288_v35 = vld [vmem:[%s17100_s2 + $0x488] ss:$72 sps:$4 sm:$0xff]  }
   0xd   :  { %5367 = vmatprep.subr.bf16.mxu1 %v11255_v13  ;;  %v11289_v36 = vld [vmem:[%s17100_s2 + $0x514] ss:$72 sps:$4 sm:$0xff]   ;;  %v11293_v38 = vld [vmem:[%s17100_s2 + $0x510] ss:$72 sps:$4 sm:$0xff]   ;;  %v11295_v40 = vld [vmem:[%s17100_s2 + $0x5a4] ss:$72 sps:$4 sm:$0xff]  }
   0xe   :  { %v11291_v37 = vld [vmem:[%s17100_s2 + $0x51c] ss:$72 sps:$4 sm:$0xff]   ;;  %v11294_v39 = vld [vmem:[%s17100_s2 + $0x518] ss:$72 sps:$4 sm:$0xff]   ;;  %v11297_v41 = vld [vmem:[%s17100_s2 + $0x5ac] ss:$72 sps:$4 sm:$0xff]  }
   0xf   :  { %5239 = vmatpush1.bf16.msra.mxu0 %v11257_v14  ;;  %v11299_v42 = vld [vmem:[%s17100_s2 + $0x5a0] ss:$72 sps:$4 sm:$0xff]   ;;  %v11301_v44 = vld [vmem:[%s17100_s2 + $0x634] ss:$72 sps:$4 sm:$0xff]   ;;  %v11305_v48 = vld [vmem:[%s17100_s2 + $0x630] ss:$72 sps:$4 sm:$0xff]  }
  0x10   :  { %5368 = vmatpush1.bf16.msra.mxu1 %v11258_v15  ;;  %5240 = vmatprep.subr.bf16.mxu0 %v11259_v16  ;;  %v11300_v43 = vld [vmem:[%s17100_s2 + $0x5a8] ss:$72 sps:$4 sm:$0xff]   ;;  %v11303_v45 = vld [vmem:[%s17100_s2 + $0x63c] ss:$72 sps:$4 sm:$0xff]   ;;  %v11306_v49 = vld [vmem:[%s17100_s2 + $0x638] ss:$72 sps:$4 sm:$0xff]  }
  0x11   :  { %5369 = vmatprep.subr.bf16.mxu1 %v11261_v17  ;;  %v31_v46 = vld [vmem:[%s17101_s0 + $0x8] sm:$0xff]  ;;  %v37_v47 = vld [vmem:[%s17101_s0 + $0x38] sm:$0xff]  ;;  %v30_v4 = vld [vmem:[%s17101_s0] sm:$0xff] }
  0x12   :  { %v13232_v50 = vpack.c.bf16 %v37_v47, %v31_v46  ;;  %v11307_v51 = vld [vmem:[%s17100_s2 + $0x6c4] ss:$72 sps:$4 sm:$0xff]   ;;  %v11311_v53 = vld [vmem:[%s17100_s2 + $0x6c0] ss:$72 sps:$4 sm:$0xff]   ;;  %v11313_v55 = vld [vmem:[%s17100_s2 + $0x754] ss:$72 sps:$4 sm:$0xff]  }
  0x13   :  { %5241 = vmatpush1.bf16.msra.mxu0 %v11263_v18  ;;  %v11309_v52 = vld [vmem:[%s17100_s2 + $0x6cc] ss:$72 sps:$4 sm:$0xff]   ;;  %v11312_v54 = vld [vmem:[%s17100_s2 + $0x6c8] ss:$72 sps:$4 sm:$0xff]   ;;  %v11315_v56 = vld [vmem:[%s17100_s2 + $0x75c] ss:$72 sps:$4 sm:$0xff]  }
  0x14   :  { %5370 = vmatpush1.bf16.msra.mxu1 %v11264_v19  ;;  %5242 = vmatprep.subr.bf16.mxu0 %v11265_v20  ;;  %v11317_v57 = vld [vmem:[%s17100_s2 + $0x750] ss:$72 sps:$4 sm:$0xff]   ;;  %v11319_v59 = vld [vmem:[%s17100_s2 + $0x7e4] ss:$72 sps:$4 sm:$0xff]   ;;  %v11323_v61 = vld [vmem:[%s17100_s2 + $0x7e0] ss:$72 sps:$4 sm:$0xff]  }
  0x15   :  { %5371 = vmatprep.subr.bf16.mxu1 %v11267_v21  ;;  %5264 = vmatprep.mubr.bf16.mxu0 %v13232_v50  ;;  %v11318_v58 = vld [vmem:[%s17100_s2 + $0x758] ss:$72 sps:$4 sm:$0xff]   ;;  %v11321_v60 = vld [vmem:[%s17100_s2 + $0x7ec] ss:$72 sps:$4 sm:$0xff]   ;;  %v11324_v62 = vld [vmem:[%s17100_s2 + $0x7e8] ss:$72 sps:$4 sm:$0xff]  }
  0x16   :  { %5393 = vmatprep.mubr.bf16.mxu1 %v13232_v50  ;;  %v11325_v63 = vld [vmem:[%s17100_s2 + $0x874] ss:$72 sps:$4 sm:$0xff]   ;;  %v11329_v1 = vld [vmem:[%s17100_s2 + $0x870] ss:$72 sps:$4 sm:$0xff]   ;;  %v11333_v3 = vld [vmem:[%s17100_s2 + $0x904] ss:$72 sps:$4 sm:$0xff]  }
  0x17   :  { %5243 = vmatpush1.bf16.msra.mxu0 %v11269_v22  ;;  %v11327_v0 = vld [vmem:[%s17100_s2 + $0x87c] ss:$72 sps:$4 sm:$0xff]   ;;  %v11330_v2 = vld [vmem:[%s17100_s2 + $0x878] ss:$72 sps:$4 sm:$0xff]   ;;  %v36_v5 = vld [vmem:[%s17101_s0 + $0x30] sm:$0xff] }
  0x18   :  { %5372 = vmatpush1.bf16.msra.mxu1 %v11270_v23  ;;  %5244 = vmatprep.subr.bf16.mxu0 %v11271_v24  ;;  %v11336_v6 = vld [vmem:[%s17100_s2 + $0x90c] ss:$72 sps:$4 sm:$0xff]   ;;  %v11331_v7 = vld [vmem:[%s17100_s2 + $0x900] ss:$72 sps:$4 sm:$0xff]   ;;  %v13302_v9 = vpack.c.bf16 %v36_v5, %v30_v4  ;;  %v11342_v11 = vld [vmem:[%s17100_s2 + $0x99c] ss:$72 sps:$4 sm:$0xff]  }
  0x19   :  { %5373 = vmatprep.subr.bf16.mxu1 %v11273_v25  ;;  %v11334_v8 = vld [vmem:[%s17100_s2 + $0x908] ss:$72 sps:$4 sm:$0xff]   ;;  %v11339_v10 = vld [vmem:[%s17100_s2 + $0x994] ss:$72 sps:$4 sm:$0xff]   ;;  %v11340_v13 = vld [vmem:[%s17100_s2 + $0x998] ss:$72 sps:$4 sm:$0xff]  }
  0x1a   :  { %v11337_v12 = vld [vmem:[%s17100_s2 + $0x990] ss:$72 sps:$4 sm:$0xff]   ;;  %v11345_v14 = vld [vmem:[%s17100_s2 + $0xa24] ss:$72 sps:$4 sm:$0xff]   ;;  %v11343_v16 = vld [vmem:[%s17100_s2 + $0xa20] ss:$72 sps:$4 sm:$0xff]  }
  0x1b   :  { %5245 = vmatpush1.bf16.msra.mxu0 %v11275_v26  ;;  %v11348_v15 = vld [vmem:[%s17100_s2 + $0xa2c] ss:$72 sps:$4 sm:$0xff]   ;;  %v11346_v17 = vld [vmem:[%s17100_s2 + $0xa28] ss:$72 sps:$4 sm:$0xff]   ;;  %v11354_v19 = vld [vmem:[%s17100_s2 + $0xabc] ss:$72 sps:$4 sm:$0xff]  }
  0x1c   :  { %5374 = vmatpush1.bf16.msra.mxu1 %v11276_v27  ;;  %5246 = vmatprep.subr.bf16.mxu0 %v11277_v28  ;;  %v11351_v18 = vld [vmem:[%s17100_s2 + $0xab4] ss:$72 sps:$4 sm:$0xff]   ;;  %v11349_v20 = vld [vmem:[%s17100_s2 + $0xab0] ss:$72 sps:$4 sm:$0xff]   ;;  %v11357_v22 = vld [vmem:[%s17100_s2 + $0xb44] ss:$72 sps:$4 sm:$0xff]  }
  0x1d   :  { %5375 = vmatprep.subr.bf16.mxu1 %v11279_v29  ;;  %v11352_v21 = vld [vmem:[%s17100_s2 + $0xab8] ss:$72 sps:$4 sm:$0xff]   ;;  %v11360_v23 = vld [vmem:[%s17100_s2 + $0xb4c] ss:$72 sps:$4 sm:$0xff]   ;;  %v11358_v25 = vld [vmem:[%s17100_s2 + $0xb48] ss:$72 sps:$4 sm:$0xff]  }
  0x1e   :  { %v11355_v24 = vld [vmem:[%s17100_s2 + $0xb40] ss:$72 sps:$4 sm:$0xff]   ;;  %v11363_v26 = vld [vmem:[%s17100_s2 + $0xbd4] ss:$72 sps:$4 sm:$0xff]   ;;  %v11361_v28 = vld [vmem:[%s17100_s2 + $0xbd0] ss:$72 sps:$4 sm:$0xff]  }
  0x1f   :  { %5247 = vmatpush1.bf16.msra.mxu0 %v11281_v30  ;;  %v11366_v27 = vld [vmem:[%s17100_s2 + $0xbdc] ss:$72 sps:$4 sm:$0xff]   ;;  %v11364_v29 = vld [vmem:[%s17100_s2 + $0xbd8] ss:$72 sps:$4 sm:$0xff]   ;;  %v11418_v5 = vld [vmem:[%s17100_s2 + $0x10e8] ss:$72 sps:$4 sm:$0xff]  }
  0x20   :  { %5376 = vmatpush1.bf16.msra.mxu1 %v11282_v31  ;;  %5248 = vmatprep.subr.bf16.mxu0 %v11283_v32  ;;  %v11369_v30 = vld [vmem:[%s17100_s2 + $0xc64] ss:$72 sps:$4 sm:$0xff]   ;;  %v33_v32 = vld [vmem:[%s17101_s0 + $0x18] sm:$0xff]  ;;  %v11415_v4 = vld [vmem:[%s17100_s2 + $0x10e0] ss:$72 sps:$4 sm:$0xff]  }
  0x21   :  { %5377 = vmatprep.subr.bf16.mxu1 %v11285_v33  ;;  %v11372_v31 = vld [vmem:[%s17100_s2 + $0xc6c] ss:$72 sps:$4 sm:$0xff]   ;;  %v11390_v46 = vld [vmem:[%s17100_s2 + $0xe1c] ss:$72 sps:$4 sm:$0xff]   ;;  %v11385_v47 = vld [vmem:[%s17100_s2 + $0xe10] ss:$72 sps:$4 sm:$0xff]  }
  0x22   :  { %v39_v33 = vld [vmem:[%s17101_s0 + $0x48] sm:$0xff] }
  0x23   :  { %5249 = vmatpush1.bf16.msra.mxu0 %v11287_v34  ;;  %v11367_v34 = vld [vmem:[%s17100_s2 + $0xc60] ss:$72 sps:$4 sm:$0xff]  }
  0x24   :  { %5378 = vmatpush1.bf16.msra.mxu1 %v11288_v35  ;;  %5250 = vmatprep.subr.bf16.mxu0 %v11289_v36  ;;  %v11370_v35 = vld [vmem:[%s17100_s2 + $0xc68] ss:$72 sps:$4 sm:$0xff]   ;;  %v13384_v36 = vpack.c.bf16 %v39_v33, %v33_v32  ;;  %v11448_v32 = vld [vmem:[%s17100_s2 + $0x13b8] ss:$72 sps:$4 sm:$0xff]   ;;  %v11453_v33 = vld [vmem:[%s17100_s2 + $0x1444] ss:$72 sps:$4 sm:$0xff]  }
  0x25   :  { %5379 = vmatprep.subr.bf16.mxu1 %v11291_v37  ;;  %v11375_v37 = vld [vmem:[%s17100_s2 + $0xcf4] ss:$72 sps:$4 sm:$0xff]  }
  0x27   :  { %5251 = vmatpush1.bf16.msra.mxu0 %v11293_v38  ;;  %v11378_v38 = vld [vmem:[%s17100_s2 + $0xcfc] ss:$72 sps:$4 sm:$0xff]  }
  0x28   :  { %5380 = vmatpush1.bf16.msra.mxu1 %v11294_v39  ;;  %5252 = vmatprep.subr.bf16.mxu0 %v11295_v40  ;;  %v11373_v39 = vld [vmem:[%s17100_s2 + $0xcf0] ss:$72 sps:$4 sm:$0xff]  }
  0x29   :  { %5381 = vmatprep.subr.bf16.mxu1 %v11297_v41  ;;  %v11376_v40 = vld [vmem:[%s17100_s2 + $0xcf8] ss:$72 sps:$4 sm:$0xff]   ;;  %v11381_v41 = vld [vmem:[%s17100_s2 + $0xd84] ss:$72 sps:$4 sm:$0xff]  }
  0x2b   :  { %5253 = vmatpush1.bf16.msra.mxu0 %v11299_v42  ;;  %v11384_v42 = vld [vmem:[%s17100_s2 + $0xd8c] ss:$72 sps:$4 sm:$0xff]  }
  0x2c   :  { %5382 = vmatpush1.bf16.msra.mxu1 %v11300_v43  ;;  %5254 = vmatprep.subr.bf16.mxu0 %v11301_v44  ;;  %v11379_v43 = vld [vmem:[%s17100_s2 + $0xd80] ss:$72 sps:$4 sm:$0xff]  }
  0x2d   :  { %5383 = vmatprep.subr.bf16.mxu1 %v11303_v45  ;;  %v11382_v44 = vld [vmem:[%s17100_s2 + $0xd88] ss:$72 sps:$4 sm:$0xff]   ;;  %v11387_v45 = vld [vmem:[%s17100_s2 + $0xe14] ss:$72 sps:$4 sm:$0xff]  }
  0x2f   :  { %5255 = vmatpush1.bf16.msra.mxu0 %v11305_v48  ;;  %v11388_v48 = vld [vmem:[%s17100_s2 + $0xe18] ss:$72 sps:$4 sm:$0xff]  }
  0x30   :  { %5384 = vmatpush1.bf16.msra.mxu1 %v11306_v49  ;;  %5256 = vmatprep.subr.bf16.mxu0 %v11307_v51  ;;  %v11393_v49 = vld [vmem:[%s17100_s2 + $0xea4] ss:$72 sps:$4 sm:$0xff]  }
  0x31   :  { %5385 = vmatprep.subr.bf16.mxu1 %v11309_v52  ;;  %v11396_v51 = vld [vmem:[%s17100_s2 + $0xeac] ss:$72 sps:$4 sm:$0xff]   ;;  %v11391_v52 = vld [vmem:[%s17100_s2 + $0xea0] ss:$72 sps:$4 sm:$0xff]  }
  0x33   :  { %5257 = vmatpush1.bf16.msra.mxu0 %v11311_v53  ;;  %v11394_v53 = vld [vmem:[%s17100_s2 + $0xea8] ss:$72 sps:$4 sm:$0xff]  }
  0x34   :  { %5386 = vmatpush1.bf16.msra.mxu1 %v11312_v54  ;;  %5258 = vmatprep.subr.bf16.mxu0 %v11313_v55  ;;  %v11399_v54 = vld [vmem:[%s17100_s2 + $0xf34] ss:$72 sps:$4 sm:$0xff]  }
  0x35   :  { %5387 = vmatprep.subr.bf16.mxu1 %v11315_v56  ;;  %v11402_v55 = vld [vmem:[%s17100_s2 + $0xf3c] ss:$72 sps:$4 sm:$0xff]   ;;  %v11397_v56 = vld [vmem:[%s17100_s2 + $0xf30] ss:$72 sps:$4 sm:$0xff]  }
  0x37   :  { %5259 = vmatpush1.bf16.msra.mxu0 %v11317_v57  ;;  %v11400_v57 = vld [vmem:[%s17100_s2 + $0xf38] ss:$72 sps:$4 sm:$0xff]  }
  0x38   :  { %5388 = vmatpush1.bf16.msra.mxu1 %v11318_v58  ;;  %5260 = vmatprep.subr.bf16.mxu0 %v11319_v59  ;;  %v11405_v58 = vld [vmem:[%s17100_s2 + $0xfc4] ss:$72 sps:$4 sm:$0xff]  }
  0x39   :  { %5389 = vmatprep.subr.bf16.mxu1 %v11321_v60  ;;  %v11408_v59 = vld [vmem:[%s17100_s2 + $0xfcc] ss:$72 sps:$4 sm:$0xff]   ;;  %v11403_v60 = vld [vmem:[%s17100_s2 + $0xfc0] ss:$72 sps:$4 sm:$0xff]  }
  0x3b   :  { %5261 = vmatpush1.bf16.msra.mxu0 %v11323_v61  ;;  %v11406_v61 = vld [vmem:[%s17100_s2 + $0xfc8] ss:$72 sps:$4 sm:$0xff]  }
  0x3c   :  { %5390 = vmatpush1.bf16.msra.mxu1 %v11324_v62  ;;  %5262 = vmatprep.subr.bf16.mxu0 %v11325_v63  ;;  %v11411_v62 = vld [vmem:[%s17100_s2 + $0x1054] ss:$72 sps:$4 sm:$0xff]  }
  0x3d   :  { %5391 = vmatprep.subr.bf16.mxu1 %v11327_v0  ;;  %v11414_v63 = vld [vmem:[%s17100_s2 + $0x105c] ss:$72 sps:$4 sm:$0xff]   ;;  %v11409_v0 = vld [vmem:[%s17100_s2 + $0x1050] ss:$72 sps:$4 sm:$0xff]  }
  0x3f   :  { %5263 = vmatpush1.bf16.msra.mxu0 %v11329_v1  ;;  %v11412_v1 = vld [vmem:[%s17100_s2 + $0x1058] ss:$72 sps:$4 sm:$0xff]  }
  0x40   :  { %5392 = vmatpush1.bf16.msra.mxu1 %v11330_v2  ;;  %5275 = vmatprep.subr.bf16.mxu0 %v11333_v3  ;;  %v11417_v2 = vld [vmem:[%s17100_s2 + $0x10e4] ss:$72 sps:$4 sm:$0xff]  }
  0x41   :  { %5404 = vmatprep.subr.bf16.mxu1 %v11336_v6  ;;  %v11420_v3 = vld [vmem:[%s17100_s2 + $0x10ec] ss:$72 sps:$4 sm:$0xff]  }
  0x42   :  { %5265 = vmatmul.mubr.bf16.vlgmr.msra.gmra.mrb[0].mxu0 %v13302_v9  ;;  %v11423_v6 = vld [vmem:[%s17100_s2 + $0x1174] ss:$72 sps:$4 sm:$0xff]  }
  0x43   :  { %5394 = vmatmul.mubr.bf16.vlgmr.msra.gmra.mrb[0].mxu1 %v13302_v9  ;;  %5276 = vmatpush1.bf16.msra.mxu0 %v11331_v7  ;;  %v11426_v7 = vld [vmem:[%s17100_s2 + $0x117c] ss:$72 sps:$4 sm:$0xff]  }
  0x44   :  { %5405 = vmatpush1.bf16.msra.mxu1 %v11334_v8  ;;  %5277 = vmatprep.subr.bf16.mxu0 %v11339_v10  ;;  %v11421_v8 = vld [vmem:[%s17100_s2 + $0x1170] ss:$72 sps:$4 sm:$0xff]  }
  0x45   :  { %5406 = vmatprep.subr.bf16.mxu1 %v11342_v11  ;;  %5307 = vmatprep.mubr.bf16.mxu0 %v13384_v36  ;;  %v11424_v10 = vld [vmem:[%s17100_s2 + $0x1178] ss:$72 sps:$4 sm:$0xff]   ;;  %v11429_v11 = vld [vmem:[%s17100_s2 + $0x1204] ss:$72 sps:$4 sm:$0xff]  }
  0x46   :  { %5436 = vmatprep.mubr.bf16.mxu1 %v13384_v36 }
  0x47   :  { %5278 = vmatpush1.bf16.msra.mxu0 %v11337_v12  ;;  %v32_v12 = vld [vmem:[%s17101_s0 + $0x10] sm:$0xff] }
  0x48   :  { %5407 = vmatpush1.bf16.msra.mxu1 %v11340_v13  ;;  %5279 = vmatprep.subr.bf16.mxu0 %v11345_v14  ;;  %v38_v13 = vld [vmem:[%s17101_s0 + $0x40] sm:$0xff]  ;;  %v11432_v14 = vld [vmem:[%s17100_s2 + $0x120c] ss:$72 sps:$4 sm:$0xff]  }
  0x49   :  { %5408 = vmatprep.subr.bf16.mxu1 %v11348_v15  ;;  %v11427_v15 = vld [vmem:[%s17100_s2 + $0x1200] ss:$72 sps:$4 sm:$0xff]  }
  0x4b   :  { %5280 = vmatpush1.bf16.msra.mxu0 %v11343_v16  ;;  %v11430_v16 = vld [vmem:[%s17100_s2 + $0x1208] ss:$72 sps:$4 sm:$0xff]  }
  0x4c   :  { %5409 = vmatpush1.bf16.msra.mxu1 %v11346_v17  ;;  %5281 = vmatprep.subr.bf16.mxu0 %v11351_v18  ;;  %v13514_v17 = vpack.c.bf16 %v38_v13, %v32_v12  ;;  %v11435_v18 = vld [vmem:[%s17100_s2 + $0x1294] ss:$72 sps:$4 sm:$0xff]   ;;  %v11513_v12 = vld [vmem:[%s17100_s2 + $0x19e4] ss:$72 sps:$4 sm:$0xff]  }
  0x4d   :  { %5410 = vmatprep.subr.bf16.mxu1 %v11354_v19  ;;  %v11438_v19 = vld [vmem:[%s17100_s2 + $0x129c] ss:$72 sps:$4 sm:$0xff]   ;;  %v11516_v13 = vld [vmem:[%s17100_s2 + $0x19ec] ss:$72 sps:$4 sm:$0xff]  }
  0x4f   :  { %5282 = vmatpush1.bf16.msra.mxu0 %v11349_v20  ;;  %v35_v20 = vld [vmem:[%s17101_s0 + $0x28] sm:$0xff] }
  0x50   :  { %5411 = vmatpush1.bf16.msra.mxu1 %v11352_v21  ;;  %5283 = vmatprep.subr.bf16.mxu0 %v11357_v22  ;;  %v11433_v21 = vld [vmem:[%s17100_s2 + $0x1290] ss:$72 sps:$4 sm:$0xff]  }
  0x51   :  { %5412 = vmatprep.subr.bf16.mxu1 %v11360_v23  ;;  %v11436_v22 = vld [vmem:[%s17100_s2 + $0x1298] ss:$72 sps:$4 sm:$0xff]  }
  0x52   :  { %v41_v23 = vld [vmem:[%s17101_s0 + $0x58] sm:$0xff] }
  0x53   :  { %5284 = vmatpush1.bf16.msra.mxu0 %v11355_v24  ;;  %v11441_v24 = vld [vmem:[%s17100_s2 + $0x1324] ss:$72 sps:$4 sm:$0xff]  }
  0x54   :  { %5413 = vmatpush1.bf16.msra.mxu1 %v11358_v25  ;;  %5285 = vmatprep.subr.bf16.mxu0 %v11363_v26  ;;  %v13539_v25 = vpack.c.bf16 %v41_v23, %v35_v20  ;;  %v11444_v26 = vld [vmem:[%s17100_s2 + $0x132c] ss:$72 sps:$4 sm:$0xff]   ;;  %v11520_v20 = vld [vmem:[%s17100_s2 + $0x1a78] ss:$72 sps:$4 sm:$0xff]  }
  0x55   :  { %5414 = vmatprep.subr.bf16.mxu1 %v11366_v27  ;;  %v11439_v27 = vld [vmem:[%s17100_s2 + $0x1320] ss:$72 sps:$4 sm:$0xff]   ;;  %v11525_v23 = vld [vmem:[%s17100_s2 + $0x14] ss:$72 sps:$4 sm:$0xff]  }
  0x57   :  { %5286 = vmatpush1.bf16.msra.mxu0 %v11361_v28  ;;  %v11442_v28 = vld [vmem:[%s17100_s2 + $0x1328] ss:$72 sps:$4 sm:$0xff]  }
  0x58   :  { %5415 = vmatpush1.bf16.msra.mxu1 %v11364_v29  ;;  %5287 = vmatprep.subr.bf16.mxu0 %v11369_v30  ;;  %v11447_v29 = vld [vmem:[%s17100_s2 + $0x13b4] ss:$72 sps:$4 sm:$0xff]  }
  0x59   :  { %5416 = vmatprep.subr.bf16.mxu1 %v11372_v31  ;;  %v11450_v30 = vld [vmem:[%s17100_s2 + $0x13bc] ss:$72 sps:$4 sm:$0xff]   ;;  %v11445_v31 = vld [vmem:[%s17100_s2 + $0x13b0] ss:$72 sps:$4 sm:$0xff]  }
  0x5b   :  { %5288 = vmatpush1.bf16.msra.mxu0 %v11367_v34  ;;  %v11456_v34 = vld [vmem:[%s17100_s2 + $0x144c] ss:$72 sps:$4 sm:$0xff]  }
  0x5c   :  { %5417 = vmatpush1.bf16.msra.mxu1 %v11370_v35  ;;  %5289 = vmatprep.subr.bf16.mxu0 %v11375_v37  ;;  %v11451_v35 = vld [vmem:[%s17100_s2 + $0x1440] ss:$72 sps:$4 sm:$0xff]  }
  0x5d   :  { %5418 = vmatprep.subr.bf16.mxu1 %v11378_v38  ;;  %v11454_v37 = vld [vmem:[%s17100_s2 + $0x1448] ss:$72 sps:$4 sm:$0xff]   ;;  %v11459_v38 = vld [vmem:[%s17100_s2 + $0x14d4] ss:$72 sps:$4 sm:$0xff]  }
  0x5f   :  { %5290 = vmatpush1.bf16.msra.mxu0 %v11373_v39  ;;  %v11462_v39 = vld [vmem:[%s17100_s2 + $0x14dc] ss:$72 sps:$4 sm:$0xff]  }
  0x60   :  { %5419 = vmatpush1.bf16.msra.mxu1 %v11376_v40  ;;  %5291 = vmatprep.subr.bf16.mxu0 %v11381_v41  ;;  %v11457_v40 = vld [vmem:[%s17100_s2 + $0x14d0] ss:$72 sps:$4 sm:$0xff]  }
  0x61   :  { %5420 = vmatprep.subr.bf16.mxu1 %v11384_v42  ;;  %v11460_v41 = vld [vmem:[%s17100_s2 + $0x14d8] ss:$72 sps:$4 sm:$0xff]   ;;  %v11465_v42 = vld [vmem:[%s17100_s2 + $0x1564] ss:$72 sps:$4 sm:$0xff]  }
  0x63   :  { %5292 = vmatpush1.bf16.msra.mxu0 %v11379_v43  ;;  %v11468_v43 = vld [vmem:[%s17100_s2 + $0x156c] ss:$72 sps:$4 sm:$0xff]  }
  0x64   :  { %5421 = vmatpush1.bf16.msra.mxu1 %v11382_v44  ;;  %5293 = vmatprep.subr.bf16.mxu0 %v11387_v45  ;;  %v11463_v44 = vld [vmem:[%s17100_s2 + $0x1560] ss:$72 sps:$4 sm:$0xff]  }
  0x65   :  { %5422 = vmatprep.subr.bf16.mxu1 %v11390_v46  ;;  %v11466_v45 = vld [vmem:[%s17100_s2 + $0x1568] ss:$72 sps:$4 sm:$0xff]   ;;  %v11471_v46 = vld [vmem:[%s17100_s2 + $0x15f4] ss:$72 sps:$4 sm:$0xff]  }
  0x67   :  { %5294 = vmatpush1.bf16.msra.mxu0 %v11385_v47  ;;  %v11474_v47 = vld [vmem:[%s17100_s2 + $0x15fc] ss:$72 sps:$4 sm:$0xff]  }
  0x68   :  { %5423 = vmatpush1.bf16.msra.mxu1 %v11388_v48  ;;  %5295 = vmatprep.subr.bf16.mxu0 %v11393_v49  ;;  %v11469_v48 = vld [vmem:[%s17100_s2 + $0x15f0] ss:$72 sps:$4 sm:$0xff]  }
  0x69   :  { %5424 = vmatprep.subr.bf16.mxu1 %v11396_v51  ;;  %v11472_v49 = vld [vmem:[%s17100_s2 + $0x15f8] ss:$72 sps:$4 sm:$0xff]   ;;  %v11477_v51 = vld [vmem:[%s17100_s2 + $0x1684] ss:$72 sps:$4 sm:$0xff]  }
  0x6b   :  { %5296 = vmatpush1.bf16.msra.mxu0 %v11391_v52  ;;  %v11480_v52 = vld [vmem:[%s17100_s2 + $0x168c] ss:$72 sps:$4 sm:$0xff]  }
  0x6c   :  { %5425 = vmatpush1.bf16.msra.mxu1 %v11394_v53  ;;  %5297 = vmatprep.subr.bf16.mxu0 %v11399_v54  ;;  %v11475_v53 = vld [vmem:[%s17100_s2 + $0x1680] ss:$72 sps:$4 sm:$0xff]  }
  0x6d   :  { %5426 = vmatprep.subr.bf16.mxu1 %v11402_v55  ;;  %v11478_v54 = vld [vmem:[%s17100_s2 + $0x1688] ss:$72 sps:$4 sm:$0xff]   ;;  %v11483_v55 = vld [vmem:[%s17100_s2 + $0x1714] ss:$72 sps:$4 sm:$0xff]  }
  0x6f   :  { %5298 = vmatpush1.bf16.msra.mxu0 %v11397_v56  ;;  %v11486_v56 = vld [vmem:[%s17100_s2 + $0x171c] ss:$72 sps:$4 sm:$0xff]  }
  0x70   :  { %5427 = vmatpush1.bf16.msra.mxu1 %v11400_v57  ;;  %5299 = vmatprep.subr.bf16.mxu0 %v11405_v58  ;;  %v11481_v57 = vld [vmem:[%s17100_s2 + $0x1710] ss:$72 sps:$4 sm:$0xff]  }
  0x71   :  { %5428 = vmatprep.subr.bf16.mxu1 %v11408_v59  ;;  %v11484_v58 = vld [vmem:[%s17100_s2 + $0x1718] ss:$72 sps:$4 sm:$0xff]   ;;  %v11489_v59 = vld [vmem:[%s17100_s2 + $0x17a4] ss:$72 sps:$4 sm:$0xff]  }
  0x73   :  { %5300 = vmatpush1.bf16.msra.mxu0 %v11403_v60  ;;  %v11492_v60 = vld [vmem:[%s17100_s2 + $0x17ac] ss:$72 sps:$4 sm:$0xff]  }
  0x74   :  { %5429 = vmatpush1.bf16.msra.mxu1 %v11406_v61  ;;  %5301 = vmatprep.subr.bf16.mxu0 %v11411_v62  ;;  %v11487_v61 = vld [vmem:[%s17100_s2 + $0x17a0] ss:$72 sps:$4 sm:$0xff]  }
  0x75   :  { %5430 = vmatprep.subr.bf16.mxu1 %v11414_v63  ;;  %v11490_v62 = vld [vmem:[%s17100_s2 + $0x17a8] ss:$72 sps:$4 sm:$0xff]   ;;  %v11495_v63 = vld [vmem:[%s17100_s2 + $0x1834] ss:$72 sps:$4 sm:$0xff]  }
  0x77   :  { %5302 = vmatpush1.bf16.msra.mxu0 %v11409_v0  ;;  %v11498_v0 = vld [vmem:[%s17100_s2 + $0x183c] ss:$72 sps:$4 sm:$0xff]  }
  0x78   :  { %5431 = vmatpush1.bf16.msra.mxu1 %v11412_v1  ;;  %5303 = vmatprep.subr.bf16.mxu0 %v11417_v2  ;;  %v11493_v1 = vld [vmem:[%s17100_s2 + $0x1830] ss:$72 sps:$4 sm:$0xff]  }
  0x79   :  { %5432 = vmatprep.subr.bf16.mxu1 %v11420_v3  ;;  %v11496_v2 = vld [vmem:[%s17100_s2 + $0x1838] ss:$72 sps:$4 sm:$0xff]   ;;  %v11501_v3 = vld [vmem:[%s17100_s2 + $0x18c4] ss:$72 sps:$4 sm:$0xff]  }
  0x7b   :  { %5304 = vmatpush1.bf16.msra.mxu0 %v11415_v4  ;;  %v11504_v4 = vld [vmem:[%s17100_s2 + $0x18cc] ss:$72 sps:$4 sm:$0xff]  }
  0x7c   :  { %5433 = vmatpush1.bf16.msra.mxu1 %v11418_v5  ;;  %5305 = vmatprep.subr.bf16.mxu0 %v11423_v6  ;;  %v11499_v5 = vld [vmem:[%s17100_s2 + $0x18c0] ss:$72 sps:$4 sm:$0xff]  }
  0x7d   :  { %5434 = vmatprep.subr.bf16.mxu1 %v11426_v7  ;;  %v11502_v6 = vld [vmem:[%s17100_s2 + $0x18c8] ss:$72 sps:$4 sm:$0xff]   ;;  %v11507_v7 = vld [vmem:[%s17100_s2 + $0x1954] ss:$72 sps:$4 sm:$0xff]  }
  0x7f   :  { %5306 = vmatpush1.bf16.msra.mxu0 %v11421_v8  ;;  %v11510_v8 = vld [vmem:[%s17100_s2 + $0x195c] ss:$72 sps:$4 sm:$0xff]  }
  0x80   :  { %5435 = vmatpush1.bf16.msra.mxu1 %v11424_v10  ;;  %5318 = vmatprep.subr.bf16.mxu0 %v11429_v11  ;;  %v11505_v10 = vld [vmem:[%s17100_s2 + $0x1950] ss:$72 sps:$4 sm:$0xff]  }
  0x81   :  { %5447 = vmatprep.subr.bf16.mxu1 %v11432_v14  ;;  %v11508_v11 = vld [vmem:[%s17100_s2 + $0x1958] ss:$72 sps:$4 sm:$0xff]  }
  0x82   :  { %5308 = vmatmul.mubr.bf16.vlgmr.msra.gmra.mrb[0].mxu0 %v13514_v17  ;;  %v11511_v14 = vld [vmem:[%s17100_s2 + $0x19e0] ss:$72 sps:$4 sm:$0xff]  }
  0x83   :  { %5437 = vmatmul.mubr.bf16.vlgmr.msra.gmra.mrb[0].mxu1 %v13514_v17  ;;  %5319 = vmatpush1.bf16.msra.mxu0 %v11427_v15  ;;  %v11514_v15 = vld [vmem:[%s17100_s2 + $0x19e8] ss:$72 sps:$4 sm:$0xff]  }
  0x84   :  { %5448 = vmatpush1.bf16.msra.mxu1 %v11430_v16  ;;  %5320 = vmatprep.subr.bf16.mxu0 %v11435_v18  ;;  %v11519_v16 = vld [vmem:[%s17100_s2 + $0x1a74] ss:$72 sps:$4 sm:$0xff]  }
  0x85   :  { %5449 = vmatprep.subr.bf16.mxu1 %v11438_v19  ;;  %5350 = vmatprep.mubr.bf16.mxu0 %v13539_v25  ;;  %v11522_v18 = vld [vmem:[%s17100_s2 + $0x1a7c] ss:$72 sps:$4 sm:$0xff]   ;;  %v11517_v19 = vld [vmem:[%s17100_s2 + $0x1a70] ss:$72 sps:$4 sm:$0xff]  }
  0x86   :  { %5479 = vmatprep.mubr.bf16.mxu1 %v13539_v25 }
  0x87   :  { %5321 = vmatpush1.bf16.msra.mxu0 %v11433_v21  ;;  %v34_v21 = vld [vmem:[%s17101_s0 + $0x20] sm:$0xff] }
  0x88   :  { %5450 = vmatpush1.bf16.msra.mxu1 %v11436_v22  ;;  %5322 = vmatprep.subr.bf16.mxu0 %v11441_v24  ;;  %v40_v22 = vld [vmem:[%s17101_s0 + $0x50] sm:$0xff]  ;;  %v11528_v24 = vld [vmem:[%s17100_s2 + $0x1c] ss:$72 sps:$4 sm:$0xff]  }
  0x89   :  { %5451 = vmatprep.subr.bf16.mxu1 %v11444_v26  ;;  %v13720_v26 = vpack.c.bf16 %v40_v22, %v34_v21  ;;  %v11609_v21 = vld [vmem:[%s17100_s2 + $0x7f4] ss:$72 sps:$4 sm:$0xff]  }
  0x8a   :  { %v11612_v22 = vld [vmem:[%s17100_s2 + $0x7fc] ss:$72 sps:$4 sm:$0xff]  }
  0x8b   :  { %5323 = vmatpush1.bf16.msra.mxu0 %v11439_v27  ;;  %v11523_v27 = vld [vmem:[%s17100_s2 + $0x10] ss:$72 sps:$4 sm:$0xff]  }
  0x8c   :  { %5452 = vmatpush1.bf16.msra.mxu1 %v11442_v28  ;;  %5324 = vmatprep.subr.bf16.mxu0 %v11447_v29  ;;  %v11526_v28 = vld [vmem:[%s17100_s2 + $0x18] ss:$72 sps:$4 sm:$0xff]   ;;  %v11531_v29 = vld [vmem:[%s17100_s2 + $0xa4] ss:$72 sps:$4 sm:$0xff]  }
  0x8d   :  { %5453 = vmatprep.subr.bf16.mxu1 %v11450_v30  ;;  %v11534_v30 = vld [vmem:[%s17100_s2 + $0xac] ss:$72 sps:$4 sm:$0xff]  }
  0x8f   :  { %5325 = vmatpush1.bf16.msra.mxu0 %v11445_v31  ;;  %v11529_v31 = vld [vmem:[%s17100_s2 + $0xa0] ss:$72 sps:$4 sm:$0xff]  }
  0x90   :  { %5454 = vmatpush1.bf16.msra.mxu1 %v11448_v32  ;;  %5326 = vmatprep.subr.bf16.mxu0 %v11453_v33  ;;  %v11532_v32 = vld [vmem:[%s17100_s2 + $0xa8] ss:$72 sps:$4 sm:$0xff]   ;;  %v11537_v33 = vld [vmem:[%s17100_s2 + $0x134] ss:$72 sps:$4 sm:$0xff]  }
  0x91   :  { %5455 = vmatprep.subr.bf16.mxu1 %v11456_v34  ;;  %v11540_v34 = vld [vmem:[%s17100_s2 + $0x13c] ss:$72 sps:$4 sm:$0xff]  }
  0x93   :  { %5327 = vmatpush1.bf16.msra.mxu0 %v11451_v35  ;;  %v11535_v35 = vld [vmem:[%s17100_s2 + $0x130] ss:$72 sps:$4 sm:$0xff]  }
  0x94   :  { %5456 = vmatpush1.bf16.msra.mxu1 %v11454_v37  ;;  %5328 = vmatprep.subr.bf16.mxu0 %v11459_v38  ;;  %v11538_v37 = vld [vmem:[%s17100_s2 + $0x138] ss:$72 sps:$4 sm:$0xff]   ;;  %v11543_v38 = vld [vmem:[%s17100_s2 + $0x1c4] ss:$72 sps:$4 sm:$0xff]  }
  0x95   :  { %5457 = vmatprep.subr.bf16.mxu1 %v11462_v39  ;;  %v11546_v39 = vld [vmem:[%s17100_s2 + $0x1cc] ss:$72 sps:$4 sm:$0xff]  }
  0x97   :  { %5329 = vmatpush1.bf16.msra.mxu0 %v11457_v40  ;;  %v11541_v40 = vld [vmem:[%s17100_s2 + $0x1c0] ss:$72 sps:$4 sm:$0xff]  }
  0x98   :  { %5458 = vmatpush1.bf16.msra.mxu1 %v11460_v41  ;;  %5330 = vmatprep.subr.bf16.mxu0 %v11465_v42  ;;  %v11544_v41 = vld [vmem:[%s17100_s2 + $0x1c8] ss:$72 sps:$4 sm:$0xff]   ;;  %v11549_v42 = vld [vmem:[%s17100_s2 + $0x254] ss:$72 sps:$4 sm:$0xff]  }
  0x99   :  { %5459 = vmatprep.subr.bf16.mxu1 %v11468_v43  ;;  %v11552_v43 = vld [vmem:[%s17100_s2 + $0x25c] ss:$72 sps:$4 sm:$0xff]  }
  0x9b   :  { %5331 = vmatpush1.bf16.msra.mxu0 %v11463_v44  ;;  %v11547_v44 = vld [vmem:[%s17100_s2 + $0x250] ss:$72 sps:$4 sm:$0xff]  }
  0x9c   :  { %5460 = vmatpush1.bf16.msra.mxu1 %v11466_v45  ;;  %5332 = vmatprep.subr.bf16.mxu0 %v11471_v46  ;;  %v11550_v45 = vld [vmem:[%s17100_s2 + $0x258] ss:$72 sps:$4 sm:$0xff]   ;;  %v11555_v46 = vld [vmem:[%s17100_s2 + $0x2e4] ss:$72 sps:$4 sm:$0xff]  }
  0x9d   :  { %5461 = vmatprep.subr.bf16.mxu1 %v11474_v47  ;;  %v11558_v47 = vld [vmem:[%s17100_s2 + $0x2ec] ss:$72 sps:$4 sm:$0xff]  }
  0x9f   :  { %5333 = vmatpush1.bf16.msra.mxu0 %v11469_v48  ;;  %v11553_v48 = vld [vmem:[%s17100_s2 + $0x2e0] ss:$72 sps:$4 sm:$0xff]  }
  0xa0   :  { %5462 = vmatpush1.bf16.msra.mxu1 %v11472_v49  ;;  %5334 = vmatprep.subr.bf16.mxu0 %v11477_v51  ;;  %v11556_v49 = vld [vmem:[%s17100_s2 + $0x2e8] ss:$72 sps:$4 sm:$0xff]   ;;  %v11561_v51 = vld [vmem:[%s17100_s2 + $0x374] ss:$72 sps:$4 sm:$0xff]  }
  0xa1   :  { %5463 = vmatprep.subr.bf16.mxu1 %v11480_v52  ;;  %v11564_v52 = vld [vmem:[%s17100_s2 + $0x37c] ss:$72 sps:$4 sm:$0xff]  }
  0xa3   :  { %5335 = vmatpush1.bf16.msra.mxu0 %v11475_v53  ;;  %v11559_v53 = vld [vmem:[%s17100_s2 + $0x370] ss:$72 sps:$4 sm:$0xff]  }
  0xa4   :  { %5464 = vmatpush1.bf16.msra.mxu1 %v11478_v54  ;;  %5336 = vmatprep.subr.bf16.mxu0 %v11483_v55  ;;  %v11562_v54 = vld [vmem:[%s17100_s2 + $0x378] ss:$72 sps:$4 sm:$0xff]   ;;  %v11567_v55 = vld [vmem:[%s17100_s2 + $0x404] ss:$72 sps:$4 sm:$0xff]  }
  0xa5   :  { %5465 = vmatprep.subr.bf16.mxu1 %v11486_v56  ;;  %v11570_v56 = vld [vmem:[%s17100_s2 + $0x40c] ss:$72 sps:$4 sm:$0xff]  }
  0xa7   :  { %5337 = vmatpush1.bf16.msra.mxu0 %v11481_v57  ;;  %v11565_v57 = vld [vmem:[%s17100_s2 + $0x400] ss:$72 sps:$4 sm:$0xff]  }
  0xa8   :  { %5466 = vmatpush1.bf16.msra.mxu1 %v11484_v58  ;;  %5338 = vmatprep.subr.bf16.mxu0 %v11489_v59  ;;  %v11568_v58 = vld [vmem:[%s17100_s2 + $0x408] ss:$72 sps:$4 sm:$0xff]   ;;  %v11573_v59 = vld [vmem:[%s17100_s2 + $0x494] ss:$72 sps:$4 sm:$0xff]  }
  0xa9   :  { %5467 = vmatprep.subr.bf16.mxu1 %v11492_v60  ;;  %v11576_v60 = vld [vmem:[%s17100_s2 + $0x49c] ss:$72 sps:$4 sm:$0xff]  }
  0xab   :  { %5339 = vmatpush1.bf16.msra.mxu0 %v11487_v61  ;;  %v11571_v61 = vld [vmem:[%s17100_s2 + $0x490] ss:$72 sps:$4 sm:$0xff]  }
  0xac   :  { %5468 = vmatpush1.bf16.msra.mxu1 %v11490_v62  ;;  %5340 = vmatprep.subr.bf16.mxu0 %v11495_v63  ;;  %v11574_v62 = vld [vmem:[%s17100_s2 + $0x498] ss:$72 sps:$4 sm:$0xff]   ;;  %v11579_v63 = vld [vmem:[%s17100_s2 + $0x524] ss:$72 sps:$4 sm:$0xff]  }
  0xad   :  { %5469 = vmatprep.subr.bf16.mxu1 %v11498_v0  ;;  %v11582_v0 = vld [vmem:[%s17100_s2 + $0x52c] ss:$72 sps:$4 sm:$0xff]  }
  0xaf   :  { %5341 = vmatpush1.bf16.msra.mxu0 %v11493_v1  ;;  %v11577_v1 = vld [vmem:[%s17100_s2 + $0x520] ss:$72 sps:$4 sm:$0xff]  }
  0xb0   :  { %5470 = vmatpush1.bf16.msra.mxu1 %v11496_v2  ;;  %5342 = vmatprep.subr.bf16.mxu0 %v11501_v3  ;;  %v11580_v2 = vld [vmem:[%s17100_s2 + $0x528] ss:$72 sps:$4 sm:$0xff]   ;;  %v11585_v3 = vld [vmem:[%s17100_s2 + $0x5b4] ss:$72 sps:$4 sm:$0xff]  }
  0xb1   :  { %5471 = vmatprep.subr.bf16.mxu1 %v11504_v4  ;;  %v11588_v4 = vld [vmem:[%s17100_s2 + $0x5bc] ss:$72 sps:$4 sm:$0xff]  }
  0xb3   :  { %5343 = vmatpush1.bf16.msra.mxu0 %v11499_v5  ;;  %v11583_v5 = vld [vmem:[%s17100_s2 + $0x5b0] ss:$72 sps:$4 sm:$0xff]  }
  0xb4   :  { %5472 = vmatpush1.bf16.msra.mxu1 %v11502_v6  ;;  %5344 = vmatprep.subr.bf16.mxu0 %v11507_v7  ;;  %v11586_v6 = vld [vmem:[%s17100_s2 + $0x5b8] ss:$72 sps:$4 sm:$0xff]   ;;  %v11591_v7 = vld [vmem:[%s17100_s2 + $0x644] ss:$72 sps:$4 sm:$0xff]  }
  0xb5   :  { %5473 = vmatprep.subr.bf16.mxu1 %v11510_v8  ;;  %v11594_v8 = vld [vmem:[%s17100_s2 + $0x64c] ss:$72 sps:$4 sm:$0xff]  }
  0xb7   :  { %5345 = vmatpush1.bf16.msra.mxu0 %v11505_v10  ;;  %v11589_v10 = vld [vmem:[%s17100_s2 + $0x640] ss:$72 sps:$4 sm:$0xff]  }
  0xb8   :  { %5474 = vmatpush1.bf16.msra.mxu1 %v11508_v11  ;;  %5346 = vmatprep.subr.bf16.mxu0 %v11513_v12  ;;  %v11592_v11 = vld [vmem:[%s17100_s2 + $0x648] ss:$72 sps:$4 sm:$0xff]   ;;  %v11597_v12 = vld [vmem:[%s17100_s2 + $0x6d4] ss:$72 sps:$4 sm:$0xff]  }
  0xb9   :  { %5475 = vmatprep.subr.bf16.mxu1 %v11516_v13  ;;  %v11600_v13 = vld [vmem:[%s17100_s2 + $0x6dc] ss:$72 sps:$4 sm:$0xff]  }
  0xbb   :  { %5347 = vmatpush1.bf16.msra.mxu0 %v11511_v14  ;;  %v11595_v14 = vld [vmem:[%s17100_s2 + $0x6d0] ss:$72 sps:$4 sm:$0xff]  }
  0xbc   :  { %5476 = vmatpush1.bf16.msra.mxu1 %v11514_v15  ;;  %5348 = vmatprep.subr.bf16.mxu0 %v11519_v16  ;;  %v11598_v15 = vld [vmem:[%s17100_s2 + $0x6d8] ss:$72 sps:$4 sm:$0xff]   ;;  %v11603_v16 = vld [vmem:[%s17100_s2 + $0x764] ss:$72 sps:$4 sm:$0xff]  }
  0xbd   :  { %5477 = vmatprep.subr.bf16.mxu1 %v11522_v18  ;;  %v11606_v18 = vld [vmem:[%s17100_s2 + $0x76c] ss:$72 sps:$4 sm:$0xff]  }
  0xbf   :  { %5349 = vmatpush1.bf16.msra.mxu0 %v11517_v19  ;;  %v11601_v19 = vld [vmem:[%s17100_s2 + $0x760] ss:$72 sps:$4 sm:$0xff]  }
  0xc0   :  { %5478 = vmatpush1.bf16.msra.mxu1 %v11520_v20  ;;  %5490 = vmatprep.subr.bf16.mxu0 %v11525_v23  ;;  %v11604_v20 = vld [vmem:[%s17100_s2 + $0x768] ss:$72 sps:$4 sm:$0xff]  }
  0xc1   :  { %5619 = vmatprep.subr.bf16.mxu1 %v11528_v24  ;;  %v11607_v23 = vld [vmem:[%s17100_s2 + $0x7f0] ss:$72 sps:$4 sm:$0xff]  }
  0xc2   :  { %5351 = vmatmul.mubr.bf16.vlgmr.msra.gmra.mrb[0].mxu0 %v13720_v26  ;;  %v11610_v24 = vld [vmem:[%s17100_s2 + $0x7f8] ss:$72 sps:$4 sm:$0xff]  }
  0xc3   :  { %5480 = vmatmul.mubr.bf16.vlgmr.msra.gmra.mrb[0].mxu1 %v13720_v26  ;;  %5491 = vmatpush1.bf16.msra.mxu0 %v11523_v27  ;;  %v11615_v27 = vld [vmem:[%s17100_s2 + $0x884] ss:$72 sps:$4 sm:$0xff]  }
  0xc4   :  { %5620 = vmatpush1.bf16.msra.mxu1 %v11526_v28  ;;  %5492 = vmatprep.subr.bf16.mxu0 %v11531_v29  ;;  %v11618_v28 = vld [vmem:[%s17100_s2 + $0x88c] ss:$72 sps:$4 sm:$0xff]   ;;  %v11613_v29 = vld [vmem:[%s17100_s2 + $0x880] ss:$72 sps:$4 sm:$0xff]  }
  0xc5   :  { %5621 = vmatprep.subr.bf16.mxu1 %v11534_v30  ;;  %5522 = vmatprep.mubr.bf16.mxu0 %v13232_v50  ;;  %v11616_v30 = vld [vmem:[%s17100_s2 + $0x888] ss:$72 sps:$4 sm:$0xff]  }
  0xc6   :  { %5651 = vmatprep.mubr.bf16.mxu1 %v13232_v50 }
  0xc7   :  { %5493 = vmatpush1.bf16.msra.mxu0 %v11529_v31  ;;  %v11621_v31 = vld [vmem:[%s17100_s2 + $0x914] ss:$72 sps:$4 sm:$0xff]  }
  0xc8   :  { %5622 = vmatpush1.bf16.msra.mxu1 %v11532_v32  ;;  %5494 = vmatprep.subr.bf16.mxu0 %v11537_v33  ;;  %v11624_v32 = vld [vmem:[%s17100_s2 + $0x91c] ss:$72 sps:$4 sm:$0xff]   ;;  %v11619_v33 = vld [vmem:[%s17100_s2 + $0x910] ss:$72 sps:$4 sm:$0xff]  }
  0xc9   :  { %5623 = vmatprep.subr.bf16.mxu1 %v11540_v34  ;;  %v11622_v34 = vld [vmem:[%s17100_s2 + $0x918] ss:$72 sps:$4 sm:$0xff]  }
  0xcb   :  { %5495 = vmatpush1.bf16.msra.mxu0 %v11535_v35  ;;  %v11627_v35 = vld [vmem:[%s17100_s2 + $0x9a4] ss:$72 sps:$4 sm:$0xff]  }
  0xcc   :  { %5624 = vmatpush1.bf16.msra.mxu1 %v11538_v37  ;;  %5496 = vmatprep.subr.bf16.mxu0 %v11543_v38  ;;  %v11630_v37 = vld [vmem:[%s17100_s2 + $0x9ac] ss:$72 sps:$4 sm:$0xff]   ;;  %v11625_v38 = vld [vmem:[%s17100_s2 + $0x9a0] ss:$72 sps:$4 sm:$0xff]  }
  0xcd   :  { %5625 = vmatprep.subr.bf16.mxu1 %v11546_v39  ;;  %v11628_v39 = vld [vmem:[%s17100_s2 + $0x9a8] ss:$72 sps:$4 sm:$0xff]  }
  0xcf   :  { %5497 = vmatpush1.bf16.msra.mxu0 %v11541_v40  ;;  %v11633_v40 = vld [vmem:[%s17100_s2 + $0xa34] ss:$72 sps:$4 sm:$0xff]  }
  0xd0   :  { %5626 = vmatpush1.bf16.msra.mxu1 %v11544_v41  ;;  %5498 = vmatprep.subr.bf16.mxu0 %v11549_v42  ;;  %v11636_v41 = vld [vmem:[%s17100_s2 + $0xa3c] ss:$72 sps:$4 sm:$0xff]   ;;  %v11631_v42 = vld [vmem:[%s17100_s2 + $0xa30] ss:$72 sps:$4 sm:$0xff]  }
  0xd1   :  { %5627 = vmatprep.subr.bf16.mxu1 %v11552_v43  ;;  %v11634_v43 = vld [vmem:[%s17100_s2 + $0xa38] ss:$72 sps:$4 sm:$0xff]  }
  0xd3   :  { %5499 = vmatpush1.bf16.msra.mxu0 %v11547_v44  ;;  %v11639_v44 = vld [vmem:[%s17100_s2 + $0xac4] ss:$72 sps:$4 sm:$0xff]  }
  0xd4   :  { %5628 = vmatpush1.bf16.msra.mxu1 %v11550_v45  ;;  %5500 = vmatprep.subr.bf16.mxu0 %v11555_v46  ;;  %v11642_v45 = vld [vmem:[%s17100_s2 + $0xacc] ss:$72 sps:$4 sm:$0xff]   ;;  %v11637_v46 = vld [vmem:[%s17100_s2 + $0xac0] ss:$72 sps:$4 sm:$0xff]  }
  0xd5   :  { %5629 = vmatprep.subr.bf16.mxu1 %v11558_v47  ;;  %v11640_v47 = vld [vmem:[%s17100_s2 + $0xac8] ss:$72 sps:$4 sm:$0xff]  }
  0xd7   :  { %5501 = vmatpush1.bf16.msra.mxu0 %v11553_v48  ;;  %v11645_v48 = vld [vmem:[%s17100_s2 + $0xb54] ss:$72 sps:$4 sm:$0xff]  }
  0xd8   :  { %5630 = vmatpush1.bf16.msra.mxu1 %v11556_v49  ;;  %5502 = vmatprep.subr.bf16.mxu0 %v11561_v51  ;;  %v11648_v49 = vld [vmem:[%s17100_s2 + $0xb5c] ss:$72 sps:$4 sm:$0xff]   ;;  %v11643_v51 = vld [vmem:[%s17100_s2 + $0xb50] ss:$72 sps:$4 sm:$0xff]  }
  0xd9   :  { %5631 = vmatprep.subr.bf16.mxu1 %v11564_v52  ;;  %v11646_v52 = vld [vmem:[%s17100_s2 + $0xb58] ss:$72 sps:$4 sm:$0xff]  }
  0xdb   :  { %5503 = vmatpush1.bf16.msra.mxu0 %v11559_v53  ;;  %v11651_v53 = vld [vmem:[%s17100_s2 + $0xbe4] ss:$72 sps:$4 sm:$0xff]  }
  0xdc   :  { %5632 = vmatpush1.bf16.msra.mxu1 %v11562_v54  ;;  %5504 = vmatprep.subr.bf16.mxu0 %v11567_v55  ;;  %v11654_v54 = vld [vmem:[%s17100_s2 + $0xbec] ss:$72 sps:$4 sm:$0xff]   ;;  %v11649_v55 = vld [vmem:[%s17100_s2 + $0xbe0] ss:$72 sps:$4 sm:$0xff]  }
  0xdd   :  { %5633 = vmatprep.subr.bf16.mxu1 %v11570_v56  ;;  %v11652_v56 = vld [vmem:[%s17100_s2 + $0xbe8] ss:$72 sps:$4 sm:$0xff]  }
  0xdf   :  { %5505 = vmatpush1.bf16.msra.mxu0 %v11565_v57  ;;  %v11657_v57 = vld [vmem:[%s17100_s2 + $0xc74] ss:$72 sps:$4 sm:$0xff]  }
  0xe0   :  { %5634 = vmatpush1.bf16.msra.mxu1 %v11568_v58  ;;  %5506 = vmatprep.subr.bf16.mxu0 %v11573_v59  ;;  %v11660_v58 = vld [vmem:[%s17100_s2 + $0xc7c] ss:$72 sps:$4 sm:$0xff]   ;;  %v11655_v59 = vld [vmem:[%s17100_s2 + $0xc70] ss:$72 sps:$4 sm:$0xff]  }
  0xe1   :  { %5635 = vmatprep.subr.bf16.mxu1 %v11576_v60  ;;  %v11658_v60 = vld [vmem:[%s17100_s2 + $0xc78] ss:$72 sps:$4 sm:$0xff]  }
  0xe3   :  { %5507 = vmatpush1.bf16.msra.mxu0 %v11571_v61  ;;  %v11663_v61 = vld [vmem:[%s17100_s2 + $0xd04] ss:$72 sps:$4 sm:$0xff]  }
  0xe4   :  { %5636 = vmatpush1.bf16.msra.mxu1 %v11574_v62  ;;  %5508 = vmatprep.subr.bf16.mxu0 %v11579_v63  ;;  %v11666_v62 = vld [vmem:[%s17100_s2 + $0xd0c] ss:$72 sps:$4 sm:$0xff]   ;;  %v11661_v63 = vld [vmem:[%s17100_s2 + $0xd00] ss:$72 sps:$4 sm:$0xff]  }
  0xe5   :  { %5637 = vmatprep.subr.bf16.mxu1 %v11582_v0  ;;  %v11664_v0 = vld [vmem:[%s17100_s2 + $0xd08] ss:$72 sps:$4 sm:$0xff]  }
  0xe7   :  { %5509 = vmatpush1.bf16.msra.mxu0 %v11577_v1  ;;  %v11669_v1 = vld [vmem:[%s17100_s2 + $0xd94] ss:$72 sps:$4 sm:$0xff]  }
  0xe8   :  { %5638 = vmatpush1.bf16.msra.mxu1 %v11580_v2  ;;  %5510 = vmatprep.subr.bf16.mxu0 %v11585_v3  ;;  %v11672_v2 = vld [vmem:[%s17100_s2 + $0xd9c] ss:$72 sps:$4 sm:$0xff]   ;;  %v11667_v3 = vld [vmem:[%s17100_s2 + $0xd90] ss:$72 sps:$4 sm:$0xff]  }
  0xe9   :  { %5639 = vmatprep.subr.bf16.mxu1 %v11588_v4  ;;  %v11670_v4 = vld [vmem:[%s17100_s2 + $0xd98] ss:$72 sps:$4 sm:$0xff]  }
  0xeb   :  { %5511 = vmatpush1.bf16.msra.mxu0 %v11583_v5  ;;  %v11675_v5 = vld [vmem:[%s17100_s2 + $0xe24] ss:$72 sps:$4 sm:$0xff]  }
  0xec   :  { %5640 = vmatpush1.bf16.msra.mxu1 %v11586_v6  ;;  %5512 = vmatprep.subr.bf16.mxu0 %v11591_v7  ;;  %v11678_v6 = vld [vmem:[%s17100_s2 + $0xe2c] ss:$72 sps:$4 sm:$0xff]   ;;  %v11673_v7 = vld [vmem:[%s17100_s2 + $0xe20] ss:$72 sps:$4 sm:$0xff]  }
  0xed   :  { %5641 = vmatprep.subr.bf16.mxu1 %v11594_v8  ;;  %v11676_v8 = vld [vmem:[%s17100_s2 + $0xe28] ss:$72 sps:$4 sm:$0xff]  }
  0xef   :  { %5513 = vmatpush1.bf16.msra.mxu0 %v11589_v10  ;;  %v11681_v10 = vld [vmem:[%s17100_s2 + $0xeb4] ss:$72 sps:$4 sm:$0xff]  }
  0xf0   :  { %5642 = vmatpush1.bf16.msra.mxu1 %v11592_v11  ;;  %5514 = vmatprep.subr.bf16.mxu0 %v11597_v12  ;;  %v11684_v11 = vld [vmem:[%s17100_s2 + $0xebc] ss:$72 sps:$4 sm:$0xff]   ;;  %v11679_v12 = vld [vmem:[%s17100_s2 + $0xeb0] ss:$72 sps:$4 sm:$0xff]  }
  0xf1   :  { %5643 = vmatprep.subr.bf16.mxu1 %v11600_v13  ;;  %v11682_v13 = vld [vmem:[%s17100_s2 + $0xeb8] ss:$72 sps:$4 sm:$0xff]  }
  0xf3   :  { %5515 = vmatpush1.bf16.msra.mxu0 %v11595_v14  ;;  %v11687_v14 = vld [vmem:[%s17100_s2 + $0xf44] ss:$72 sps:$4 sm:$0xff]  }
  0xf4   :  { %5644 = vmatpush1.bf16.msra.mxu1 %v11598_v15  ;;  %5516 = vmatprep.subr.bf16.mxu0 %v11603_v16  ;;  %v11690_v15 = vld [vmem:[%s17100_s2 + $0xf4c] ss:$72 sps:$4 sm:$0xff]   ;;  %v11685_v16 = vld [vmem:[%s17100_s2 + $0xf40] ss:$72 sps:$4 sm:$0xff]  }
  0xf5   :  { %5645 = vmatprep.subr.bf16.mxu1 %v11606_v18  ;;  %v11688_v18 = vld [vmem:[%s17100_s2 + $0xf48] ss:$72 sps:$4 sm:$0xff]  }
  0xf7   :  { %5517 = vmatpush1.bf16.msra.mxu0 %v11601_v19  ;;  %v11693_v19 = vld [vmem:[%s17100_s2 + $0xfd4] ss:$72 sps:$4 sm:$0xff]  }
  0xf8   :  { %5646 = vmatpush1.bf16.msra.mxu1 %v11604_v20  ;;  %5518 = vmatprep.subr.bf16.mxu0 %v11609_v21  ;;  %v11696_v20 = vld [vmem:[%s17100_s2 + $0xfdc] ss:$72 sps:$4 sm:$0xff]   ;;  %v11691_v21 = vld [vmem:[%s17100_s2 + $0xfd0] ss:$72 sps:$4 sm:$0xff]  }
  0xf9   :  { %5647 = vmatprep.subr.bf16.mxu1 %v11612_v22  ;;  %v11694_v22 = vld [vmem:[%s17100_s2 + $0xfd8] ss:$72 sps:$4 sm:$0xff]  }
  0xfb   :  { %5519 = vmatpush1.bf16.msra.mxu0 %v11607_v23  ;;  %v11699_v23 = vld [vmem:[%s17100_s2 + $0x1064] ss:$72 sps:$4 sm:$0xff]  }
  0xfc   :  { %5648 = vmatpush1.bf16.msra.mxu1 %v11610_v24  ;;  %5520 = vmatprep.subr.bf16.mxu0 %v11615_v27  ;;  %v11702_v24 = vld [vmem:[%s17100_s2 + $0x106c] ss:$72 sps:$4 sm:$0xff]   ;;  %v11697_v27 = vld [vmem:[%s17100_s2 + $0x1060] ss:$72 sps:$4 sm:$0xff]  }
  0xfd   :  { %5649 = vmatprep.subr.bf16.mxu1 %v11618_v28  ;;  %v11700_v28 = vld [vmem:[%s17100_s2 + $0x1068] ss:$72 sps:$4 sm:$0xff]  }
  0xff   :  { %5521 = vmatpush1.bf16.msra.mxu0 %v11613_v29  ;;  %v11705_v29 = vld [vmem:[%s17100_s2 + $0x10f4] ss:$72 sps:$4 sm:$0xff]  }
 0x100   :  { %5650 = vmatpush1.bf16.msra.mxu1 %v11616_v30  ;;  %5533 = vmatprep.subr.bf16.mxu0 %v11621_v31  ;;  %v11708_v30 = vld [vmem:[%s17100_s2 + $0x10fc] ss:$72 sps:$4 sm:$0xff]   ;;  %v11703_v31 = vld [vmem:[%s17100_s2 + $0x10f0] ss:$72 sps:$4 sm:$0xff]  }
 0x101   :  { %5662 = vmatprep.subr.bf16.mxu1 %v11624_v32  ;;  %v11706_v32 = vld [vmem:[%s17100_s2 + $0x10f8] ss:$72 sps:$4 sm:$0xff]  }
 0x102   :  { %5523 = vmatmul.mubr.bf16.vlgmr.msra.gmra.mrb[4].mxu0 %v13302_v9 }
 0x103   :  { %5652 = vmatmul.mubr.bf16.vlgmr.msra.gmra.mrb[4].mxu1 %v13302_v9  ;;  %5534 = vmatpush1.bf16.msra.mxu0 %v11619_v33  ;;  %v11711_v33 = vld [vmem:[%s17100_s2 + $0x1184] ss:$72 sps:$4 sm:$0xff]  }
 0x104   :  { %5663 = vmatpush1.bf16.msra.mxu1 %v11622_v34  ;;  %5535 = vmatprep.subr.bf16.mxu0 %v11627_v35  ;;  %v11714_v34 = vld [vmem:[%s17100_s2 + $0x118c] ss:$72 sps:$4 sm:$0xff]   ;;  %v11709_v35 = vld [vmem:[%s17100_s2 + $0x1180] ss:$72 sps:$4 sm:$0xff]  }
 0x105   :  { %5664 = vmatprep.subr.bf16.mxu1 %v11630_v37  ;;  %5565 = vmatprep.mubr.bf16.mxu0 %v13384_v36  ;;  %v11712_v37 = vld [vmem:[%s17100_s2 + $0x1188] ss:$72 sps:$4 sm:$0xff]  }
 0x106   :  { %5694 = vmatprep.mubr.bf16.mxu1 %v13384_v36 }
 0x107   :  { %5536 = vmatpush1.bf16.msra.mxu0 %v11625_v38  ;;  %v11717_v38 = vld [vmem:[%s17100_s2 + $0x1214] ss:$72 sps:$4 sm:$0xff]  }
 0x108   :  { %5665 = vmatpush1.bf16.msra.mxu1 %v11628_v39  ;;  %5537 = vmatprep.subr.bf16.mxu0 %v11633_v40  ;;  %v11720_v39 = vld [vmem:[%s17100_s2 + $0x121c] ss:$72 sps:$4 sm:$0xff]   ;;  %v11715_v40 = vld [vmem:[%s17100_s2 + $0x1210] ss:$72 sps:$4 sm:$0xff]  }
 0x109   :  { %5666 = vmatprep.subr.bf16.mxu1 %v11636_v41  ;;  %v11718_v41 = vld [vmem:[%s17100_s2 + $0x1218] ss:$72 sps:$4 sm:$0xff]  }
 0x10b   :  { %5538 = vmatpush1.bf16.msra.mxu0 %v11631_v42  ;;  %v11723_v42 = vld [vmem:[%s17100_s2 + $0x12a4] ss:$72 sps:$4 sm:$0xff]  }
 0x10c   :  { %5667 = vmatpush1.bf16.msra.mxu1 %v11634_v43  ;;  %5539 = vmatprep.subr.bf16.mxu0 %v11639_v44  ;;  %v11726_v43 = vld [vmem:[%s17100_s2 + $0x12ac] ss:$72 sps:$4 sm:$0xff]   ;;  %v11721_v44 = vld [vmem:[%s17100_s2 + $0x12a0] ss:$72 sps:$4 sm:$0xff]  }
 0x10d   :  { %5668 = vmatprep.subr.bf16.mxu1 %v11642_v45  ;;  %v11724_v45 = vld [vmem:[%s17100_s2 + $0x12a8] ss:$72 sps:$4 sm:$0xff]  }
 0x10f   :  { %5540 = vmatpush1.bf16.msra.mxu0 %v11637_v46  ;;  %v11729_v46 = vld [vmem:[%s17100_s2 + $0x1334] ss:$72 sps:$4 sm:$0xff]  }
 0x110   :  { %5669 = vmatpush1.bf16.msra.mxu1 %v11640_v47  ;;  %5541 = vmatprep.subr.bf16.mxu0 %v11645_v48  ;;  %v11732_v47 = vld [vmem:[%s17100_s2 + $0x133c] ss:$72 sps:$4 sm:$0xff]   ;;  %v11727_v48 = vld [vmem:[%s17100_s2 + $0x1330] ss:$72 sps:$4 sm:$0xff]  }
 0x111   :  { %5670 = vmatprep.subr.bf16.mxu1 %v11648_v49  ;;  %v11730_v49 = vld [vmem:[%s17100_s2 + $0x1338] ss:$72 sps:$4 sm:$0xff]  }
 0x113   :  { %5542 = vmatpush1.bf16.msra.mxu0 %v11643_v51  ;;  %v11735_v51 = vld [vmem:[%s17100_s2 + $0x13c4] ss:$72 sps:$4 sm:$0xff]  }
 0x114   :  { %5671 = vmatpush1.bf16.msra.mxu1 %v11646_v52  ;;  %5543 = vmatprep.subr.bf16.mxu0 %v11651_v53  ;;  %v11738_v52 = vld [vmem:[%s17100_s2 + $0x13cc] ss:$72 sps:$4 sm:$0xff]   ;;  %v11733_v53 = vld [vmem:[%s17100_s2 + $0x13c0] ss:$72 sps:$4 sm:$0xff]  }
 0x115   :  { %5672 = vmatprep.subr.bf16.mxu1 %v11654_v54  ;;  %v11736_v54 = vld [vmem:[%s17100_s2 + $0x13c8] ss:$72 sps:$4 sm:$0xff]  }
 0x117   :  { %5544 = vmatpush1.bf16.msra.mxu0 %v11649_v55  ;;  %v11741_v55 = vld [vmem:[%s17100_s2 + $0x1454] ss:$72 sps:$4 sm:$0xff]  }
 0x118   :  { %5673 = vmatpush1.bf16.msra.mxu1 %v11652_v56  ;;  %5545 = vmatprep.subr.bf16.mxu0 %v11657_v57  ;;  %v11744_v56 = vld [vmem:[%s17100_s2 + $0x145c] ss:$72 sps:$4 sm:$0xff]   ;;  %v11739_v57 = vld [vmem:[%s17100_s2 + $0x1450] ss:$72 sps:$4 sm:$0xff]  }
 0x119   :  { %5674 = vmatprep.subr.bf16.mxu1 %v11660_v58  ;;  %v11742_v58 = vld [vmem:[%s17100_s2 + $0x1458] ss:$72 sps:$4 sm:$0xff]  }
 0x11b   :  { %5546 = vmatpush1.bf16.msra.mxu0 %v11655_v59  ;;  %v11747_v59 = vld [vmem:[%s17100_s2 + $0x14e4] ss:$72 sps:$4 sm:$0xff]  }
 0x11c   :  { %5675 = vmatpush1.bf16.msra.mxu1 %v11658_v60  ;;  %5547 = vmatprep.subr.bf16.mxu0 %v11663_v61  ;;  %v11750_v60 = vld [vmem:[%s17100_s2 + $0x14ec] ss:$72 sps:$4 sm:$0xff]   ;;  %v11745_v61 = vld [vmem:[%s17100_s2 + $0x14e0] ss:$72 sps:$4 sm:$0xff]  }
 0x11d   :  { %5676 = vmatprep.subr.bf16.mxu1 %v11666_v62  ;;  %v11748_v62 = vld [vmem:[%s17100_s2 + $0x14e8] ss:$72 sps:$4 sm:$0xff]  }
 0x11f   :  { %5548 = vmatpush1.bf16.msra.mxu0 %v11661_v63  ;;  %v11753_v63 = vld [vmem:[%s17100_s2 + $0x1574] ss:$72 sps:$4 sm:$0xff]  }
 0x120   :  { %5677 = vmatpush1.bf16.msra.mxu1 %v11664_v0  ;;  %5549 = vmatprep.subr.bf16.mxu0 %v11669_v1  ;;  %v11756_v0 = vld [vmem:[%s17100_s2 + $0x157c] ss:$72 sps:$4 sm:$0xff]   ;;  %v11751_v1 = vld [vmem:[%s17100_s2 + $0x1570] ss:$72 sps:$4 sm:$0xff]  }
 0x121   :  { %5678 = vmatprep.subr.bf16.mxu1 %v11672_v2  ;;  %v11754_v2 = vld [vmem:[%s17100_s2 + $0x1578] ss:$72 sps:$4 sm:$0xff]  }
 0x123   :  { %5550 = vmatpush1.bf16.msra.mxu0 %v11667_v3  ;;  %v11759_v3 = vld [vmem:[%s17100_s2 + $0x1604] ss:$72 sps:$4 sm:$0xff]  }
 0x124   :  { %5679 = vmatpush1.bf16.msra.mxu1 %v11670_v4  ;;  %5551 = vmatprep.subr.bf16.mxu0 %v11675_v5  ;;  %v11762_v4 = vld [vmem:[%s17100_s2 + $0x160c] ss:$72 sps:$4 sm:$0xff]   ;;  %v11757_v5 = vld [vmem:[%s17100_s2 + $0x1600] ss:$72 sps:$4 sm:$0xff]  }
 0x125   :  { %5680 = vmatprep.subr.bf16.mxu1 %v11678_v6  ;;  %v11760_v6 = vld [vmem:[%s17100_s2 + $0x1608] ss:$72 sps:$4 sm:$0xff]  }
 0x127   :  { %5552 = vmatpush1.bf16.msra.mxu0 %v11673_v7  ;;  %v11765_v7 = vld [vmem:[%s17100_s2 + $0x1694] ss:$72 sps:$4 sm:$0xff]  }
 0x128   :  { %5681 = vmatpush1.bf16.msra.mxu1 %v11676_v8  ;;  %5553 = vmatprep.subr.bf16.mxu0 %v11681_v10  ;;  %v11768_v8 = vld [vmem:[%s17100_s2 + $0x169c] ss:$72 sps:$4 sm:$0xff]   ;;  %v11763_v10 = vld [vmem:[%s17100_s2 + $0x1690] ss:$72 sps:$4 sm:$0xff]  }
 0x129   :  { %5682 = vmatprep.subr.bf16.mxu1 %v11684_v11  ;;  %v11766_v11 = vld [vmem:[%s17100_s2 + $0x1698] ss:$72 sps:$4 sm:$0xff]  }
 0x12b   :  { %5554 = vmatpush1.bf16.msra.mxu0 %v11679_v12  ;;  %v11771_v12 = vld [vmem:[%s17100_s2 + $0x1724] ss:$72 sps:$4 sm:$0xff]  }
 0x12c   :  { %5683 = vmatpush1.bf16.msra.mxu1 %v11682_v13  ;;  %5555 = vmatprep.subr.bf16.mxu0 %v11687_v14  ;;  %v11774_v13 = vld [vmem:[%s17100_s2 + $0x172c] ss:$72 sps:$4 sm:$0xff]   ;;  %v11769_v14 = vld [vmem:[%s17100_s2 + $0x1720] ss:$72 sps:$4 sm:$0xff]  }
 0x12d   :  { %5684 = vmatprep.subr.bf16.mxu1 %v11690_v15  ;;  %v11772_v15 = vld [vmem:[%s17100_s2 + $0x1728] ss:$72 sps:$4 sm:$0xff]  }
 0x12f   :  { %5556 = vmatpush1.bf16.msra.mxu0 %v11685_v16  ;;  %v11777_v16 = vld [vmem:[%s17100_s2 + $0x17b4] ss:$72 sps:$4 sm:$0xff]  }
 0x130   :  { %5685 = vmatpush1.bf16.msra.mxu1 %v11688_v18  ;;  %5557 = vmatprep.subr.bf16.mxu0 %v11693_v19  ;;  %v11780_v18 = vld [vmem:[%s17100_s2 + $0x17bc] ss:$72 sps:$4 sm:$0xff]   ;;  %v11775_v19 = vld [vmem:[%s17100_s2 + $0x17b0] ss:$72 sps:$4 sm:$0xff]  }
 0x131   :  { %5686 = vmatprep.subr.bf16.mxu1 %v11696_v20  ;;  %v11778_v20 = vld [vmem:[%s17100_s2 + $0x17b8] ss:$72 sps:$4 sm:$0xff]  }
 0x133   :  { %5558 = vmatpush1.bf16.msra.mxu0 %v11691_v21  ;;  %v11783_v21 = vld [vmem:[%s17100_s2 + $0x1844] ss:$72 sps:$4 sm:$0xff]  }
 0x134   :  { %5687 = vmatpush1.bf16.msra.mxu1 %v11694_v22  ;;  %5559 = vmatprep.subr.bf16.mxu0 %v11699_v23  ;;  %v11786_v22 = vld [vmem:[%s17100_s2 + $0x184c] ss:$72 sps:$4 sm:$0xff]   ;;  %v11781_v23 = vld [vmem:[%s17100_s2 + $0x1840] ss:$72 sps:$4 sm:$0xff]  }
 0x135   :  { %5688 = vmatprep.subr.bf16.mxu1 %v11702_v24  ;;  %v11784_v24 = vld [vmem:[%s17100_s2 + $0x1848] ss:$72 sps:$4 sm:$0xff]  }
 0x137   :  { %5560 = vmatpush1.bf16.msra.mxu0 %v11697_v27  ;;  %v11789_v27 = vld [vmem:[%s17100_s2 + $0x18d4] ss:$72 sps:$4 sm:$0xff]  }
 0x138   :  { %5689 = vmatpush1.bf16.msra.mxu1 %v11700_v28  ;;  %5561 = vmatprep.subr.bf16.mxu0 %v11705_v29  ;;  %v11792_v28 = vld [vmem:[%s17100_s2 + $0x18dc] ss:$72 sps:$4 sm:$0xff]   ;;  %v11787_v29 = vld [vmem:[%s17100_s2 + $0x18d0] ss:$72 sps:$4 sm:$0xff]  }
 0x139   :  { %5690 = vmatprep.subr.bf16.mxu1 %v11708_v30  ;;  %v11790_v30 = vld [vmem:[%s17100_s2 + $0x18d8] ss:$72 sps:$4 sm:$0xff]  }
 0x13b   :  { %5562 = vmatpush1.bf16.msra.mxu0 %v11703_v31  ;;  %v11795_v31 = vld [vmem:[%s17100_s2 + $0x1964] ss:$72 sps:$4 sm:$0xff]  }
 0x13c   :  { %5691 = vmatpush1.bf16.msra.mxu1 %v11706_v32  ;;  %5563 = vmatprep.subr.bf16.mxu0 %v11711_v33  ;;  %v11798_v32 = vld [vmem:[%s17100_s2 + $0x196c] ss:$72 sps:$4 sm:$0xff]   ;;  %v11793_v33 = vld [vmem:[%s17100_s2 + $0x1960] ss:$72 sps:$4 sm:$0xff]  }
 0x13d   :  { %5692 = vmatprep.subr.bf16.mxu1 %v11714_v34  ;;  %v11796_v34 = vld [vmem:[%s17100_s2 + $0x1968] ss:$72 sps:$4 sm:$0xff]  }
 0x13f   :  { %5564 = vmatpush1.bf16.msra.mxu0 %v11709_v35  ;;  %v11801_v35 = vld [vmem:[%s17100_s2 + $0x19f4] ss:$72 sps:$4 sm:$0xff]  }
 0x140   :  { %5693 = vmatpush1.bf16.msra.mxu1 %v11712_v37  ;;  %5576 = vmatprep.subr.bf16.mxu0 %v11717_v38  ;;  %v11804_v37 = vld [vmem:[%s17100_s2 + $0x19fc] ss:$72 sps:$4 sm:$0xff]   ;;  %v11799_v38 = vld [vmem:[%s17100_s2 + $0x19f0] ss:$72 sps:$4 sm:$0xff]  }
 0x141   :  { %5705 = vmatprep.subr.bf16.mxu1 %v11720_v39  ;;  %v11802_v39 = vld [vmem:[%s17100_s2 + $0x19f8] ss:$72 sps:$4 sm:$0xff]  }
 0x142   :  { %5566 = vmatmul.mubr.bf16.vlgmr.msra.gmra.mrb[4].mxu0 %v13514_v17 }
 0x143   :  { %5695 = vmatmul.mubr.bf16.vlgmr.msra.gmra.mrb[4].mxu1 %v13514_v17  ;;  %5577 = vmatpush1.bf16.msra.mxu0 %v11715_v40  ;;  %v11807_v40 = vld [vmem:[%s17100_s2 + $0x1a84] ss:$72 sps:$4 sm:$0xff]  }
 0x144   :  { %5706 = vmatpush1.bf16.msra.mxu1 %v11718_v41  ;;  %5578 = vmatprep.subr.bf16.mxu0 %v11723_v42  ;;  %v11810_v41 = vld [vmem:[%s17100_s2 + $0x1a8c] ss:$72 sps:$4 sm:$0xff]   ;;  %v11805_v42 = vld [vmem:[%s17100_s2 + $0x1a80] ss:$72 sps:$4 sm:$0xff]  }
 0x145   :  { %5707 = vmatprep.subr.bf16.mxu1 %v11726_v43  ;;  %5608 = vmatprep.mubr.bf16.mxu0 %v13539_v25  ;;  %v11808_v43 = vld [vmem:[%s17100_s2 + $0x1a88] ss:$72 sps:$4 sm:$0xff]  }
 0x146   :  { %5737 = vmatprep.mubr.bf16.mxu1 %v13539_v25 }
 0x147   :  { %5579 = vmatpush1.bf16.msra.mxu0 %v11721_v44  ;;  %v11813_v44 = vld [vmem:[%s17100_s2 + $0x24] ss:$72 sps:$4 sm:$0xff]  }
 0x148   :  { %5708 = vmatpush1.bf16.msra.mxu1 %v11724_v45  ;;  %5580 = vmatprep.subr.bf16.mxu0 %v11729_v46  ;;  %v11816_v45 = vld [vmem:[%s17100_s2 + $0x2c] ss:$72 sps:$4 sm:$0xff]   ;;  %v11811_v46 = vld [vmem:[%s17100_s2 + $0x20] ss:$72 sps:$4 sm:$0xff]  }
 0x149   :  { %5709 = vmatprep.subr.bf16.mxu1 %v11732_v47  ;;  %v11814_v47 = vld [vmem:[%s17100_s2 + $0x28] ss:$72 sps:$4 sm:$0xff]  }
 0x14b   :  { %5581 = vmatpush1.bf16.msra.mxu0 %v11727_v48  ;;  %v11819_v48 = vld [vmem:[%s17100_s2 + $0xb4] ss:$72 sps:$4 sm:$0xff]  }
 0x14c   :  { %5710 = vmatpush1.bf16.msra.mxu1 %v11730_v49  ;;  %5582 = vmatprep.subr.bf16.mxu0 %v11735_v51  ;;  %v11822_v49 = vld [vmem:[%s17100_s2 + $0xbc] ss:$72 sps:$4 sm:$0xff]   ;;  %v11817_v51 = vld [vmem:[%s17100_s2 + $0xb0] ss:$72 sps:$4 sm:$0xff]  }
 0x14d   :  { %5711 = vmatprep.subr.bf16.mxu1 %v11738_v52  ;;  %v11820_v52 = vld [vmem:[%s17100_s2 + $0xb8] ss:$72 sps:$4 sm:$0xff]  }
 0x14f   :  { %5583 = vmatpush1.bf16.msra.mxu0 %v11733_v53  ;;  %v11825_v53 = vld [vmem:[%s17100_s2 + $0x144] ss:$72 sps:$4 sm:$0xff]  }
 0x150   :  { %5712 = vmatpush1.bf16.msra.mxu1 %v11736_v54  ;;  %5584 = vmatprep.subr.bf16.mxu0 %v11741_v55  ;;  %v11828_v54 = vld [vmem:[%s17100_s2 + $0x14c] ss:$72 sps:$4 sm:$0xff]   ;;  %v11823_v55 = vld [vmem:[%s17100_s2 + $0x140] ss:$72 sps:$4 sm:$0xff]  }
 0x151   :  { %5713 = vmatprep.subr.bf16.mxu1 %v11744_v56  ;;  %v11826_v56 = vld [vmem:[%s17100_s2 + $0x148] ss:$72 sps:$4 sm:$0xff]  }
 0x153   :  { %5585 = vmatpush1.bf16.msra.mxu0 %v11739_v57  ;;  %v11831_v57 = vld [vmem:[%s17100_s2 + $0x1d4] ss:$72 sps:$4 sm:$0xff]  }
 0x154   :  { %5714 = vmatpush1.bf16.msra.mxu1 %v11742_v58  ;;  %5586 = vmatprep.subr.bf16.mxu0 %v11747_v59  ;;  %v11834_v58 = vld [vmem:[%s17100_s2 + $0x1dc] ss:$72 sps:$4 sm:$0xff]   ;;  %v11829_v59 = vld [vmem:[%s17100_s2 + $0x1d0] ss:$72 sps:$4 sm:$0xff]  }
 0x155   :  { %5715 = vmatprep.subr.bf16.mxu1 %v11750_v60  ;;  %v11832_v60 = vld [vmem:[%s17100_s2 + $0x1d8] ss:$72 sps:$4 sm:$0xff]  }
 0x157   :  { %5587 = vmatpush1.bf16.msra.mxu0 %v11745_v61  ;;  %v11837_v61 = vld [vmem:[%s17100_s2 + $0x264] ss:$72 sps:$4 sm:$0xff]  }
 0x158   :  { %5716 = vmatpush1.bf16.msra.mxu1 %v11748_v62  ;;  %5588 = vmatprep.subr.bf16.mxu0 %v11753_v63  ;;  %v11840_v62 = vld [vmem:[%s17100_s2 + $0x26c] ss:$72 sps:$4 sm:$0xff]   ;;  %v11835_v63 = vld [vmem:[%s17100_s2 + $0x260] ss:$72 sps:$4 sm:$0xff]  }
 0x159   :  { %5717 = vmatprep.subr.bf16.mxu1 %v11756_v0  ;;  %v11838_v0 = vld [vmem:[%s17100_s2 + $0x268] ss:$72 sps:$4 sm:$0xff]  }
 0x15b   :  { %5589 = vmatpush1.bf16.msra.mxu0 %v11751_v1  ;;  %v11843_v1 = vld [vmem:[%s17100_s2 + $0x2f4] ss:$72 sps:$4 sm:$0xff]  }
 0x15c   :  { %5718 = vmatpush1.bf16.msra.mxu1 %v11754_v2  ;;  %5590 = vmatprep.subr.bf16.mxu0 %v11759_v3  ;;  %v11846_v2 = vld [vmem:[%s17100_s2 + $0x2fc] ss:$72 sps:$4 sm:$0xff]   ;;  %v11841_v3 = vld [vmem:[%s17100_s2 + $0x2f0] ss:$72 sps:$4 sm:$0xff]  }
 0x15d   :  { %5719 = vmatprep.subr.bf16.mxu1 %v11762_v4  ;;  %v11844_v4 = vld [vmem:[%s17100_s2 + $0x2f8] ss:$72 sps:$4 sm:$0xff]  }
 0x15f   :  { %5591 = vmatpush1.bf16.msra.mxu0 %v11757_v5  ;;  %v11849_v5 = vld [vmem:[%s17100_s2 + $0x384] ss:$72 sps:$4 sm:$0xff]  }
 0x160   :  { %5720 = vmatpush1.bf16.msra.mxu1 %v11760_v6  ;;  %5592 = vmatprep.subr.bf16.mxu0 %v11765_v7  ;;  %v11852_v6 = vld [vmem:[%s17100_s2 + $0x38c] ss:$72 sps:$4 sm:$0xff]  }
 0x161   :  { %5721 = vmatprep.subr.bf16.mxu1 %v11768_v8 }
 0x163   :  { %5593 = vmatpush1.bf16.msra.mxu0 %v11763_v10 }
 0x164   :  { %5722 = vmatpush1.bf16.msra.mxu1 %v11766_v11  ;;  %5594 = vmatprep.subr.bf16.mxu0 %v11771_v12 }
 0x165   :  { %5723 = vmatprep.subr.bf16.mxu1 %v11774_v13 }
 0x167   :  { %5595 = vmatpush1.bf16.msra.mxu0 %v11769_v14  ;;  %v11847_v14 = vld [vmem:[%s17100_s2 + $0x380] ss:$72 sps:$4 sm:$0xff]  }
 0x168   :  { %5724 = vmatpush1.bf16.msra.mxu1 %v11772_v15  ;;  %5596 = vmatprep.subr.bf16.mxu0 %v11777_v16  ;;  %v11850_v15 = vld [vmem:[%s17100_s2 + $0x388] ss:$72 sps:$4 sm:$0xff]  }
 0x169   :  { %5725 = vmatprep.subr.bf16.mxu1 %v11780_v18 }
 0x16b   :  { %5597 = vmatpush1.bf16.msra.mxu0 %v11775_v19  ;;  %v11855_v19 = vld [vmem:[%s17100_s2 + $0x414] ss:$72 sps:$4 sm:$0xff]  }
 0x16c   :  { %5726 = vmatpush1.bf16.msra.mxu1 %v11778_v20  ;;  %5598 = vmatprep.subr.bf16.mxu0 %v11783_v21  ;;  %v11858_v20 = vld [vmem:[%s17100_s2 + $0x41c] ss:$72 sps:$4 sm:$0xff]   ;;  %v11853_v21 = vld [vmem:[%s17100_s2 + $0x410] ss:$72 sps:$4 sm:$0xff]  }
 0x16d   :  { %5727 = vmatprep.subr.bf16.mxu1 %v11786_v22  ;;  %v11856_v22 = vld [vmem:[%s17100_s2 + $0x418] ss:$72 sps:$4 sm:$0xff]  }
 0x16f   :  { %5599 = vmatpush1.bf16.msra.mxu0 %v11781_v23  ;;  %v11861_v23 = vld [vmem:[%s17100_s2 + $0x4a4] ss:$72 sps:$4 sm:$0xff]  }
 0x170   :  { %5728 = vmatpush1.bf16.msra.mxu1 %v11784_v24  ;;  %5600 = vmatprep.subr.bf16.mxu0 %v11789_v27  ;;  %v11864_v24 = vld [vmem:[%s17100_s2 + $0x4ac] ss:$72 sps:$4 sm:$0xff]   ;;  %v11859_v27 = vld [vmem:[%s17100_s2 + $0x4a0] ss:$72 sps:$4 sm:$0xff]  }
 0x171   :  { %5729 = vmatprep.subr.bf16.mxu1 %v11792_v28  ;;  %v11862_v28 = vld [vmem:[%s17100_s2 + $0x4a8] ss:$72 sps:$4 sm:$0xff]  }
 0x173   :  { %5601 = vmatpush1.bf16.msra.mxu0 %v11787_v29  ;;  %v11867_v29 = vld [vmem:[%s17100_s2 + $0x534] ss:$72 sps:$4 sm:$0xff]  }
 0x174   :  { %5730 = vmatpush1.bf16.msra.mxu1 %v11790_v30  ;;  %5602 = vmatprep.subr.bf16.mxu0 %v11795_v31  ;;  %v11870_v30 = vld [vmem:[%s17100_s2 + $0x53c] ss:$72 sps:$4 sm:$0xff]   ;;  %v11865_v31 = vld [vmem:[%s17100_s2 + $0x530] ss:$72 sps:$4 sm:$0xff]  }
 0x175   :  { %5731 = vmatprep.subr.bf16.mxu1 %v11798_v32  ;;  %v11868_v32 = vld [vmem:[%s17100_s2 + $0x538] ss:$72 sps:$4 sm:$0xff]  }
 0x177   :  { %5603 = vmatpush1.bf16.msra.mxu0 %v11793_v33  ;;  %v11873_v33 = vld [vmem:[%s17100_s2 + $0x5c4] ss:$72 sps:$4 sm:$0xff]  }
 0x178   :  { %5732 = vmatpush1.bf16.msra.mxu1 %v11796_v34  ;;  %5604 = vmatprep.subr.bf16.mxu0 %v11801_v35  ;;  %v11876_v34 = vld [vmem:[%s17100_s2 + $0x5cc] ss:$72 sps:$4 sm:$0xff]   ;;  %v11871_v35 = vld [vmem:[%s17100_s2 + $0x5c0] ss:$72 sps:$4 sm:$0xff]  }
 0x179   :  { %5733 = vmatprep.subr.bf16.mxu1 %v11804_v37  ;;  %v11874_v37 = vld [vmem:[%s17100_s2 + $0x5c8] ss:$72 sps:$4 sm:$0xff]  }
 0x17b   :  { %5605 = vmatpush1.bf16.msra.mxu0 %v11799_v38  ;;  %v11879_v38 = vld [vmem:[%s17100_s2 + $0x654] ss:$72 sps:$4 sm:$0xff]  }
 0x17c   :  { %5734 = vmatpush1.bf16.msra.mxu1 %v11802_v39  ;;  %5606 = vmatprep.subr.bf16.mxu0 %v11807_v40  ;;  %v11882_v39 = vld [vmem:[%s17100_s2 + $0x65c] ss:$72 sps:$4 sm:$0xff]   ;;  %v11877_v40 = vld [vmem:[%s17100_s2 + $0x650] ss:$72 sps:$4 sm:$0xff]  }
 0x17d   :  { %5735 = vmatprep.subr.bf16.mxu1 %v11810_v41  ;;  %v11880_v41 = vld [vmem:[%s17100_s2 + $0x658] ss:$72 sps:$4 sm:$0xff]  }
 0x17f   :  { %5607 = vmatpush1.bf16.msra.mxu0 %v11805_v42  ;;  %v11885_v42 = vld [vmem:[%s17100_s2 + $0x6e4] ss:$72 sps:$4 sm:$0xff]  }
 0x180   :  { %5736 = vmatpush1.bf16.msra.mxu1 %v11808_v43  ;;  %5748 = vmatprep.subr.bf16.mxu0 %v11813_v44  ;;  %v11888_v43 = vld [vmem:[%s17100_s2 + $0x6ec] ss:$72 sps:$4 sm:$0xff]   ;;  %v11883_v44 = vld [vmem:[%s17100_s2 + $0x6e0] ss:$72 sps:$4 sm:$0xff]  }
 0x181   :  { %5877 = vmatprep.subr.bf16.mxu1 %v11816_v45  ;;  %v11886_v45 = vld [vmem:[%s17100_s2 + $0x6e8] ss:$72 sps:$4 sm:$0xff]  }
 0x182   :  { %5609 = vmatmul.mubr.bf16.vlgmr.msra.gmra.mrb[4].mxu0 %v13720_v26 }
 0x183   :  { %5738 = vmatmul.mubr.bf16.vlgmr.msra.gmra.mrb[4].mxu1 %v13720_v26  ;;  %5749 = vmatpush1.bf16.msra.mxu0 %v11811_v46  ;;  %v11891_v46 = vld [vmem:[%s17100_s2 + $0x774] ss:$72 sps:$4 sm:$0xff]  }
 0x184   :  { %5878 = vmatpush1.bf16.msra.mxu1 %v11814_v47  ;;  %5750 = vmatprep.subr.bf16.mxu0 %v11819_v48  ;;  %v11894_v47 = vld [vmem:[%s17100_s2 + $0x77c] ss:$72 sps:$4 sm:$0xff]   ;;  %v11889_v48 = vld [vmem:[%s17100_s2 + $0x770] ss:$72 sps:$4 sm:$0xff]  }
 0x185   :  { %5879 = vmatprep.subr.bf16.mxu1 %v11822_v49  ;;  %5780 = vmatprep.mubr.bf16.mxu0 %v13232_v50  ;;  %v11892_v49 = vld [vmem:[%s17100_s2 + $0x778] ss:$72 sps:$4 sm:$0xff]  }
 0x186   :  { %5909 = vmatprep.mubr.bf16.mxu1 %v13232_v50 }
 0x187   :  { %5751 = vmatpush1.bf16.msra.mxu0 %v11817_v51  ;;  %v11897_v51 = vld [vmem:[%s17100_s2 + $0x804] ss:$72 sps:$4 sm:$0xff]  }
 0x188   :  { %5880 = vmatpush1.bf16.msra.mxu1 %v11820_v52  ;;  %5752 = vmatprep.subr.bf16.mxu0 %v11825_v53  ;;  %v11900_v52 = vld [vmem:[%s17100_s2 + $0x80c] ss:$72 sps:$4 sm:$0xff]   ;;  %v11895_v53 = vld [vmem:[%s17100_s2 + $0x800] ss:$72 sps:$4 sm:$0xff]  }
 0x189   :  { %5881 = vmatprep.subr.bf16.mxu1 %v11828_v54  ;;  %v11898_v54 = vld [vmem:[%s17100_s2 + $0x808] ss:$72 sps:$4 sm:$0xff]  }
 0x18b   :  { %5753 = vmatpush1.bf16.msra.mxu0 %v11823_v55  ;;  %v11903_v55 = vld [vmem:[%s17100_s2 + $0x894] ss:$72 sps:$4 sm:$0xff]  }
 0x18c   :  { %5882 = vmatpush1.bf16.msra.mxu1 %v11826_v56  ;;  %5754 = vmatprep.subr.bf16.mxu0 %v11831_v57  ;;  %v11906_v56 = vld [vmem:[%s17100_s2 + $0x89c] ss:$72 sps:$4 sm:$0xff]   ;;  %v11901_v57 = vld [vmem:[%s17100_s2 + $0x890] ss:$72 sps:$4 sm:$0xff]  }
 0x18d   :  { %5883 = vmatprep.subr.bf16.mxu1 %v11834_v58  ;;  %v11904_v58 = vld [vmem:[%s17100_s2 + $0x898] ss:$72 sps:$4 sm:$0xff]  }
 0x18f   :  { %5755 = vmatpush1.bf16.msra.mxu0 %v11829_v59  ;;  %v11909_v59 = vld [vmem:[%s17100_s2 + $0x924] ss:$72 sps:$4 sm:$0xff]  }
 0x190   :  { %5884 = vmatpush1.bf16.msra.mxu1 %v11832_v60  ;;  %5756 = vmatprep.subr.bf16.mxu0 %v11837_v61  ;;  %v11912_v60 = vld [vmem:[%s17100_s2 + $0x92c] ss:$72 sps:$4 sm:$0xff]   ;;  %v11907_v61 = vld [vmem:[%s17100_s2 + $0x920] ss:$72 sps:$4 sm:$0xff]  }
 0x191   :  { %5885 = vmatprep.subr.bf16.mxu1 %v11840_v62  ;;  %v11910_v62 = vld [vmem:[%s17100_s2 + $0x928] ss:$72 sps:$4 sm:$0xff]  }
 0x193   :  { %5757 = vmatpush1.bf16.msra.mxu0 %v11835_v63  ;;  %v11915_v63 = vld [vmem:[%s17100_s2 + $0x9b4] ss:$72 sps:$4 sm:$0xff]  }
 0x194   :  { %5886 = vmatpush1.bf16.msra.mxu1 %v11838_v0  ;;  %5758 = vmatprep.subr.bf16.mxu0 %v11843_v1  ;;  %v11918_v0 = vld [vmem:[%s17100_s2 + $0x9bc] ss:$72 sps:$4 sm:$0xff]   ;;  %v11913_v1 = vld [vmem:[%s17100_s2 + $0x9b0] ss:$72 sps:$4 sm:$0xff]  }
 0x195   :  { %5887 = vmatprep.subr.bf16.mxu1 %v11846_v2  ;;  %v14386_v7 = vpop.f32.mrb[0].mxu0  ;;  %v11916_v2 = vld [vmem:[%s17100_s2 + $0x9b8] ss:$72 sps:$4 sm:$0xff]  }
 0x196   :  { %v14388_v8 = vpop.f32.mrb[0].mxu1  ;;  %v14390_v10 = vpop.f32.mrb[1].mxu0 }
 0x197   :  { %v14392_v11 = vpop.f32.mrb[1].mxu1  ;;  %v14394_v12 = vpop.f32.mrb[2].mxu0  ;;  %5759 = vmatpush1.bf16.msra.mxu0 %v11841_v3  ;;  %v11921_v3 = vld [vmem:[%s17100_s2 + $0xa44] ss:$72 sps:$4 sm:$0xff]  }
 0x198   :  { %v14396_v13 = vpop.f32.mrb[2].mxu1  ;;  %5888 = vmatpush1.bf16.msra.mxu1 %v11844_v4  ;;  %v14404_v16 = vpop.f32.mrb[3].mxu0  ;;  %5760 = vmatprep.subr.bf16.mxu0 %v11849_v5  ;;  %v11924_v4 = vld [vmem:[%s17100_s2 + $0xa4c] ss:$72 sps:$4 sm:$0xff]   ;;  %v11919_v5 = vld [vmem:[%s17100_s2 + $0xa40] ss:$72 sps:$4 sm:$0xff]  }
 0x199   :  { %v14406_v18 = vpop.f32.mrb[3].mxu1  ;;  %5889 = vmatprep.subr.bf16.mxu1 %v11852_v6  ;;  %v11922_v6 = vld [vmem:[%s17100_s2 + $0xa48] ss:$72 sps:$4 sm:$0xff]  }
 0x19b   :  { %5761 = vmatpush1.bf16.msra.mxu0 %v11847_v14  ;;  %v11927_v14 = vld [vmem:[%s17100_s2 + $0xad4] ss:$72 sps:$4 sm:$0xff]  }
 0x19c   :  { %5890 = vmatpush1.bf16.msra.mxu1 %v11850_v15  ;;  %5762 = vmatprep.subr.bf16.mxu0 %v11855_v19  ;;  %v11930_v15 = vld [vmem:[%s17100_s2 + $0xadc] ss:$72 sps:$4 sm:$0xff]   ;;  %v11925_v19 = vld [vmem:[%s17100_s2 + $0xad0] ss:$72 sps:$4 sm:$0xff]  }
 0x19d   :  { %5891 = vmatprep.subr.bf16.mxu1 %v11858_v20  ;;  %v11928_v20 = vld [vmem:[%s17100_s2 + $0xad8] ss:$72 sps:$4 sm:$0xff]  }
 0x19f   :  { %5763 = vmatpush1.bf16.msra.mxu0 %v11853_v21  ;;  %v11933_v21 = vld [vmem:[%s17100_s2 + $0xb64] ss:$72 sps:$4 sm:$0xff]  }
 0x1a0   :  { %5892 = vmatpush1.bf16.msra.mxu1 %v11856_v22  ;;  %5764 = vmatprep.subr.bf16.mxu0 %v11861_v23  ;;  %v11936_v22 = vld [vmem:[%s17100_s2 + $0xb6c] ss:$72 sps:$4 sm:$0xff]   ;;  %v11931_v23 = vld [vmem:[%s17100_s2 + $0xb60] ss:$72 sps:$4 sm:$0xff]  }
 0x1a1   :  { %5893 = vmatprep.subr.bf16.mxu1 %v11864_v24  ;;  %v11934_v24 = vld [vmem:[%s17100_s2 + $0xb68] ss:$72 sps:$4 sm:$0xff]  }
 0x1a3   :  { %5765 = vmatpush1.bf16.msra.mxu0 %v11859_v27  ;;  %v11939_v27 = vld [vmem:[%s17100_s2 + $0xbf4] ss:$72 sps:$4 sm:$0xff]  }
 0x1a4   :  { %5894 = vmatpush1.bf16.msra.mxu1 %v11862_v28  ;;  %5766 = vmatprep.subr.bf16.mxu0 %v11867_v29  ;;  %v11942_v28 = vld [vmem:[%s17100_s2 + $0xbfc] ss:$72 sps:$4 sm:$0xff]   ;;  %v11937_v29 = vld [vmem:[%s17100_s2 + $0xbf0] ss:$72 sps:$4 sm:$0xff]  }
 0x1a5   :  { %5895 = vmatprep.subr.bf16.mxu1 %v11870_v30  ;;  %v11940_v30 = vld [vmem:[%s17100_s2 + $0xbf8] ss:$72 sps:$4 sm:$0xff]  }
 0x1a7   :  { %5767 = vmatpush1.bf16.msra.mxu0 %v11865_v31  ;;  %v11945_v31 = vld [vmem:[%s17100_s2 + $0xc84] ss:$72 sps:$4 sm:$0xff]  }
 0x1a8   :  { %5896 = vmatpush1.bf16.msra.mxu1 %v11868_v32  ;;  %5768 = vmatprep.subr.bf16.mxu0 %v11873_v33  ;;  %v11948_v32 = vld [vmem:[%s17100_s2 + $0xc8c] ss:$72 sps:$4 sm:$0xff]   ;;  %v11943_v33 = vld [vmem:[%s17100_s2 + $0xc80] ss:$72 sps:$4 sm:$0xff]  }
 0x1a9   :  { %5897 = vmatprep.subr.bf16.mxu1 %v11876_v34  ;;  %v11946_v34 = vld [vmem:[%s17100_s2 + $0xc88] ss:$72 sps:$4 sm:$0xff]  }
 0x1ab   :  { %5769 = vmatpush1.bf16.msra.mxu0 %v11871_v35  ;;  %v11951_v35 = vld [vmem:[%s17100_s2 + $0xd14] ss:$72 sps:$4 sm:$0xff]  }
 0x1ac   :  { %5898 = vmatpush1.bf16.msra.mxu1 %v11874_v37  ;;  %5770 = vmatprep.subr.bf16.mxu0 %v11879_v38  ;;  %v11954_v37 = vld [vmem:[%s17100_s2 + $0xd1c] ss:$72 sps:$4 sm:$0xff]   ;;  %v11949_v38 = vld [vmem:[%s17100_s2 + $0xd10] ss:$72 sps:$4 sm:$0xff]  }
 0x1ad   :  { %5899 = vmatprep.subr.bf16.mxu1 %v11882_v39  ;;  %v11952_v39 = vld [vmem:[%s17100_s2 + $0xd18] ss:$72 sps:$4 sm:$0xff]  }
 0x1af   :  { %5771 = vmatpush1.bf16.msra.mxu0 %v11877_v40  ;;  %v11957_v40 = vld [vmem:[%s17100_s2 + $0xda4] ss:$72 sps:$4 sm:$0xff]  }
 0x1b0   :  { %5900 = vmatpush1.bf16.msra.mxu1 %v11880_v41  ;;  %5772 = vmatprep.subr.bf16.mxu0 %v11885_v42  ;;  %v11960_v41 = vld [vmem:[%s17100_s2 + $0xdac] ss:$72 sps:$4 sm:$0xff]   ;;  %v11955_v42 = vld [vmem:[%s17100_s2 + $0xda0] ss:$72 sps:$4 sm:$0xff]  }
 0x1b1   :  { %5901 = vmatprep.subr.bf16.mxu1 %v11888_v43  ;;  %v11958_v43 = vld [vmem:[%s17100_s2 + $0xda8] ss:$72 sps:$4 sm:$0xff]  }
 0x1b3   :  { %5773 = vmatpush1.bf16.msra.mxu0 %v11883_v44  ;;  %v11963_v44 = vld [vmem:[%s17100_s2 + $0xe34] ss:$72 sps:$4 sm:$0xff]  }
 0x1b4   :  { %5902 = vmatpush1.bf16.msra.mxu1 %v11886_v45  ;;  %5774 = vmatprep.subr.bf16.mxu0 %v11891_v46  ;;  %v11966_v45 = vld [vmem:[%s17100_s2 + $0xe3c] ss:$72 sps:$4 sm:$0xff]   ;;  %v11961_v46 = vld [vmem:[%s17100_s2 + $0xe30] ss:$72 sps:$4 sm:$0xff]  }
 0x1b5   :  { %5903 = vmatprep.subr.bf16.mxu1 %v11894_v47  ;;  %v11964_v47 = vld [vmem:[%s17100_s2 + $0xe38] ss:$72 sps:$4 sm:$0xff]  }
 0x1b7   :  { %5775 = vmatpush1.bf16.msra.mxu0 %v11889_v48  ;;  %v11969_v48 = vld [vmem:[%s17100_s2 + $0xec4] ss:$72 sps:$4 sm:$0xff]  }
 0x1b8   :  { %5904 = vmatpush1.bf16.msra.mxu1 %v11892_v49  ;;  %5776 = vmatprep.subr.bf16.mxu0 %v11897_v51  ;;  %v11972_v49 = vld [vmem:[%s17100_s2 + $0xecc] ss:$72 sps:$4 sm:$0xff]   ;;  %v11967_v51 = vld [vmem:[%s17100_s2 + $0xec0] ss:$72 sps:$4 sm:$0xff]  }
 0x1b9   :  { %5905 = vmatprep.subr.bf16.mxu1 %v11900_v52  ;;  %v11970_v52 = vld [vmem:[%s17100_s2 + $0xec8] ss:$72 sps:$4 sm:$0xff]  }
 0x1bb   :  { %5777 = vmatpush1.bf16.msra.mxu0 %v11895_v53  ;;  %v11975_v53 = vld [vmem:[%s17100_s2 + $0xf54] ss:$72 sps:$4 sm:$0xff]  }
 0x1bc   :  { %5906 = vmatpush1.bf16.msra.mxu1 %v11898_v54  ;;  %5778 = vmatprep.subr.bf16.mxu0 %v11903_v55  ;;  %v11978_v54 = vld [vmem:[%s17100_s2 + $0xf5c] ss:$72 sps:$4 sm:$0xff]   ;;  %v11973_v55 = vld [vmem:[%s17100_s2 + $0xf50] ss:$72 sps:$4 sm:$0xff]  }
 0x1bd   :  { %5907 = vmatprep.subr.bf16.mxu1 %v11906_v56  ;;  %v11976_v56 = vld [vmem:[%s17100_s2 + $0xf58] ss:$72 sps:$4 sm:$0xff]  }
 0x1bf   :  { %5779 = vmatpush1.bf16.msra.mxu0 %v11901_v57  ;;  %v11981_v57 = vld [vmem:[%s17100_s2 + $0xfe4] ss:$72 sps:$4 sm:$0xff]  }
 0x1c0   :  { %5908 = vmatpush1.bf16.msra.mxu1 %v11904_v58  ;;  %5791 = vmatprep.subr.bf16.mxu0 %v11909_v59  ;;  %v11984_v58 = vld [vmem:[%s17100_s2 + $0xfec] ss:$72 sps:$4 sm:$0xff]   ;;  %v11979_v59 = vld [vmem:[%s17100_s2 + $0xfe0] ss:$72 sps:$4 sm:$0xff]  }
 0x1c1   :  { %5920 = vmatprep.subr.bf16.mxu1 %v11912_v60  ;;  %v11982_v60 = vld [vmem:[%s17100_s2 + $0xfe8] ss:$72 sps:$4 sm:$0xff]  }
 0x1c2   :  { %5781 = vmatmul.mubr.bf16.vlgmr.msra.gmra.mrb[8].mxu0 %v13302_v9 }
 0x1c3   :  { %5910 = vmatmul.mubr.bf16.vlgmr.msra.gmra.mrb[8].mxu1 %v13302_v9  ;;  %5792 = vmatpush1.bf16.msra.mxu0 %v11907_v61  ;;  %v11987_v61 = vld [vmem:[%s17100_s2 + $0x1074] ss:$72 sps:$4 sm:$0xff]  }
 0x1c4   :  { %5921 = vmatpush1.bf16.msra.mxu1 %v11910_v62  ;;  %5793 = vmatprep.subr.bf16.mxu0 %v11915_v63  ;;  %v11990_v62 = vld [vmem:[%s17100_s2 + $0x107c] ss:$72 sps:$4 sm:$0xff]   ;;  %v11985_v63 = vld [vmem:[%s17100_s2 + $0x1070] ss:$72 sps:$4 sm:$0xff]  }
 0x1c5   :  { %5922 = vmatprep.subr.bf16.mxu1 %v11918_v0  ;;  %5823 = vmatprep.mubr.bf16.mxu0 %v13384_v36  ;;  %v11988_v0 = vld [vmem:[%s17100_s2 + $0x1078] ss:$72 sps:$4 sm:$0xff]  }
 0x1c6   :  { %5952 = vmatprep.mubr.bf16.mxu1 %v13384_v36 }
 0x1c7   :  { %5794 = vmatpush1.bf16.msra.mxu0 %v11913_v1  ;;  %v11993_v1 = vld [vmem:[%s17100_s2 + $0x1104] ss:$72 sps:$4 sm:$0xff]  }
 0x1c8   :  { %5923 = vmatpush1.bf16.msra.mxu1 %v11916_v2  ;;  %5795 = vmatprep.subr.bf16.mxu0 %v11921_v3  ;;  %v11996_v2 = vld [vmem:[%s17100_s2 + $0x110c] ss:$72 sps:$4 sm:$0xff]   ;;  %v11991_v3 = vld [vmem:[%s17100_s2 + $0x1100] ss:$72 sps:$4 sm:$0xff]  }
 0x1c9   :  { %5924 = vmatprep.subr.bf16.mxu1 %v11924_v4  ;;  %v11994_v4 = vld [vmem:[%s17100_s2 + $0x1108] ss:$72 sps:$4 sm:$0xff]  }
 0x1cb   :  { %5796 = vmatpush1.bf16.msra.mxu0 %v11919_v5  ;;  %v11999_v5 = vld [vmem:[%s17100_s2 + $0x1194] ss:$72 sps:$4 sm:$0xff]  }
 0x1cc   :  { %5925 = vmatpush1.bf16.msra.mxu1 %v11922_v6  ;;  %5797 = vmatprep.subr.bf16.mxu0 %v11927_v14  ;;  %v12002_v6 = vld [vmem:[%s17100_s2 + $0x119c] ss:$72 sps:$4 sm:$0xff]   ;;  %v11997_v14 = vld [vmem:[%s17100_s2 + $0x1190] ss:$72 sps:$4 sm:$0xff]  }
 0x1cd   :  { %5926 = vmatprep.subr.bf16.mxu1 %v11930_v15  ;;  %v12000_v15 = vld [vmem:[%s17100_s2 + $0x1198] ss:$72 sps:$4 sm:$0xff]  }
 0x1cf   :  { %5798 = vmatpush1.bf16.msra.mxu0 %v11925_v19  ;;  %v12005_v19 = vld [vmem:[%s17100_s2 + $0x1224] ss:$72 sps:$4 sm:$0xff]  }
 0x1d0   :  { %5927 = vmatpush1.bf16.msra.mxu1 %v11928_v20  ;;  %5799 = vmatprep.subr.bf16.mxu0 %v11933_v21  ;;  %v12008_v20 = vld [vmem:[%s17100_s2 + $0x122c] ss:$72 sps:$4 sm:$0xff]   ;;  %v12003_v21 = vld [vmem:[%s17100_s2 + $0x1220] ss:$72 sps:$4 sm:$0xff]  }
 0x1d1   :  { %5928 = vmatprep.subr.bf16.mxu1 %v11936_v22  ;;  %v12006_v22 = vld [vmem:[%s17100_s2 + $0x1228] ss:$72 sps:$4 sm:$0xff]  }
 0x1d3   :  { %5800 = vmatpush1.bf16.msra.mxu0 %v11931_v23  ;;  %v12011_v23 = vld [vmem:[%s17100_s2 + $0x12b4] ss:$72 sps:$4 sm:$0xff]  }
 0x1d4   :  { %5929 = vmatpush1.bf16.msra.mxu1 %v11934_v24  ;;  %5801 = vmatprep.subr.bf16.mxu0 %v11939_v27  ;;  %v12014_v24 = vld [vmem:[%s17100_s2 + $0x12bc] ss:$72 sps:$4 sm:$0xff]   ;;  %v12009_v27 = vld [vmem:[%s17100_s2 + $0x12b0] ss:$72 sps:$4 sm:$0xff]  }
 0x1d5   :  { %5930 = vmatprep.subr.bf16.mxu1 %v11942_v28  ;;  %v12012_v28 = vld [vmem:[%s17100_s2 + $0x12b8] ss:$72 sps:$4 sm:$0xff]  }
 0x1d7   :  { %5802 = vmatpush1.bf16.msra.mxu0 %v11937_v29  ;;  %v12017_v29 = vld [vmem:[%s17100_s2 + $0x1344] ss:$72 sps:$4 sm:$0xff]  }
 0x1d8   :  { %5931 = vmatpush1.bf16.msra.mxu1 %v11940_v30  ;;  %5803 = vmatprep.subr.bf16.mxu0 %v11945_v31  ;;  %v12020_v30 = vld [vmem:[%s17100_s2 + $0x134c] ss:$72 sps:$4 sm:$0xff]   ;;  %v12015_v31 = vld [vmem:[%s17100_s2 + $0x1340] ss:$72 sps:$4 sm:$0xff]  }
 0x1d9   :  { %5932 = vmatprep.subr.bf16.mxu1 %v11948_v32  ;;  %v12018_v32 = vld [vmem:[%s17100_s2 + $0x1348] ss:$72 sps:$4 sm:$0xff]  }
 0x1db   :  { %5804 = vmatpush1.bf16.msra.mxu0 %v11943_v33  ;;  %v12023_v33 = vld [vmem:[%s17100_s2 + $0x13d4] ss:$72 sps:$4 sm:$0xff]  }
 0x1dc   :  { %5933 = vmatpush1.bf16.msra.mxu1 %v11946_v34  ;;  %5805 = vmatprep.subr.bf16.mxu0 %v11951_v35  ;;  %v12026_v34 = vld [vmem:[%s17100_s2 + $0x13dc] ss:$72 sps:$4 sm:$0xff]   ;;  %v12021_v35 = vld [vmem:[%s17100_s2 + $0x13d0] ss:$72 sps:$4 sm:$0xff]  }
 0x1dd   :  { %5934 = vmatprep.subr.bf16.mxu1 %v11954_v37  ;;  %v12024_v37 = vld [vmem:[%s17100_s2 + $0x13d8] ss:$72 sps:$4 sm:$0xff]  }
 0x1df   :  { %5806 = vmatpush1.bf16.msra.mxu0 %v11949_v38  ;;  %v12029_v38 = vld [vmem:[%s17100_s2 + $0x1464] ss:$72 sps:$4 sm:$0xff]  }
 0x1e0   :  { %5935 = vmatpush1.bf16.msra.mxu1 %v11952_v39  ;;  %5807 = vmatprep.subr.bf16.mxu0 %v11957_v40  ;;  %v12032_v39 = vld [vmem:[%s17100_s2 + $0x146c] ss:$72 sps:$4 sm:$0xff]   ;;  %v12027_v40 = vld [vmem:[%s17100_s2 + $0x1460] ss:$72 sps:$4 sm:$0xff]  }
 0x1e1   :  { %5936 = vmatprep.subr.bf16.mxu1 %v11960_v41  ;;  %v12030_v41 = vld [vmem:[%s17100_s2 + $0x1468] ss:$72 sps:$4 sm:$0xff]  }
 0x1e3   :  { %5808 = vmatpush1.bf16.msra.mxu0 %v11955_v42  ;;  %v12035_v42 = vld [vmem:[%s17100_s2 + $0x14f4] ss:$72 sps:$4 sm:$0xff]  }
 0x1e4   :  { %5937 = vmatpush1.bf16.msra.mxu1 %v11958_v43  ;;  %5809 = vmatprep.subr.bf16.mxu0 %v11963_v44  ;;  %v12038_v43 = vld [vmem:[%s17100_s2 + $0x14fc] ss:$72 sps:$4 sm:$0xff]   ;;  %v12033_v44 = vld [vmem:[%s17100_s2 + $0x14f0] ss:$72 sps:$4 sm:$0xff]  }
 0x1e5   :  { %5938 = vmatprep.subr.bf16.mxu1 %v11966_v45  ;;  %v12036_v45 = vld [vmem:[%s17100_s2 + $0x14f8] ss:$72 sps:$4 sm:$0xff]  }
 0x1e7   :  { %5810 = vmatpush1.bf16.msra.mxu0 %v11961_v46  ;;  %v12041_v46 = vld [vmem:[%s17100_s2 + $0x1584] ss:$72 sps:$4 sm:$0xff]  }
 0x1e8   :  { %5939 = vmatpush1.bf16.msra.mxu1 %v11964_v47  ;;  %5811 = vmatprep.subr.bf16.mxu0 %v11969_v48  ;;  %v12044_v47 = vld [vmem:[%s17100_s2 + $0x158c] ss:$72 sps:$4 sm:$0xff]   ;;  %v12039_v48 = vld [vmem:[%s17100_s2 + $0x1580] ss:$72 sps:$4 sm:$0xff]  }
 0x1e9   :  { %5940 = vmatprep.subr.bf16.mxu1 %v11972_v49  ;;  %v12042_v49 = vld [vmem:[%s17100_s2 + $0x1588] ss:$72 sps:$4 sm:$0xff]  }
 0x1eb   :  { %5812 = vmatpush1.bf16.msra.mxu0 %v11967_v51  ;;  %v12047_v51 = vld [vmem:[%s17100_s2 + $0x1614] ss:$72 sps:$4 sm:$0xff]  }
 0x1ec   :  { %5941 = vmatpush1.bf16.msra.mxu1 %v11970_v52  ;;  %5813 = vmatprep.subr.bf16.mxu0 %v11975_v53  ;;  %v12050_v52 = vld [vmem:[%s17100_s2 + $0x161c] ss:$72 sps:$4 sm:$0xff]   ;;  %v12045_v53 = vld [vmem:[%s17100_s2 + $0x1610] ss:$72 sps:$4 sm:$0xff]  }
 0x1ed   :  { %5942 = vmatprep.subr.bf16.mxu1 %v11978_v54  ;;  %v12048_v54 = vld [vmem:[%s17100_s2 + $0x1618] ss:$72 sps:$4 sm:$0xff]  }
 0x1ef   :  { %5814 = vmatpush1.bf16.msra.mxu0 %v11973_v55  ;;  %v12053_v55 = vld [vmem:[%s17100_s2 + $0x16a4] ss:$72 sps:$4 sm:$0xff]  }
 0x1f0   :  { %5943 = vmatpush1.bf16.msra.mxu1 %v11976_v56  ;;  %5815 = vmatprep.subr.bf16.mxu0 %v11981_v57  ;;  %v12056_v56 = vld [vmem:[%s17100_s2 + $0x16ac] ss:$72 sps:$4 sm:$0xff]   ;;  %v12051_v57 = vld [vmem:[%s17100_s2 + $0x16a0] ss:$72 sps:$4 sm:$0xff]  }
 0x1f1   :  { %5944 = vmatprep.subr.bf16.mxu1 %v11984_v58  ;;  %v12054_v58 = vld [vmem:[%s17100_s2 + $0x16a8] ss:$72 sps:$4 sm:$0xff]  }
 0x1f3   :  { %5816 = vmatpush1.bf16.msra.mxu0 %v11979_v59  ;;  %v12059_v59 = vld [vmem:[%s17100_s2 + $0x1734] ss:$72 sps:$4 sm:$0xff]  }
 0x1f4   :  { %5945 = vmatpush1.bf16.msra.mxu1 %v11982_v60  ;;  %5817 = vmatprep.subr.bf16.mxu0 %v11987_v61  ;;  %v12062_v60 = vld [vmem:[%s17100_s2 + $0x173c] ss:$72 sps:$4 sm:$0xff]   ;;  %v12057_v61 = vld [vmem:[%s17100_s2 + $0x1730] ss:$72 sps:$4 sm:$0xff]  }
 0x1f5   :  { %5946 = vmatprep.subr.bf16.mxu1 %v11990_v62  ;;  %v12060_v62 = vld [vmem:[%s17100_s2 + $0x1738] ss:$72 sps:$4 sm:$0xff]  }
 0x1f7   :  { %5818 = vmatpush1.bf16.msra.mxu0 %v11985_v63  ;;  %v12065_v63 = vld [vmem:[%s17100_s2 + $0x17c4] ss:$72 sps:$4 sm:$0xff]  }
 0x1f8   :  { %5947 = vmatpush1.bf16.msra.mxu1 %v11988_v0  ;;  %5819 = vmatprep.subr.bf16.mxu0 %v11993_v1  ;;  %v12068_v0 = vld [vmem:[%s17100_s2 + $0x17cc] ss:$72 sps:$4 sm:$0xff]   ;;  %v12063_v1 = vld [vmem:[%s17100_s2 + $0x17c0] ss:$72 sps:$4 sm:$0xff]  }
 0x1f9   :  { %5948 = vmatprep.subr.bf16.mxu1 %v11996_v2  ;;  %v12066_v2 = vld [vmem:[%s17100_s2 + $0x17c8] ss:$72 sps:$4 sm:$0xff]  }
 0x1fb   :  { %5820 = vmatpush1.bf16.msra.mxu0 %v11991_v3  ;;  %v12071_v3 = vld [vmem:[%s17100_s2 + $0x1854] ss:$72 sps:$4 sm:$0xff]  }
 0x1fc   :  { %5949 = vmatpush1.bf16.msra.mxu1 %v11994_v4  ;;  %5821 = vmatprep.subr.bf16.mxu0 %v11999_v5  ;;  %v12074_v4 = vld [vmem:[%s17100_s2 + $0x185c] ss:$72 sps:$4 sm:$0xff]   ;;  %v12069_v5 = vld [vmem:[%s17100_s2 + $0x1850] ss:$72 sps:$4 sm:$0xff]  }
 0x1fd   :  { %5950 = vmatprep.subr.bf16.mxu1 %v12002_v6  ;;  %v12072_v6 = vld [vmem:[%s17100_s2 + $0x1858] ss:$72 sps:$4 sm:$0xff]  }
 0x1ff   :  { %5822 = vmatpush1.bf16.msra.mxu0 %v11997_v14  ;;  %v12077_v14 = vld [vmem:[%s17100_s2 + $0x18e4] ss:$72 sps:$4 sm:$0xff]  }
 0x200   :  { %5951 = vmatpush1.bf16.msra.mxu1 %v12000_v15  ;;  %5834 = vmatprep.subr.bf16.mxu0 %v12005_v19  ;;  %v12080_v15 = vld [vmem:[%s17100_s2 + $0x18ec] ss:$72 sps:$4 sm:$0xff]   ;;  %v12075_v19 = vld [vmem:[%s17100_s2 + $0x18e0] ss:$72 sps:$4 sm:$0xff]  }
 0x201   :  { %5963 = vmatprep.subr.bf16.mxu1 %v12008_v20  ;;  %v12078_v20 = vld [vmem:[%s17100_s2 + $0x18e8] ss:$72 sps:$4 sm:$0xff]  }
 0x202   :  { %5824 = vmatmul.mubr.bf16.vlgmr.msra.gmra.mrb[8].mxu0 %v13514_v17 }
 0x203   :  { %5953 = vmatmul.mubr.bf16.vlgmr.msra.gmra.mrb[8].mxu1 %v13514_v17  ;;  %5835 = vmatpush1.bf16.msra.mxu0 %v12003_v21  ;;  %v12083_v21 = vld [vmem:[%s17100_s2 + $0x1974] ss:$72 sps:$4 sm:$0xff]  }
 0x204   :  { %5964 = vmatpush1.bf16.msra.mxu1 %v12006_v22  ;;  %5836 = vmatprep.subr.bf16.mxu0 %v12011_v23  ;;  %v12086_v22 = vld [vmem:[%s17100_s2 + $0x197c] ss:$72 sps:$4 sm:$0xff]   ;;  %v12081_v23 = vld [vmem:[%s17100_s2 + $0x1970] ss:$72 sps:$4 sm:$0xff]  }
 0x205   :  { %5965 = vmatprep.subr.bf16.mxu1 %v12014_v24  ;;  %5866 = vmatprep.mubr.bf16.mxu0 %v13539_v25  ;;  %v12084_v24 = vld [vmem:[%s17100_s2 + $0x1978] ss:$72 sps:$4 sm:$0xff]  }
 0x206   :  { %5995 = vmatprep.mubr.bf16.mxu1 %v13539_v25 }
 0x207   :  { %5837 = vmatpush1.bf16.msra.mxu0 %v12009_v27  ;;  %v12089_v27 = vld [vmem:[%s17100_s2 + $0x1a04] ss:$72 sps:$4 sm:$0xff]  }
 0x208   :  { %5966 = vmatpush1.bf16.msra.mxu1 %v12012_v28  ;;  %5838 = vmatprep.subr.bf16.mxu0 %v12017_v29  ;;  %v12092_v28 = vld [vmem:[%s17100_s2 + $0x1a0c] ss:$72 sps:$4 sm:$0xff]   ;;  %v12087_v29 = vld [vmem:[%s17100_s2 + $0x1a00] ss:$72 sps:$4 sm:$0xff]  }
 0x209   :  { %5967 = vmatprep.subr.bf16.mxu1 %v12020_v30  ;;  %v12090_v30 = vld [vmem:[%s17100_s2 + $0x1a08] ss:$72 sps:$4 sm:$0xff]  }
 0x20b   :  { %5839 = vmatpush1.bf16.msra.mxu0 %v12015_v31  ;;  %v12095_v31 = vld [vmem:[%s17100_s2 + $0x1a94] ss:$72 sps:$4 sm:$0xff]  }
 0x20c   :  { %5968 = vmatpush1.bf16.msra.mxu1 %v12018_v32  ;;  %5840 = vmatprep.subr.bf16.mxu0 %v12023_v33  ;;  %v12098_v32 = vld [vmem:[%s17100_s2 + $0x1a9c] ss:$72 sps:$4 sm:$0xff]   ;;  %v12093_v33 = vld [vmem:[%s17100_s2 + $0x1a90] ss:$72 sps:$4 sm:$0xff]  }
 0x20d   :  { %5969 = vmatprep.subr.bf16.mxu1 %v12026_v34  ;;  %v12096_v34 = vld [vmem:[%s17100_s2 + $0x1a98] ss:$72 sps:$4 sm:$0xff]  }
 0x20f   :  { %5841 = vmatpush1.bf16.msra.mxu0 %v12021_v35  ;;  %v12101_v35 = vld [vmem:[%s17100_s2 + $0x34] ss:$72 sps:$4 sm:$0xff]  }
 0x210   :  { %5970 = vmatpush1.bf16.msra.mxu1 %v12024_v37  ;;  %5842 = vmatprep.subr.bf16.mxu0 %v12029_v38  ;;  %v12104_v37 = vld [vmem:[%s17100_s2 + $0x3c] ss:$72 sps:$4 sm:$0xff]   ;;  %v12099_v38 = vld [vmem:[%s17100_s2 + $0x30] ss:$72 sps:$4 sm:$0xff]  }
 0x211   :  { %5971 = vmatprep.subr.bf16.mxu1 %v12032_v39  ;;  %v12102_v39 = vld [vmem:[%s17100_s2 + $0x38] ss:$72 sps:$4 sm:$0xff]  }
 0x213   :  { %5843 = vmatpush1.bf16.msra.mxu0 %v12027_v40  ;;  %v12107_v40 = vld [vmem:[%s17100_s2 + $0xc4] ss:$72 sps:$4 sm:$0xff]  }
 0x214   :  { %5972 = vmatpush1.bf16.msra.mxu1 %v12030_v41  ;;  %5844 = vmatprep.subr.bf16.mxu0 %v12035_v42  ;;  %v12110_v41 = vld [vmem:[%s17100_s2 + $0xcc] ss:$72 sps:$4 sm:$0xff]   ;;  %v12105_v42 = vld [vmem:[%s17100_s2 + $0xc0] ss:$72 sps:$4 sm:$0xff]  }
 0x215   :  { %5973 = vmatprep.subr.bf16.mxu1 %v12038_v43  ;;  %v12108_v43 = vld [vmem:[%s17100_s2 + $0xc8] ss:$72 sps:$4 sm:$0xff]  }
 0x217   :  { %5845 = vmatpush1.bf16.msra.mxu0 %v12033_v44  ;;  %v12113_v44 = vld [vmem:[%s17100_s2 + $0x154] ss:$72 sps:$4 sm:$0xff]  }
 0x218   :  { %5974 = vmatpush1.bf16.msra.mxu1 %v12036_v45  ;;  %5846 = vmatprep.subr.bf16.mxu0 %v12041_v46  ;;  %v12116_v45 = vld [vmem:[%s17100_s2 + $0x15c] ss:$72 sps:$4 sm:$0xff]   ;;  %v12111_v46 = vld [vmem:[%s17100_s2 + $0x150] ss:$72 sps:$4 sm:$0xff]  }
 0x219   :  { %5975 = vmatprep.subr.bf16.mxu1 %v12044_v47  ;;  %v12114_v47 = vld [vmem:[%s17100_s2 + $0x158] ss:$72 sps:$4 sm:$0xff]  }
 0x21b   :  { %5847 = vmatpush1.bf16.msra.mxu0 %v12039_v48  ;;  %v12119_v48 = vld [vmem:[%s17100_s2 + $0x1e4] ss:$72 sps:$4 sm:$0xff]  }
 0x21c   :  { %5976 = vmatpush1.bf16.msra.mxu1 %v12042_v49  ;;  %5848 = vmatprep.subr.bf16.mxu0 %v12047_v51  ;;  %v12122_v49 = vld [vmem:[%s17100_s2 + $0x1ec] ss:$72 sps:$4 sm:$0xff]   ;;  %v12117_v51 = vld [vmem:[%s17100_s2 + $0x1e0] ss:$72 sps:$4 sm:$0xff]  }
 0x21d   :  { %5977 = vmatprep.subr.bf16.mxu1 %v12050_v52  ;;  %v12120_v52 = vld [vmem:[%s17100_s2 + $0x1e8] ss:$72 sps:$4 sm:$0xff]  }
 0x21f   :  { %5849 = vmatpush1.bf16.msra.mxu0 %v12045_v53  ;;  %v12125_v53 = vld [vmem:[%s17100_s2 + $0x274] ss:$72 sps:$4 sm:$0xff]  }
 0x220   :  { %5978 = vmatpush1.bf16.msra.mxu1 %v12048_v54  ;;  %5850 = vmatprep.subr.bf16.mxu0 %v12053_v55  ;;  %v12128_v54 = vld [vmem:[%s17100_s2 + $0x27c] ss:$72 sps:$4 sm:$0xff]   ;;  %v12123_v55 = vld [vmem:[%s17100_s2 + $0x270] ss:$72 sps:$4 sm:$0xff]  }
 0x221   :  { %5979 = vmatprep.subr.bf16.mxu1 %v12056_v56  ;;  %v12126_v56 = vld [vmem:[%s17100_s2 + $0x278] ss:$72 sps:$4 sm:$0xff]  }
 0x223   :  { %5851 = vmatpush1.bf16.msra.mxu0 %v12051_v57  ;;  %v12131_v57 = vld [vmem:[%s17100_s2 + $0x304] ss:$72 sps:$4 sm:$0xff]  }
 0x224   :  { %5980 = vmatpush1.bf16.msra.mxu1 %v12054_v58  ;;  %5852 = vmatprep.subr.bf16.mxu0 %v12059_v59  ;;  %v12134_v58 = vld [vmem:[%s17100_s2 + $0x30c] ss:$72 sps:$4 sm:$0xff]   ;;  %v12129_v59 = vld [vmem:[%s17100_s2 + $0x300] ss:$72 sps:$4 sm:$0xff]  }
 0x225   :  { %5981 = vmatprep.subr.bf16.mxu1 %v12062_v60  ;;  %v12132_v60 = vld [vmem:[%s17100_s2 + $0x308] ss:$72 sps:$4 sm:$0xff]  }
 0x227   :  { %5853 = vmatpush1.bf16.msra.mxu0 %v12057_v61  ;;  %v12137_v61 = vld [vmem:[%s17100_s2 + $0x394] ss:$72 sps:$4 sm:$0xff]  }
 0x228   :  { %5982 = vmatpush1.bf16.msra.mxu1 %v12060_v62  ;;  %5854 = vmatprep.subr.bf16.mxu0 %v12065_v63  ;;  %v12140_v62 = vld [vmem:[%s17100_s2 + $0x39c] ss:$72 sps:$4 sm:$0xff]  }
 0x229   :  { %5983 = vmatprep.subr.bf16.mxu1 %v12068_v0 }
 0x22b   :  { %5855 = vmatpush1.bf16.msra.mxu0 %v12063_v1 }
 0x22c   :  { %5984 = vmatpush1.bf16.msra.mxu1 %v12066_v2  ;;  %5856 = vmatprep.subr.bf16.mxu0 %v12071_v3 }
 0x22d   :  { %5985 = vmatprep.subr.bf16.mxu1 %v12074_v4 }
 0x22f   :  { %5857 = vmatpush1.bf16.msra.mxu0 %v12069_v5  ;;  %v12135_v5 = vld [vmem:[%s17100_s2 + $0x390] ss:$72 sps:$4 sm:$0xff]  }
 0x230   :  { %5986 = vmatpush1.bf16.msra.mxu1 %v12072_v6  ;;  %5858 = vmatprep.subr.bf16.mxu0 %v12077_v14  ;;  %v12138_v6 = vld [vmem:[%s17100_s2 + $0x398] ss:$72 sps:$4 sm:$0xff]  }
 0x231   :  { %5987 = vmatprep.subr.bf16.mxu1 %v12080_v15 }
 0x233   :  { %5859 = vmatpush1.bf16.msra.mxu0 %v12075_v19  ;;  %v12143_v19 = vld [vmem:[%s17100_s2 + $0x424] ss:$72 sps:$4 sm:$0xff]  }
 0x234   :  { %5988 = vmatpush1.bf16.msra.mxu1 %v12078_v20  ;;  %5860 = vmatprep.subr.bf16.mxu0 %v12083_v21  ;;  %v12146_v20 = vld [vmem:[%s17100_s2 + $0x42c] ss:$72 sps:$4 sm:$0xff]   ;;  %v12141_v21 = vld [vmem:[%s17100_s2 + $0x420] ss:$72 sps:$4 sm:$0xff]  }
 0x235   :  { %5989 = vmatprep.subr.bf16.mxu1 %v12086_v22  ;;  %v12144_v22 = vld [vmem:[%s17100_s2 + $0x428] ss:$72 sps:$4 sm:$0xff]  }
 0x237   :  { %5861 = vmatpush1.bf16.msra.mxu0 %v12081_v23  ;;  %v12149_v23 = vld [vmem:[%s17100_s2 + $0x4b4] ss:$72 sps:$4 sm:$0xff]  }
 0x238   :  { %5990 = vmatpush1.bf16.msra.mxu1 %v12084_v24  ;;  %5862 = vmatprep.subr.bf16.mxu0 %v12089_v27  ;;  %v12152_v24 = vld [vmem:[%s17100_s2 + $0x4bc] ss:$72 sps:$4 sm:$0xff]   ;;  %v12147_v27 = vld [vmem:[%s17100_s2 + $0x4b0] ss:$72 sps:$4 sm:$0xff]  }
 0x239   :  { %5991 = vmatprep.subr.bf16.mxu1 %v12092_v28  ;;  %v12150_v28 = vld [vmem:[%s17100_s2 + $0x4b8] ss:$72 sps:$4 sm:$0xff]  }
 0x23b   :  { %5863 = vmatpush1.bf16.msra.mxu0 %v12087_v29  ;;  %v12155_v29 = vld [vmem:[%s17100_s2 + $0x544] ss:$72 sps:$4 sm:$0xff]  }
 0x23c   :  { %5992 = vmatpush1.bf16.msra.mxu1 %v12090_v30  ;;  %5864 = vmatprep.subr.bf16.mxu0 %v12095_v31  ;;  %v12158_v30 = vld [vmem:[%s17100_s2 + $0x54c] ss:$72 sps:$4 sm:$0xff]   ;;  %v12153_v31 = vld [vmem:[%s17100_s2 + $0x540] ss:$72 sps:$4 sm:$0xff]  }
 0x23d   :  { %5993 = vmatprep.subr.bf16.mxu1 %v12098_v32  ;;  %v12156_v32 = vld [vmem:[%s17100_s2 + $0x548] ss:$72 sps:$4 sm:$0xff]  }
 0x23f   :  { %5865 = vmatpush1.bf16.msra.mxu0 %v12093_v33  ;;  %v12161_v33 = vld [vmem:[%s17100_s2 + $0x5d4] ss:$72 sps:$4 sm:$0xff]  }
 0x240   :  { %5994 = vmatpush1.bf16.msra.mxu1 %v12096_v34  ;;  %6006 = vmatprep.subr.bf16.mxu0 %v12101_v35  ;;  %v12164_v34 = vld [vmem:[%s17100_s2 + $0x5dc] ss:$72 sps:$4 sm:$0xff]   ;;  %v12159_v35 = vld [vmem:[%s17100_s2 + $0x5d0] ss:$72 sps:$4 sm:$0xff]  }
 0x241   :  { %6135 = vmatprep.subr.bf16.mxu1 %v12104_v37  ;;  %v12162_v37 = vld [vmem:[%s17100_s2 + $0x5d8] ss:$72 sps:$4 sm:$0xff]  }
 0x242   :  { %5867 = vmatmul.mubr.bf16.vlgmr.msra.gmra.mrb[8].mxu0 %v13720_v26 }
 0x243   :  { %5996 = vmatmul.mubr.bf16.vlgmr.msra.gmra.mrb[8].mxu1 %v13720_v26  ;;  %6007 = vmatpush1.bf16.msra.mxu0 %v12099_v38  ;;  %v12167_v38 = vld [vmem:[%s17100_s2 + $0x664] ss:$72 sps:$4 sm:$0xff]  }
 0x244   :  { %6136 = vmatpush1.bf16.msra.mxu1 %v12102_v39  ;;  %6008 = vmatprep.subr.bf16.mxu0 %v12107_v40  ;;  %v12170_v39 = vld [vmem:[%s17100_s2 + $0x66c] ss:$72 sps:$4 sm:$0xff]   ;;  %v12165_v40 = vld [vmem:[%s17100_s2 + $0x660] ss:$72 sps:$4 sm:$0xff]  }
 0x245   :  { %6137 = vmatprep.subr.bf16.mxu1 %v12110_v41  ;;  %6038 = vmatprep.mubr.bf16.mxu0 %v13232_v50  ;;  %v12168_v41 = vld [vmem:[%s17100_s2 + $0x668] ss:$72 sps:$4 sm:$0xff]  }
 0x246   :  { %6167 = vmatprep.mubr.bf16.mxu1 %v13232_v50 }
 0x247   :  { %6009 = vmatpush1.bf16.msra.mxu0 %v12105_v42  ;;  %v12173_v42 = vld [vmem:[%s17100_s2 + $0x6f4] ss:$72 sps:$4 sm:$0xff]  }
 0x248   :  { %6138 = vmatpush1.bf16.msra.mxu1 %v12108_v43  ;;  %6010 = vmatprep.subr.bf16.mxu0 %v12113_v44  ;;  %v12176_v43 = vld [vmem:[%s17100_s2 + $0x6fc] ss:$72 sps:$4 sm:$0xff]   ;;  %v12171_v44 = vld [vmem:[%s17100_s2 + $0x6f0] ss:$72 sps:$4 sm:$0xff]  }
 0x249   :  { %6139 = vmatprep.subr.bf16.mxu1 %v12116_v45  ;;  %v12174_v45 = vld [vmem:[%s17100_s2 + $0x6f8] ss:$72 sps:$4 sm:$0xff]  }
 0x24b   :  { %6011 = vmatpush1.bf16.msra.mxu0 %v12111_v46  ;;  %v12179_v46 = vld [vmem:[%s17100_s2 + $0x784] ss:$72 sps:$4 sm:$0xff]  }
 0x24c   :  { %6140 = vmatpush1.bf16.msra.mxu1 %v12114_v47  ;;  %6012 = vmatprep.subr.bf16.mxu0 %v12119_v48  ;;  %v12182_v47 = vld [vmem:[%s17100_s2 + $0x78c] ss:$72 sps:$4 sm:$0xff]   ;;  %v12177_v48 = vld [vmem:[%s17100_s2 + $0x780] ss:$72 sps:$4 sm:$0xff]  }
 0x24d   :  { %6141 = vmatprep.subr.bf16.mxu1 %v12122_v49  ;;  %v12180_v49 = vld [vmem:[%s17100_s2 + $0x788] ss:$72 sps:$4 sm:$0xff]  }
 0x24f   :  { %6013 = vmatpush1.bf16.msra.mxu0 %v12117_v51  ;;  %v12185_v51 = vld [vmem:[%s17100_s2 + $0x814] ss:$72 sps:$4 sm:$0xff]  }
 0x250   :  { %6142 = vmatpush1.bf16.msra.mxu1 %v12120_v52  ;;  %6014 = vmatprep.subr.bf16.mxu0 %v12125_v53  ;;  %v12188_v52 = vld [vmem:[%s17100_s2 + $0x81c] ss:$72 sps:$4 sm:$0xff]   ;;  %v12183_v53 = vld [vmem:[%s17100_s2 + $0x810] ss:$72 sps:$4 sm:$0xff]  }
 0x251   :  { %6143 = vmatprep.subr.bf16.mxu1 %v12128_v54  ;;  %v12186_v54 = vld [vmem:[%s17100_s2 + $0x818] ss:$72 sps:$4 sm:$0xff]  }
 0x253   :  { %6015 = vmatpush1.bf16.msra.mxu0 %v12123_v55  ;;  %v12191_v55 = vld [vmem:[%s17100_s2 + $0x8a4] ss:$72 sps:$4 sm:$0xff]  }
 0x254   :  { %6144 = vmatpush1.bf16.msra.mxu1 %v12126_v56  ;;  %6016 = vmatprep.subr.bf16.mxu0 %v12131_v57  ;;  %v12194_v56 = vld [vmem:[%s17100_s2 + $0x8ac] ss:$72 sps:$4 sm:$0xff]   ;;  %v12189_v57 = vld [vmem:[%s17100_s2 + $0x8a0] ss:$72 sps:$4 sm:$0xff]  }
 0x255   :  { %6145 = vmatprep.subr.bf16.mxu1 %v12134_v58  ;;  %v14990_v63 = vpop.f32.mrb[4].mxu0  ;;  %v12192_v58 = vld [vmem:[%s17100_s2 + $0x8a8] ss:$72 sps:$4 sm:$0xff]  }
 0x256   :  { %v14992_v0 = vpop.f32.mrb[4].mxu1  ;;  %v14994_v1 = vpop.f32.mrb[5].mxu0 }
 0x257   :  { %v14996_v2 = vpop.f32.mrb[5].mxu1  ;;  %v14998_v3 = vpop.f32.mrb[6].mxu0  ;;  %6017 = vmatpush1.bf16.msra.mxu0 %v12129_v59  ;;  %v12197_v59 = vld [vmem:[%s17100_s2 + $0x934] ss:$72 sps:$4 sm:$0xff]  }
 0x258   :  { %v15000_v4 = vpop.f32.mrb[6].mxu1  ;;  %6146 = vmatpush1.bf16.msra.mxu1 %v12132_v60  ;;  %v15008_v14 = vpop.f32.mrb[7].mxu0  ;;  %6018 = vmatprep.subr.bf16.mxu0 %v12137_v61  ;;  %v12200_v60 = vld [vmem:[%s17100_s2 + $0x93c] ss:$72 sps:$4 sm:$0xff]   ;;  %v12195_v61 = vld [vmem:[%s17100_s2 + $0x930] ss:$72 sps:$4 sm:$0xff]  }
 0x259   :  { %v15010_v15 = vpop.f32.mrb[7].mxu1  ;;  %6147 = vmatprep.subr.bf16.mxu1 %v12140_v62  ;;  %v12198_v62 = vld [vmem:[%s17100_s2 + $0x938] ss:$72 sps:$4 sm:$0xff]  }
 0x25b   :  { %6019 = vmatpush1.bf16.msra.mxu0 %v12135_v5  ;;  %v12203_v5 = vld [vmem:[%s17100_s2 + $0x9c4] ss:$72 sps:$4 sm:$0xff]  }
 0x25c   :  { %6148 = vmatpush1.bf16.msra.mxu1 %v12138_v6  ;;  %6020 = vmatprep.subr.bf16.mxu0 %v12143_v19  ;;  %v12206_v6 = vld [vmem:[%s17100_s2 + $0x9cc] ss:$72 sps:$4 sm:$0xff]   ;;  %v12201_v19 = vld [vmem:[%s17100_s2 + $0x9c0] ss:$72 sps:$4 sm:$0xff]  }
 0x25d   :  { %6149 = vmatprep.subr.bf16.mxu1 %v12146_v20  ;;  %v12204_v20 = vld [vmem:[%s17100_s2 + $0x9c8] ss:$72 sps:$4 sm:$0xff]  }
 0x25f   :  { %6021 = vmatpush1.bf16.msra.mxu0 %v12141_v21  ;;  %v12209_v21 = vld [vmem:[%s17100_s2 + $0xa54] ss:$72 sps:$4 sm:$0xff]  }
 0x260   :  { %6150 = vmatpush1.bf16.msra.mxu1 %v12144_v22  ;;  %6022 = vmatprep.subr.bf16.mxu0 %v12149_v23  ;;  %v12212_v22 = vld [vmem:[%s17100_s2 + $0xa5c] ss:$72 sps:$4 sm:$0xff]   ;;  %v12207_v23 = vld [vmem:[%s17100_s2 + $0xa50] ss:$72 sps:$4 sm:$0xff]  }
 0x261   :  { %6151 = vmatprep.subr.bf16.mxu1 %v12152_v24  ;;  %v12210_v24 = vld [vmem:[%s17100_s2 + $0xa58] ss:$72 sps:$4 sm:$0xff]  }
 0x263   :  { %6023 = vmatpush1.bf16.msra.mxu0 %v12147_v27  ;;  %v12215_v27 = vld [vmem:[%s17100_s2 + $0xae4] ss:$72 sps:$4 sm:$0xff]  }
 0x264   :  { %6152 = vmatpush1.bf16.msra.mxu1 %v12150_v28  ;;  %6024 = vmatprep.subr.bf16.mxu0 %v12155_v29  ;;  %v12218_v28 = vld [vmem:[%s17100_s2 + $0xaec] ss:$72 sps:$4 sm:$0xff]   ;;  %v12213_v29 = vld [vmem:[%s17100_s2 + $0xae0] ss:$72 sps:$4 sm:$0xff]  }
 0x265   :  { %6153 = vmatprep.subr.bf16.mxu1 %v12158_v30  ;;  %v12216_v30 = vld [vmem:[%s17100_s2 + $0xae8] ss:$72 sps:$4 sm:$0xff]  }
 0x267   :  { %6025 = vmatpush1.bf16.msra.mxu0 %v12153_v31  ;;  %v12221_v31 = vld [vmem:[%s17100_s2 + $0xb74] ss:$72 sps:$4 sm:$0xff]  }
 0x268   :  { %6154 = vmatpush1.bf16.msra.mxu1 %v12156_v32  ;;  %6026 = vmatprep.subr.bf16.mxu0 %v12161_v33  ;;  %v12224_v32 = vld [vmem:[%s17100_s2 + $0xb7c] ss:$72 sps:$4 sm:$0xff]   ;;  %v12219_v33 = vld [vmem:[%s17100_s2 + $0xb70] ss:$72 sps:$4 sm:$0xff]  }
 0x269   :  { %6155 = vmatprep.subr.bf16.mxu1 %v12164_v34  ;;  %v12222_v34 = vld [vmem:[%s17100_s2 + $0xb78] ss:$72 sps:$4 sm:$0xff]  }
 0x26b   :  { %6027 = vmatpush1.bf16.msra.mxu0 %v12159_v35  ;;  %v12227_v35 = vld [vmem:[%s17100_s2 + $0xc04] ss:$72 sps:$4 sm:$0xff]  }
 0x26c   :  { %6156 = vmatpush1.bf16.msra.mxu1 %v12162_v37  ;;  %6028 = vmatprep.subr.bf16.mxu0 %v12167_v38  ;;  %v12230_v37 = vld [vmem:[%s17100_s2 + $0xc0c] ss:$72 sps:$4 sm:$0xff]   ;;  %v12225_v38 = vld [vmem:[%s17100_s2 + $0xc00] ss:$72 sps:$4 sm:$0xff]  }
 0x26d   :  { %6157 = vmatprep.subr.bf16.mxu1 %v12170_v39  ;;  %v12228_v39 = vld [vmem:[%s17100_s2 + $0xc08] ss:$72 sps:$4 sm:$0xff]  }
 0x26f   :  { %6029 = vmatpush1.bf16.msra.mxu0 %v12165_v40  ;;  %v12233_v40 = vld [vmem:[%s17100_s2 + $0xc94] ss:$72 sps:$4 sm:$0xff]  }
 0x270   :  { %6158 = vmatpush1.bf16.msra.mxu1 %v12168_v41  ;;  %6030 = vmatprep.subr.bf16.mxu0 %v12173_v42  ;;  %v12236_v41 = vld [vmem:[%s17100_s2 + $0xc9c] ss:$72 sps:$4 sm:$0xff]   ;;  %v12231_v42 = vld [vmem:[%s17100_s2 + $0xc90] ss:$72 sps:$4 sm:$0xff]  }
 0x271   :  { %6159 = vmatprep.subr.bf16.mxu1 %v12176_v43  ;;  %v12234_v43 = vld [vmem:[%s17100_s2 + $0xc98] ss:$72 sps:$4 sm:$0xff]  }
 0x273   :  { %6031 = vmatpush1.bf16.msra.mxu0 %v12171_v44  ;;  %v12239_v44 = vld [vmem:[%s17100_s2 + $0xd24] ss:$72 sps:$4 sm:$0xff]  }
 0x274   :  { %6160 = vmatpush1.bf16.msra.mxu1 %v12174_v45  ;;  %6032 = vmatprep.subr.bf16.mxu0 %v12179_v46  ;;  %v12242_v45 = vld [vmem:[%s17100_s2 + $0xd2c] ss:$72 sps:$4 sm:$0xff]   ;;  %v12237_v46 = vld [vmem:[%s17100_s2 + $0xd20] ss:$72 sps:$4 sm:$0xff]  }
 0x275   :  { %6161 = vmatprep.subr.bf16.mxu1 %v12182_v47  ;;  %v12240_v47 = vld [vmem:[%s17100_s2 + $0xd28] ss:$72 sps:$4 sm:$0xff]  }
 0x277   :  { %6033 = vmatpush1.bf16.msra.mxu0 %v12177_v48  ;;  %v12245_v48 = vld [vmem:[%s17100_s2 + $0xdb4] ss:$72 sps:$4 sm:$0xff]  }
 0x278   :  { %6162 = vmatpush1.bf16.msra.mxu1 %v12180_v49  ;;  %6034 = vmatprep.subr.bf16.mxu0 %v12185_v51  ;;  %v12248_v49 = vld [vmem:[%s17100_s2 + $0xdbc] ss:$72 sps:$4 sm:$0xff]   ;;  %v12243_v51 = vld [vmem:[%s17100_s2 + $0xdb0] ss:$72 sps:$4 sm:$0xff]  }
 0x279   :  { %6163 = vmatprep.subr.bf16.mxu1 %v12188_v52  ;;  %v12246_v52 = vld [vmem:[%s17100_s2 + $0xdb8] ss:$72 sps:$4 sm:$0xff]  }
 0x27b   :  { %6035 = vmatpush1.bf16.msra.mxu0 %v12183_v53  ;;  %v12251_v53 = vld [vmem:[%s17100_s2 + $0xe44] ss:$72 sps:$4 sm:$0xff]  }
 0x27c   :  { %6164 = vmatpush1.bf16.msra.mxu1 %v12186_v54  ;;  %6036 = vmatprep.subr.bf16.mxu0 %v12191_v55  ;;  %v12254_v54 = vld [vmem:[%s17100_s2 + $0xe4c] ss:$72 sps:$4 sm:$0xff]   ;;  %v12249_v55 = vld [vmem:[%s17100_s2 + $0xe40] ss:$72 sps:$4 sm:$0xff]  }
 0x27d   :  { %6165 = vmatprep.subr.bf16.mxu1 %v12194_v56  ;;  %v12252_v56 = vld [vmem:[%s17100_s2 + $0xe48] ss:$72 sps:$4 sm:$0xff]  }
 0x27f   :  { %6037 = vmatpush1.bf16.msra.mxu0 %v12189_v57  ;;  %v12257_v57 = vld [vmem:[%s17100_s2 + $0xed4] ss:$72 sps:$4 sm:$0xff]  }
 0x280   :  { %6166 = vmatpush1.bf16.msra.mxu1 %v12192_v58  ;;  %6049 = vmatprep.subr.bf16.mxu0 %v12197_v59  ;;  %v12260_v58 = vld [vmem:[%s17100_s2 + $0xedc] ss:$72 sps:$4 sm:$0xff]   ;;  %v12255_v59 = vld [vmem:[%s17100_s2 + $0xed0] ss:$72 sps:$4 sm:$0xff]  }
 0x281   :  { %6178 = vmatprep.subr.bf16.mxu1 %v12200_v60  ;;  %v12258_v60 = vld [vmem:[%s17100_s2 + $0xed8] ss:$72 sps:$4 sm:$0xff]  }
 0x282   :  { %6039 = vmatmul.mubr.bf16.vlgmr.msra.gmra.mrb[12].mxu0 %v13302_v9 }
 0x283   :  { %6168 = vmatmul.mubr.bf16.vlgmr.msra.gmra.mrb[12].mxu1 %v13302_v9  ;;  %6050 = vmatpush1.bf16.msra.mxu0 %v12195_v61  ;;  %v12263_v61 = vld [vmem:[%s17100_s2 + $0xf64] ss:$72 sps:$4 sm:$0xff]  }
 0x284   :  { %6179 = vmatpush1.bf16.msra.mxu1 %v12198_v62  ;;  %6051 = vmatprep.subr.bf16.mxu0 %v12203_v5  ;;  %v12266_v62 = vld [vmem:[%s17100_s2 + $0xf6c] ss:$72 sps:$4 sm:$0xff]   ;;  %v12261_v5 = vld [vmem:[%s17100_s2 + $0xf60] ss:$72 sps:$4 sm:$0xff]  }
 0x285   :  { %6180 = vmatprep.subr.bf16.mxu1 %v12206_v6  ;;  %6081 = vmatprep.mubr.bf16.mxu0 %v13384_v36  ;;  %v12264_v6 = vld [vmem:[%s17100_s2 + $0xf68] ss:$72 sps:$4 sm:$0xff]  }
 0x286   :  { %6210 = vmatprep.mubr.bf16.mxu1 %v13384_v36 }
 0x287   :  { %6052 = vmatpush1.bf16.msra.mxu0 %v12201_v19  ;;  %v12269_v19 = vld [vmem:[%s17100_s2 + $0xff4] ss:$72 sps:$4 sm:$0xff]  }
 0x288   :  { %6181 = vmatpush1.bf16.msra.mxu1 %v12204_v20  ;;  %6053 = vmatprep.subr.bf16.mxu0 %v12209_v21  ;;  %v12272_v20 = vld [vmem:[%s17100_s2 + $0xffc] ss:$72 sps:$4 sm:$0xff]   ;;  %v12267_v21 = vld [vmem:[%s17100_s2 + $0xff0] ss:$72 sps:$4 sm:$0xff]  }
 0x289   :  { %6182 = vmatprep.subr.bf16.mxu1 %v12212_v22  ;;  %v12270_v22 = vld [vmem:[%s17100_s2 + $0xff8] ss:$72 sps:$4 sm:$0xff]  }
 0x28b   :  { %6054 = vmatpush1.bf16.msra.mxu0 %v12207_v23  ;;  %v12275_v23 = vld [vmem:[%s17100_s2 + $0x1084] ss:$72 sps:$4 sm:$0xff]  }
 0x28c   :  { %6183 = vmatpush1.bf16.msra.mxu1 %v12210_v24  ;;  %6055 = vmatprep.subr.bf16.mxu0 %v12215_v27  ;;  %v12278_v24 = vld [vmem:[%s17100_s2 + $0x108c] ss:$72 sps:$4 sm:$0xff]   ;;  %v12273_v27 = vld [vmem:[%s17100_s2 + $0x1080] ss:$72 sps:$4 sm:$0xff]  }
 0x28d   :  { %6184 = vmatprep.subr.bf16.mxu1 %v12218_v28  ;;  %v12276_v28 = vld [vmem:[%s17100_s2 + $0x1088] ss:$72 sps:$4 sm:$0xff]  }
 0x28f   :  { %6056 = vmatpush1.bf16.msra.mxu0 %v12213_v29  ;;  %v12281_v29 = vld [vmem:[%s17100_s2 + $0x1114] ss:$72 sps:$4 sm:$0xff]  }
 0x290   :  { %6185 = vmatpush1.bf16.msra.mxu1 %v12216_v30  ;;  %6057 = vmatprep.subr.bf16.mxu0 %v12221_v31  ;;  %v12284_v30 = vld [vmem:[%s17100_s2 + $0x111c] ss:$72 sps:$4 sm:$0xff]   ;;  %v12279_v31 = vld [vmem:[%s17100_s2 + $0x1110] ss:$72 sps:$4 sm:$0xff]  }
 0x291   :  { %6186 = vmatprep.subr.bf16.mxu1 %v12224_v32  ;;  %v12282_v32 = vld [vmem:[%s17100_s2 + $0x1118] ss:$72 sps:$4 sm:$0xff]  }
 0x293   :  { %6058 = vmatpush1.bf16.msra.mxu0 %v12219_v33  ;;  %v12287_v33 = vld [vmem:[%s17100_s2 + $0x11a4] ss:$72 sps:$4 sm:$0xff]  }
 0x294   :  { %6187 = vmatpush1.bf16.msra.mxu1 %v12222_v34  ;;  %6059 = vmatprep.subr.bf16.mxu0 %v12227_v35  ;;  %v12290_v34 = vld [vmem:[%s17100_s2 + $0x11ac] ss:$72 sps:$4 sm:$0xff]   ;;  %v12285_v35 = vld [vmem:[%s17100_s2 + $0x11a0] ss:$72 sps:$4 sm:$0xff]  }
 0x295   :  { %6188 = vmatprep.subr.bf16.mxu1 %v12230_v37  ;;  %v12288_v37 = vld [vmem:[%s17100_s2 + $0x11a8] ss:$72 sps:$4 sm:$0xff]  }
 0x297   :  { %6060 = vmatpush1.bf16.msra.mxu0 %v12225_v38  ;;  %v12293_v38 = vld [vmem:[%s17100_s2 + $0x1234] ss:$72 sps:$4 sm:$0xff]  }
 0x298   :  { %6189 = vmatpush1.bf16.msra.mxu1 %v12228_v39  ;;  %6061 = vmatprep.subr.bf16.mxu0 %v12233_v40  ;;  %v12296_v39 = vld [vmem:[%s17100_s2 + $0x123c] ss:$72 sps:$4 sm:$0xff]   ;;  %v12291_v40 = vld [vmem:[%s17100_s2 + $0x1230] ss:$72 sps:$4 sm:$0xff]  }
 0x299   :  { %6190 = vmatprep.subr.bf16.mxu1 %v12236_v41  ;;  %v12294_v41 = vld [vmem:[%s17100_s2 + $0x1238] ss:$72 sps:$4 sm:$0xff]  }
 0x29b   :  { %6062 = vmatpush1.bf16.msra.mxu0 %v12231_v42  ;;  %v12299_v42 = vld [vmem:[%s17100_s2 + $0x12c4] ss:$72 sps:$4 sm:$0xff]  }
 0x29c   :  { %6191 = vmatpush1.bf16.msra.mxu1 %v12234_v43  ;;  %6063 = vmatprep.subr.bf16.mxu0 %v12239_v44  ;;  %v12302_v43 = vld [vmem:[%s17100_s2 + $0x12cc] ss:$72 sps:$4 sm:$0xff]   ;;  %v12297_v44 = vld [vmem:[%s17100_s2 + $0x12c0] ss:$72 sps:$4 sm:$0xff]  }
 0x29d   :  { %6192 = vmatprep.subr.bf16.mxu1 %v12242_v45  ;;  %v12300_v45 = vld [vmem:[%s17100_s2 + $0x12c8] ss:$72 sps:$4 sm:$0xff]  }
 0x29f   :  { %6064 = vmatpush1.bf16.msra.mxu0 %v12237_v46  ;;  %v12305_v46 = vld [vmem:[%s17100_s2 + $0x1354] ss:$72 sps:$4 sm:$0xff]  }
 0x2a0   :  { %6193 = vmatpush1.bf16.msra.mxu1 %v12240_v47  ;;  %6065 = vmatprep.subr.bf16.mxu0 %v12245_v48  ;;  %v12308_v47 = vld [vmem:[%s17100_s2 + $0x135c] ss:$72 sps:$4 sm:$0xff]   ;;  %v12303_v48 = vld [vmem:[%s17100_s2 + $0x1350] ss:$72 sps:$4 sm:$0xff]  }
 0x2a1   :  { %6194 = vmatprep.subr.bf16.mxu1 %v12248_v49  ;;  %v12306_v49 = vld [vmem:[%s17100_s2 + $0x1358] ss:$72 sps:$4 sm:$0xff]  }
 0x2a3   :  { %6066 = vmatpush1.bf16.msra.mxu0 %v12243_v51  ;;  %v12311_v51 = vld [vmem:[%s17100_s2 + $0x13e4] ss:$72 sps:$4 sm:$0xff]  }
 0x2a4   :  { %6195 = vmatpush1.bf16.msra.mxu1 %v12246_v52  ;;  %6067 = vmatprep.subr.bf16.mxu0 %v12251_v53  ;;  %v12314_v52 = vld [vmem:[%s17100_s2 + $0x13ec] ss:$72 sps:$4 sm:$0xff]   ;;  %v12309_v53 = vld [vmem:[%s17100_s2 + $0x13e0] ss:$72 sps:$4 sm:$0xff]  }
 0x2a5   :  { %6196 = vmatprep.subr.bf16.mxu1 %v12254_v54  ;;  %v12312_v54 = vld [vmem:[%s17100_s2 + $0x13e8] ss:$72 sps:$4 sm:$0xff]  }
 0x2a7   :  { %6068 = vmatpush1.bf16.msra.mxu0 %v12249_v55  ;;  %v12317_v55 = vld [vmem:[%s17100_s2 + $0x1474] ss:$72 sps:$4 sm:$0xff]  }
 0x2a8   :  { %6197 = vmatpush1.bf16.msra.mxu1 %v12252_v56  ;;  %6069 = vmatprep.subr.bf16.mxu0 %v12257_v57  ;;  %v12320_v56 = vld [vmem:[%s17100_s2 + $0x147c] ss:$72 sps:$4 sm:$0xff]   ;;  %v12315_v57 = vld [vmem:[%s17100_s2 + $0x1470] ss:$72 sps:$4 sm:$0xff]  }
 0x2a9   :  { %6198 = vmatprep.subr.bf16.mxu1 %v12260_v58  ;;  %v12318_v58 = vld [vmem:[%s17100_s2 + $0x1478] ss:$72 sps:$4 sm:$0xff]  }
 0x2ab   :  { %6070 = vmatpush1.bf16.msra.mxu0 %v12255_v59  ;;  %v12323_v59 = vld [vmem:[%s17100_s2 + $0x1504] ss:$72 sps:$4 sm:$0xff]  }
 0x2ac   :  { %6199 = vmatpush1.bf16.msra.mxu1 %v12258_v60  ;;  %6071 = vmatprep.subr.bf16.mxu0 %v12263_v61  ;;  %v12326_v60 = vld [vmem:[%s17100_s2 + $0x150c] ss:$72 sps:$4 sm:$0xff]   ;;  %v12321_v61 = vld [vmem:[%s17100_s2 + $0x1500] ss:$72 sps:$4 sm:$0xff]  }
 0x2ad   :  { %6200 = vmatprep.subr.bf16.mxu1 %v12266_v62  ;;  %v12324_v62 = vld [vmem:[%s17100_s2 + $0x1508] ss:$72 sps:$4 sm:$0xff]  }
 0x2af   :  { %6072 = vmatpush1.bf16.msra.mxu0 %v12261_v5  ;;  %v12329_v5 = vld [vmem:[%s17100_s2 + $0x1594] ss:$72 sps:$4 sm:$0xff]  }
 0x2b0   :  { %6201 = vmatpush1.bf16.msra.mxu1 %v12264_v6  ;;  %6073 = vmatprep.subr.bf16.mxu0 %v12269_v19  ;;  %v12332_v6 = vld [vmem:[%s17100_s2 + $0x159c] ss:$72 sps:$4 sm:$0xff]   ;;  %v12327_v19 = vld [vmem:[%s17100_s2 + $0x1590] ss:$72 sps:$4 sm:$0xff]  }
 0x2b1   :  { %6202 = vmatprep.subr.bf16.mxu1 %v12272_v20  ;;  %v12330_v20 = vld [vmem:[%s17100_s2 + $0x1598] ss:$72 sps:$4 sm:$0xff]  }
 0x2b3   :  { %6074 = vmatpush1.bf16.msra.mxu0 %v12267_v21  ;;  %v12335_v21 = vld [vmem:[%s17100_s2 + $0x1624] ss:$72 sps:$4 sm:$0xff]  }
 0x2b4   :  { %6203 = vmatpush1.bf16.msra.mxu1 %v12270_v22  ;;  %6075 = vmatprep.subr.bf16.mxu0 %v12275_v23  ;;  %v12338_v22 = vld [vmem:[%s17100_s2 + $0x162c] ss:$72 sps:$4 sm:$0xff]   ;;  %v12333_v23 = vld [vmem:[%s17100_s2 + $0x1620] ss:$72 sps:$4 sm:$0xff]  }
 0x2b5   :  { %6204 = vmatprep.subr.bf16.mxu1 %v12278_v24  ;;  %v12336_v24 = vld [vmem:[%s17100_s2 + $0x1628] ss:$72 sps:$4 sm:$0xff]  }
 0x2b7   :  { %6076 = vmatpush1.bf16.msra.mxu0 %v12273_v27  ;;  %v12341_v27 = vld [vmem:[%s17100_s2 + $0x16b4] ss:$72 sps:$4 sm:$0xff]  }
 0x2b8   :  { %6205 = vmatpush1.bf16.msra.mxu1 %v12276_v28  ;;  %6077 = vmatprep.subr.bf16.mxu0 %v12281_v29  ;;  %v12344_v28 = vld [vmem:[%s17100_s2 + $0x16bc] ss:$72 sps:$4 sm:$0xff]   ;;  %v12339_v29 = vld [vmem:[%s17100_s2 + $0x16b0] ss:$72 sps:$4 sm:$0xff]  }
 0x2b9   :  { %6206 = vmatprep.subr.bf16.mxu1 %v12284_v30  ;;  %v12342_v30 = vld [vmem:[%s17100_s2 + $0x16b8] ss:$72 sps:$4 sm:$0xff]  }
 0x2bb   :  { %6078 = vmatpush1.bf16.msra.mxu0 %v12279_v31  ;;  %v12347_v31 = vld [vmem:[%s17100_s2 + $0x1744] ss:$72 sps:$4 sm:$0xff]  }
 0x2bc   :  { %6207 = vmatpush1.bf16.msra.mxu1 %v12282_v32  ;;  %6079 = vmatprep.subr.bf16.mxu0 %v12287_v33  ;;  %v12350_v32 = vld [vmem:[%s17100_s2 + $0x174c] ss:$72 sps:$4 sm:$0xff]   ;;  %v12345_v33 = vld [vmem:[%s17100_s2 + $0x1740] ss:$72 sps:$4 sm:$0xff]  }
 0x2bd   :  { %6208 = vmatprep.subr.bf16.mxu1 %v12290_v34  ;;  %v12348_v34 = vld [vmem:[%s17100_s2 + $0x1748] ss:$72 sps:$4 sm:$0xff]  }
 0x2bf   :  { %6080 = vmatpush1.bf16.msra.mxu0 %v12285_v35  ;;  %v12353_v35 = vld [vmem:[%s17100_s2 + $0x17d4] ss:$72 sps:$4 sm:$0xff]  }
 0x2c0   :  { %6209 = vmatpush1.bf16.msra.mxu1 %v12288_v37  ;;  %6092 = vmatprep.subr.bf16.mxu0 %v12293_v38  ;;  %v12356_v37 = vld [vmem:[%s17100_s2 + $0x17dc] ss:$72 sps:$4 sm:$0xff]   ;;  %v12351_v38 = vld [vmem:[%s17100_s2 + $0x17d0] ss:$72 sps:$4 sm:$0xff]  }
 0x2c1   :  { %6221 = vmatprep.subr.bf16.mxu1 %v12296_v39  ;;  %v12354_v39 = vld [vmem:[%s17100_s2 + $0x17d8] ss:$72 sps:$4 sm:$0xff]  }
 0x2c2   :  { %6082 = vmatmul.mubr.bf16.vlgmr.msra.gmra.mrb[12].mxu0 %v13514_v17 }
 0x2c3   :  { %6211 = vmatmul.mubr.bf16.vlgmr.msra.gmra.mrb[12].mxu1 %v13514_v17  ;;  %6093 = vmatpush1.bf16.msra.mxu0 %v12291_v40  ;;  %v12359_v40 = vld [vmem:[%s17100_s2 + $0x1864] ss:$72 sps:$4 sm:$0xff]  }
 0x2c4   :  { %6222 = vmatpush1.bf16.msra.mxu1 %v12294_v41  ;;  %6094 = vmatprep.subr.bf16.mxu0 %v12299_v42  ;;  %v12362_v41 = vld [vmem:[%s17100_s2 + $0x186c] ss:$72 sps:$4 sm:$0xff]   ;;  %v12357_v42 = vld [vmem:[%s17100_s2 + $0x1860] ss:$72 sps:$4 sm:$0xff]  }
 0x2c5   :  { %6223 = vmatprep.subr.bf16.mxu1 %v12302_v43  ;;  %6124 = vmatprep.mubr.bf16.mxu0 %v13539_v25  ;;  %v12360_v43 = vld [vmem:[%s17100_s2 + $0x1868] ss:$72 sps:$4 sm:$0xff]  }
 0x2c6   :  { %6253 = vmatprep.mubr.bf16.mxu1 %v13539_v25 }
 0x2c7   :  { %6095 = vmatpush1.bf16.msra.mxu0 %v12297_v44  ;;  %v12365_v44 = vld [vmem:[%s17100_s2 + $0x18f4] ss:$72 sps:$4 sm:$0xff]  }
 0x2c8   :  { %6224 = vmatpush1.bf16.msra.mxu1 %v12300_v45  ;;  %6096 = vmatprep.subr.bf16.mxu0 %v12305_v46  ;;  %v12368_v45 = vld [vmem:[%s17100_s2 + $0x18fc] ss:$72 sps:$4 sm:$0xff]   ;;  %v12363_v46 = vld [vmem:[%s17100_s2 + $0x18f0] ss:$72 sps:$4 sm:$0xff]  }
 0x2c9   :  { %6225 = vmatprep.subr.bf16.mxu1 %v12308_v47  ;;  %v12366_v47 = vld [vmem:[%s17100_s2 + $0x18f8] ss:$72 sps:$4 sm:$0xff]  }
 0x2cb   :  { %6097 = vmatpush1.bf16.msra.mxu0 %v12303_v48  ;;  %v12371_v48 = vld [vmem:[%s17100_s2 + $0x1984] ss:$72 sps:$4 sm:$0xff]  }
 0x2cc   :  { %6226 = vmatpush1.bf16.msra.mxu1 %v12306_v49  ;;  %6098 = vmatprep.subr.bf16.mxu0 %v12311_v51  ;;  %v12374_v49 = vld [vmem:[%s17100_s2 + $0x198c] ss:$72 sps:$4 sm:$0xff]   ;;  %v12369_v51 = vld [vmem:[%s17100_s2 + $0x1980] ss:$72 sps:$4 sm:$0xff]  }
 0x2cd   :  { %6227 = vmatprep.subr.bf16.mxu1 %v12314_v52  ;;  %v12372_v52 = vld [vmem:[%s17100_s2 + $0x1988] ss:$72 sps:$4 sm:$0xff]  }
 0x2cf   :  { %6099 = vmatpush1.bf16.msra.mxu0 %v12309_v53  ;;  %v12377_v53 = vld [vmem:[%s17100_s2 + $0x1a14] ss:$72 sps:$4 sm:$0xff]  }
 0x2d0   :  { %6228 = vmatpush1.bf16.msra.mxu1 %v12312_v54  ;;  %6100 = vmatprep.subr.bf16.mxu0 %v12317_v55  ;;  %v12380_v54 = vld [vmem:[%s17100_s2 + $0x1a1c] ss:$72 sps:$4 sm:$0xff]   ;;  %v12375_v55 = vld [vmem:[%s17100_s2 + $0x1a10] ss:$72 sps:$4 sm:$0xff]  }
 0x2d1   :  { %6229 = vmatprep.subr.bf16.mxu1 %v12320_v56  ;;  %v12378_v56 = vld [vmem:[%s17100_s2 + $0x1a18] ss:$72 sps:$4 sm:$0xff]  }
 0x2d3   :  { %6101 = vmatpush1.bf16.msra.mxu0 %v12315_v57  ;;  %v12383_v57 = vld [vmem:[%s17100_s2 + $0x1aa4] ss:$72 sps:$4 sm:$0xff]  }
 0x2d4   :  { %6230 = vmatpush1.bf16.msra.mxu1 %v12318_v58  ;;  %6102 = vmatprep.subr.bf16.mxu0 %v12323_v59  ;;  %v12386_v58 = vld [vmem:[%s17100_s2 + $0x1aac] ss:$72 sps:$4 sm:$0xff]   ;;  %v12381_v59 = vld [vmem:[%s17100_s2 + $0x1aa0] ss:$72 sps:$4 sm:$0xff]  }
 0x2d5   :  { %6231 = vmatprep.subr.bf16.mxu1 %v12326_v60  ;;  %v12384_v60 = vld [vmem:[%s17100_s2 + $0x1aa8] ss:$72 sps:$4 sm:$0xff]  }
 0x2d7   :  { %6103 = vmatpush1.bf16.msra.mxu0 %v12321_v61  ;;  %v12389_v61 = vld [vmem:[%s17100_s2 + $0x44] ss:$72 sps:$4 sm:$0xff]  }
 0x2d8   :  { %6232 = vmatpush1.bf16.msra.mxu1 %v12324_v62  ;;  %6104 = vmatprep.subr.bf16.mxu0 %v12329_v5  ;;  %v6406_v62 = vpack.c.bf16 %v14996_v2, %v14996_v2  ;;  %v12387_v5 = vld [vmem:[%s17100_s2 + $0x40] ss:$72 sps:$4 sm:$0xff]   ;;  %v12390_v2 = vld [vmem:[%s17100_s2 + $0xd0] ss:$72 sps:$4 sm:$0xff]  }
 0x2d9   :  { %6233 = vmatprep.subr.bf16.mxu1 %v12332_v6  ;;  %v12392_v6 = vld [vmem:[%s17100_s2 + $0xd4] ss:$72 sps:$4 sm:$0xff]  }
 0x2db   :  { %6105 = vmatpush1.bf16.msra.mxu0 %v12327_v19  ;;  %v6394_v19 = vpack.c.bf16 %v14390_v10, %v14390_v10  ;;  %v6405_v10 = vpack.c.bf16 %v14992_v0, %v14992_v0  ;;  %v6393_v0 = vpack.c.bf16 %v14386_v7, %v14386_v7  ;;  %v12402_v7 = vld [vmem:[%s17100_s2 + $0x310] ss:$72 sps:$4 sm:$0xff]  }
 0x2dc   :  { %6234 = vmatpush1.bf16.msra.mxu1 %v12330_v20  ;;  %6106 = vmatprep.subr.bf16.mxu0 %v12335_v21  ;;  %v12395_v20 = vld [vmem:[%s17100_s2 + $0x164] ss:$72 sps:$4 sm:$0xff]   ;;  %v12393_v21 = vld [vmem:[%s17100_s2 + $0x160] ss:$72 sps:$4 sm:$0xff]  }
 0x2dd   :  { %6235 = vmatprep.subr.bf16.mxu1 %v12338_v22  ;;  %v12398_v22 = vld [vmem:[%s17100_s2 + $0x1f4] ss:$72 sps:$4 sm:$0xff]  }
 0x2df   :  { %6107 = vmatpush1.bf16.msra.mxu0 %v12333_v23  ;;  %v12396_v23 = vld [vmem:[%s17100_s2 + $0x1f0] ss:$72 sps:$4 sm:$0xff]  }
 0x2e0   :  { %6236 = vmatpush1.bf16.msra.mxu1 %v12336_v24  ;;  %6108 = vmatprep.subr.bf16.mxu0 %v12341_v27  ;;  %v6396_v24 = vpack.c.bf16 %v14392_v11, %v14392_v11  ;;  %v12399_v27 = vld [vmem:[%s17100_s2 + $0x280] ss:$72 sps:$4 sm:$0xff]   ;;  %v12407_v11 = vld [vmem:[%s17100_s2 + $0x3a4] ss:$72 sps:$4 sm:$0xff]  }
 0x2e1   :  { %6237 = vmatprep.subr.bf16.mxu1 %v12344_v28  ;;  %v12404_v28 = vld [vmem:[%s17100_s2 + $0x314] ss:$72 sps:$4 sm:$0xff]  }
 0x2e3   :  { %6109 = vmatpush1.bf16.msra.mxu0 %v12339_v29 }
 0x2e4   :  { %6238 = vmatpush1.bf16.msra.mxu1 %v12342_v30  ;;  %6110 = vmatprep.subr.bf16.mxu0 %v12347_v31 }
 0x2e5   :  { %6239 = vmatprep.subr.bf16.mxu1 %v12350_v32 }
 0x2e7   :  { %6111 = vmatpush1.bf16.msra.mxu0 %v12345_v33 }
 0x2e8   :  { %6240 = vmatpush1.bf16.msra.mxu1 %v12348_v34  ;;  %6112 = vmatprep.subr.bf16.mxu0 %v12353_v35 }
 0x2e9   :  { %6241 = vmatprep.subr.bf16.mxu1 %v12356_v37  ;;  %v12405_v37 = vld [vmem:[%s17100_s2 + $0x3a0] ss:$72 sps:$4 sm:$0xff]  }
 0x2eb   :  { %6113 = vmatpush1.bf16.msra.mxu0 %v12351_v38 }
 0x2ec   :  { %6242 = vmatpush1.bf16.msra.mxu1 %v12354_v39  ;;  %6114 = vmatprep.subr.bf16.mxu0 %v12359_v40 }
 0x2ed   :  { %6243 = vmatprep.subr.bf16.mxu1 %v12362_v41  ;;  %v12410_v41 = vld [vmem:[%s17100_s2 + $0x434] ss:$72 sps:$4 sm:$0xff]  }
 0x2ef   :  { %6115 = vmatpush1.bf16.msra.mxu0 %v12357_v42 }
 0x2f0   :  { %6244 = vmatpush1.bf16.msra.mxu1 %v12360_v43  ;;  %6116 = vmatprep.subr.bf16.mxu0 %v12365_v44  ;;  %v12408_v43 = vld [vmem:[%s17100_s2 + $0x430] ss:$72 sps:$4 sm:$0xff]   ;;  %v12413_v44 = vld [vmem:[%s17100_s2 + $0x4c4] ss:$72 sps:$4 sm:$0xff]  }
 0x2f1   :  { %6245 = vmatprep.subr.bf16.mxu1 %v12368_v45  ;;  %v6395_v45 = vpack.c.bf16 %v14388_v8, %v14388_v8  ;;  %v12414_v8 = vld [vmem:[%s17100_s2 + $0x550] ss:$72 sps:$4 sm:$0xff]  }
 0x2f3   :  { %6117 = vmatpush1.bf16.msra.mxu0 %v12363_v46  ;;  %v12411_v46 = vld [vmem:[%s17100_s2 + $0x4c0] ss:$72 sps:$4 sm:$0xff]  }
 0x2f4   :  { %6246 = vmatpush1.bf16.msra.mxu1 %v12366_v47  ;;  %6118 = vmatprep.subr.bf16.mxu0 %v12371_v48  ;;  %v6398_v47 = vpack.c.bf16 %v14994_v1, %v14994_v1  ;;  %v12419_v1 = vld [vmem:[%s17100_s2 + $0x5e4] ss:$72 sps:$4 sm:$0xff]  }
 0x2f5   :  { %6247 = vmatprep.subr.bf16.mxu1 %v12374_v49  ;;  %v12416_v49 = vld [vmem:[%s17100_s2 + $0x554] ss:$72 sps:$4 sm:$0xff]  }
 0x2f7   :  { %6119 = vmatpush1.bf16.msra.mxu0 %v12369_v51  ;;  %v6412_v51 = vpack.c.bf16 %v15010_v15, %v15010_v15  ;;  %v12422_v15 = vld [vmem:[%s17100_s2 + $0x674] ss:$72 sps:$4 sm:$0xff]  }
 0x2f8   :  { %6248 = vmatpush1.bf16.msra.mxu1 %v12372_v52  ;;  %6120 = vmatprep.subr.bf16.mxu0 %v12377_v53  ;;  %v12417_v52 = vld [vmem:[%s17100_s2 + $0x5e0] ss:$72 sps:$4 sm:$0xff]   ;;  %v6397_v53 = vpack.c.bf16 %v14990_v63, %v14990_v63 }
 0x2f9   :  { %6249 = vmatprep.subr.bf16.mxu1 %v12380_v54  ;;  %v12420_v54 = vld [vmem:[%s17100_s2 + $0x670] ss:$72 sps:$4 sm:$0xff]   ;;  %v12423_v63 = vld [vmem:[%s17100_s2 + $0x700] ss:$72 sps:$4 sm:$0xff]  }
 0x2fb   :  { %6121 = vmatpush1.bf16.msra.mxu0 %v12375_v55  ;;  %v6400_v55 = vpack.c.bf16 %v14404_v16, %v14404_v16  ;;  %v12428_v16 = vld [vmem:[%s17100_s2 + $0x794] ss:$72 sps:$4 sm:$0xff]  }
 0x2fc   :  { %6250 = vmatpush1.bf16.msra.mxu1 %v12378_v56  ;;  %6122 = vmatprep.subr.bf16.mxu0 %v12383_v57  ;;  %v6411_v56 = vpack.c.bf16 %v15000_v4, %v15000_v4  ;;  %v12425_v57 = vld [vmem:[%s17100_s2 + $0x704] ss:$72 sps:$4 sm:$0xff]   ;;  %v6399_v4 = vpack.c.bf16 %v14394_v12, %v14394_v12  ;;  %v12429_v12 = vld [vmem:[%s17100_s2 + $0x820] ss:$72 sps:$4 sm:$0xff]  }
 0x2fd   :  { %6251 = vmatprep.subr.bf16.mxu1 %v12386_v58 }
 0x2ff   :  { %6123 = vmatpush1.bf16.msra.mxu0 %v12381_v59  ;;  %v12426_v59 = vld [vmem:[%s17100_s2 + $0x790] ss:$72 sps:$4 sm:$0xff]  }
 0x300   :  { %6252 = vmatpush1.bf16.msra.mxu1 %v12384_v60  ;;  %6264 = vmatprep.subr.bf16.mxu0 %v12389_v61  ;;  %v6402_v60 = vpack.c.bf16 %v14406_v18, %v14406_v18  ;;  %v12434_v18 = vld [vmem:[%s17100_s2 + $0x8b4] ss:$72 sps:$4 sm:$0xff]  }
 0x301   :  { %6453 = vmatprep.subr.bf16.mxu1 %v6406_v62  ;;  %v12431_v62 = vld [vmem:[%s17100_s2 + $0x824] ss:$72 sps:$4 sm:$0xff]  }
 0x302   :  { %6125 = vmatmul.mubr.bf16.vlgmr.msra.gmra.mrb[12].mxu0 %v13720_v26 }
 0x303   :  { %6254 = vmatmul.mubr.bf16.vlgmr.msra.gmra.mrb[12].mxu1 %v13720_v26  ;;  %6265 = vmatpush1.bf16.msra.mxu0 %v12387_v5 }
 0x304   :  { %6485 = vmatprep.mubr.bf16.mxu1 %v6394_v19  ;;  %6266 = vmatprep.subr.bf16.mxu0 %v12392_v6  ;;  %v12432_v6 = vld [vmem:[%s17100_s2 + $0x8b0] ss:$72 sps:$4 sm:$0xff]   ;;  %v12437_v19 = vld [vmem:[%s17100_s2 + $0x944] ss:$72 sps:$4 sm:$0xff]  }
 0x305   :  { %6296 = vmatprep.mubr.bf16.mxu0 %v13232_v50  ;;  %v12401_v50 = vld [vmem:[%s17100_s2 + $0x284] ss:$72 sps:$4 sm:$0xff]  }
 0x307   :  { %6267 = vmatpush1.bf16.msra.mxu0 %v12390_v2  ;;  %v6401_v2 = vpack.c.bf16 %v14396_v13, %v14396_v13  ;;  %v12438_v13 = vld [vmem:[%s17100_s2 + $0x9d0] ss:$72 sps:$4 sm:$0xff]  }
 0x308   :  { %6268 = vmatprep.subr.bf16.mxu0 %v12395_v20  ;;  %v6404_v20 = vpack.c.bf16 %v15008_v14, %v15008_v14  ;;  %v12443_v14 = vld [vmem:[%s17100_s2 + $0xa64] ss:$72 sps:$4 sm:$0xff]  }
 0x309   :  { %6454 = vmatpush1.bf16.xpose.msra.mxu1 %v6405_v10 }
 0x30b   :  { %6269 = vmatpush1.bf16.msra.mxu0 %v12393_v21  ;;  %v12435_v21 = vld [vmem:[%s17100_s2 + $0x940] ss:$72 sps:$4 sm:$0xff]  }
 0x30c   :  { %6270 = vmatprep.subr.bf16.mxu0 %v12398_v22  ;;  %v12440_v22 = vld [vmem:[%s17100_s2 + $0x9d4] ss:$72 sps:$4 sm:$0xff]  }
 0x30f   :  { %6271 = vmatpush1.bf16.msra.mxu0 %v12396_v23  ;;  %v12441_v23 = vld [vmem:[%s17100_s2 + $0xa60] ss:$72 sps:$4 sm:$0xff]  }
 0x310   :  { %6486 = vmatmul.mubr.bf16.vlgmr.msra.gmra.mrb[16].mxu1 %v6393_v0  ;;  %6272 = vmatprep.subr.bf16.mxu0 %v12401_v50  ;;  %v6403_v50 = vpack.c.bf16 %v14998_v3, %v14998_v3  ;;  %v12449_v0 = vld [vmem:[%s17100_s2 + $0xb84] ss:$72 sps:$4 sm:$0xff]   ;;  %v12452_v3 = vld [vmem:[%s17100_s2 + $0xc14] ss:$72 sps:$4 sm:$0xff]  }
 0x311   :  { %6525 = vmatprep.mubr.bf16.mxu1 %v6396_v24  ;;  %v12447_v24 = vld [vmem:[%s17100_s2 + $0xb80] ss:$72 sps:$4 sm:$0xff]  }
 0x313   :  { %6273 = vmatpush1.bf16.msra.mxu0 %v12399_v27  ;;  %v12450_v27 = vld [vmem:[%s17100_s2 + $0xc10] ss:$72 sps:$4 sm:$0xff]  }
 0x314   :  { %6274 = vmatprep.subr.bf16.mxu0 %v12404_v28  ;;  %v12455_v28 = vld [vmem:[%s17100_s2 + $0xca4] ss:$72 sps:$4 sm:$0xff]  }
 0x315   :  { %v5868_v29 = vpop.f32.mrb[8].mxu0 }
 0x316   :  { %v5997_v30 = vpop.f32.mrb[8].mxu1  ;;  %v5870_v31 = vpop.f32.mrb[9].mxu0  ;;  %v6407_v38 = vpack.c.bf16 %v5868_v29, %v5868_v29  ;;  %v12456_v29 = vld [vmem:[%s17100_s2 + $0xd30] ss:$72 sps:$4 sm:$0xff]  }
 0x317   :  { %v5999_v32 = vpop.f32.mrb[9].mxu1  ;;  %v6408_v33 = vpack.c.bf16 %v5870_v31, %v5870_v31  ;;  %v5872_v34 = vpop.f32.mrb[10].mxu0  ;;  %6275 = vmatpush1.bf16.msra.mxu0 %v12402_v7  ;;  %v6409_v48 = vpack.c.bf16 %v5997_v30, %v5997_v30  ;;  %v12453_v7 = vld [vmem:[%s17100_s2 + $0xca0] ss:$72 sps:$4 sm:$0xff]   ;;  %v12461_v30 = vld [vmem:[%s17100_s2 + $0xdc4] ss:$72 sps:$4 sm:$0xff]  }
 0x318   :  { %v15564_v35 = vpop.f32.mrb[10].mxu1  ;;  %v5874_v39 = vpop.f32.mrb[11].mxu0  ;;  %6276 = vmatprep.subr.bf16.mxu0 %v12407_v11  ;;  %v6410_v42 = vpack.c.bf16 %v5999_v32, %v5999_v32  ;;  %v6413_v61 = vpack.c.bf16 %v5872_v34, %v5872_v34  ;;  %v12458_v11 = vld [vmem:[%s17100_s2 + $0xd34] ss:$72 sps:$4 sm:$0xff]   ;;  %v12459_v31 = vld [vmem:[%s17100_s2 + $0xdc0] ss:$72 sps:$4 sm:$0xff]  }
 0x319   :  { %v6003_v40 = vpop.f32.mrb[11].mxu1  ;;  %6493 = vmatprep.subr.bf16.mxu1 %v6408_v33  ;;  %v6414_v58 = vpack.c.bf16 %v5874_v39, %v5874_v39  ;;  %v6415_v10 = vpack.c.bf16 %v15564_v35, %v15564_v35  ;;  %v12464_v32 = vld [vmem:[%s17100_s2 + $0xe54] ss:$72 sps:$4 sm:$0xff]   ;;  %v12462_v33 = vld [vmem:[%s17100_s2 + $0xe50] ss:$72 sps:$4 sm:$0xff]  }
 0x31a   :  { %6494 = vmatpush1.bf16.xpose.msra.mxu1 %v6407_v38  ;;  %v6416_v5 = vpack.c.bf16 %v6003_v40, %v6003_v40  ;;  %v12467_v34 = vld [vmem:[%s17100_s2 + $0xee4] ss:$72 sps:$4 sm:$0xff]   ;;  %v12465_v35 = vld [vmem:[%s17100_s2 + $0xee0] ss:$72 sps:$4 sm:$0xff]   ;;  %v12468_v38 = vld [vmem:[%s17100_s2 + $0xf70] ss:$72 sps:$4 sm:$0xff]  }
 0x31b   :  { %6533 = vmatprep.subr.bf16.mxu1 %v6410_v42  ;;  %6277 = vmatpush1.bf16.msra.mxu0 %v12405_v37  ;;  %v12470_v37 = vld [vmem:[%s17100_s2 + $0xf74] ss:$72 sps:$4 sm:$0xff]   ;;  %v12473_v39 = vld [vmem:[%s17100_s2 + $0x1004] ss:$72 sps:$4 sm:$0xff]   ;;  %v12471_v40 = vld [vmem:[%s17100_s2 + $0x1000] ss:$72 sps:$4 sm:$0xff]  }
 0x31c   :  { %6278 = vmatprep.subr.bf16.mxu0 %v12410_v41  ;;  %v12476_v41 = vld [vmem:[%s17100_s2 + $0x1094] ss:$72 sps:$4 sm:$0xff]   ;;  %v12474_v42 = vld [vmem:[%s17100_s2 + $0x1090] ss:$72 sps:$4 sm:$0xff]  }
 0x31f   :  { %6279 = vmatpush1.bf16.msra.mxu0 %v12408_v43  ;;  %v12479_v43 = vld [vmem:[%s17100_s2 + $0x1124] ss:$72 sps:$4 sm:$0xff]  }
 0x320   :  { %6280 = vmatprep.subr.bf16.mxu0 %v12413_v44  ;;  %v12477_v44 = vld [vmem:[%s17100_s2 + $0x1120] ss:$72 sps:$4 sm:$0xff]  }
 0x321   :  { %6526 = vmatmul.mubr.bf16.vlgmr.msra.gmra.mrb[16].mxu1 %v6395_v45  ;;  %v12482_v45 = vld [vmem:[%s17100_s2 + $0x11b4] ss:$72 sps:$4 sm:$0xff]  }
 0x322   :  { %6534 = vmatpush1.bf16.xpose.msra.mxu1 %v6409_v48  ;;  %6565 = vmatprep.mubr.bf16.mxu1 %v6398_v47  ;;  %v12485_v47 = vld [vmem:[%s17100_s2 + $0x1244] ss:$72 sps:$4 sm:$0xff]   ;;  %v12483_v48 = vld [vmem:[%s17100_s2 + $0x1240] ss:$72 sps:$4 sm:$0xff]  }
 0x323   :  { %6573 = vmatprep.subr.bf16.mxu1 %v6412_v51  ;;  %6281 = vmatpush1.bf16.msra.mxu0 %v12411_v46  ;;  %v12480_v46 = vld [vmem:[%s17100_s2 + $0x11b0] ss:$72 sps:$4 sm:$0xff]  }
 0x324   :  { %6282 = vmatprep.subr.bf16.mxu0 %v12416_v49  ;;  %v12488_v49 = vld [vmem:[%s17100_s2 + $0x12d4] ss:$72 sps:$4 sm:$0xff]   ;;  %v12486_v51 = vld [vmem:[%s17100_s2 + $0x12d0] ss:$72 sps:$4 sm:$0xff]  }
 0x327   :  { %6283 = vmatpush1.bf16.msra.mxu0 %v12414_v8  ;;  %v12491_v8 = vld [vmem:[%s17100_s2 + $0x1364] ss:$72 sps:$4 sm:$0xff]  }
 0x328   :  { %6284 = vmatprep.subr.bf16.mxu0 %v12419_v1  ;;  %v12489_v1 = vld [vmem:[%s17100_s2 + $0x1360] ss:$72 sps:$4 sm:$0xff]  }
 0x32b   :  { %6285 = vmatpush1.bf16.msra.mxu0 %v12417_v52  ;;  %v12497_v52 = vld [vmem:[%s17100_s2 + $0x1484] ss:$72 sps:$4 sm:$0xff]  }
 0x32c   :  { %6286 = vmatprep.subr.bf16.mxu0 %v12422_v15  ;;  %v12495_v15 = vld [vmem:[%s17100_s2 + $0x1480] ss:$72 sps:$4 sm:$0xff]  }
 0x32d   :  { %6566 = vmatmul.mubr.bf16.vlgmr.msra.gmra.mrb[16].mxu1 %v6397_v53  ;;  %v12500_v53 = vld [vmem:[%s17100_s2 + $0x1514] ss:$72 sps:$4 sm:$0xff]  }
 0x32e   :  { %6574 = vmatpush1.bf16.xpose.msra.mxu1 %v6411_v56  ;;  %6605 = vmatprep.mubr.bf16.mxu1 %v6400_v55  ;;  %v12503_v55 = vld [vmem:[%s17100_s2 + $0x15a4] ss:$72 sps:$4 sm:$0xff]   ;;  %v12501_v56 = vld [vmem:[%s17100_s2 + $0x15a0] ss:$72 sps:$4 sm:$0xff]  }
 0x32f   :  { %6613 = vmatprep.subr.bf16.mxu1 %v6414_v58  ;;  %6287 = vmatpush1.bf16.msra.mxu0 %v12420_v54  ;;  %v12498_v54 = vld [vmem:[%s17100_s2 + $0x1510] ss:$72 sps:$4 sm:$0xff]  }
 0x330   :  { %6288 = vmatprep.subr.bf16.mxu0 %v12425_v57  ;;  %v12506_v57 = vld [vmem:[%s17100_s2 + $0x1634] ss:$72 sps:$4 sm:$0xff]   ;;  %v12504_v58 = vld [vmem:[%s17100_s2 + $0x1630] ss:$72 sps:$4 sm:$0xff]  }
 0x333   :  { %6289 = vmatpush1.bf16.msra.mxu0 %v12423_v63  ;;  %v12509_v63 = vld [vmem:[%s17100_s2 + $0x16c4] ss:$72 sps:$4 sm:$0xff]  }
 0x334   :  { %6290 = vmatprep.subr.bf16.mxu0 %v12428_v16  ;;  %v12507_v16 = vld [vmem:[%s17100_s2 + $0x16c0] ss:$72 sps:$4 sm:$0xff]  }
 0x335   :  { %6606 = vmatmul.mubr.bf16.vlgmr.msra.gmra.mrb[20].mxu1 %v6399_v4  ;;  %v12512_v4 = vld [vmem:[%s17100_s2 + $0x1754] ss:$72 sps:$4 sm:$0xff]  }
 0x336   :  { %6614 = vmatpush1.bf16.xpose.msra.mxu1 %v6413_v61  ;;  %6645 = vmatprep.mubr.bf16.mxu1 %v6402_v60  ;;  %v12515_v60 = vld [vmem:[%s17100_s2 + $0x17e4] ss:$72 sps:$4 sm:$0xff]   ;;  %v12513_v61 = vld [vmem:[%s17100_s2 + $0x17e0] ss:$72 sps:$4 sm:$0xff]  }
 0x337   :  { %6653 = vmatprep.subr.bf16.mxu1 %v6416_v5  ;;  %6291 = vmatpush1.bf16.msra.mxu0 %v12426_v59  ;;  %v12510_v59 = vld [vmem:[%s17100_s2 + $0x1750] ss:$72 sps:$4 sm:$0xff]  }
 0x338   :  { %6292 = vmatprep.subr.bf16.mxu0 %v12431_v62  ;;  %v12518_v62 = vld [vmem:[%s17100_s2 + $0x1874] ss:$72 sps:$4 sm:$0xff]   ;;  %v12516_v5 = vld [vmem:[%s17100_s2 + $0x1870] ss:$72 sps:$4 sm:$0xff]  }
 0x33b   :  { %6293 = vmatpush1.bf16.msra.mxu0 %v12429_v12  ;;  %v12521_v12 = vld [vmem:[%s17100_s2 + $0x1904] ss:$72 sps:$4 sm:$0xff]  }
 0x33c   :  { %6294 = vmatprep.subr.bf16.mxu0 %v12434_v18  ;;  %v12519_v18 = vld [vmem:[%s17100_s2 + $0x1900] ss:$72 sps:$4 sm:$0xff]  }
 0x33f   :  { %6295 = vmatpush1.bf16.msra.mxu0 %v12432_v6  ;;  %v12524_v6 = vld [vmem:[%s17100_s2 + $0x1994] ss:$72 sps:$4 sm:$0xff]  }
 0x340   :  { %6307 = vmatprep.subr.bf16.mxu0 %v12437_v19  ;;  %v12522_v19 = vld [vmem:[%s17100_s2 + $0x1990] ss:$72 sps:$4 sm:$0xff]  }
 0x341   :  { %6646 = vmatmul.mubr.bf16.vlgmr.msra.gmra.mrb[20].mxu1 %v6401_v2  ;;  %v12527_v2 = vld [vmem:[%s17100_s2 + $0x1a24] ss:$72 sps:$4 sm:$0xff]  }
 0x342   :  { %6654 = vmatpush1.bf16.xpose.msra.mxu1 %v6415_v10  ;;  %6685 = vmatprep.mubr.bf16.mxu1 %v6404_v20  ;;  %v12525_v20 = vld [vmem:[%s17100_s2 + $0x1a20] ss:$72 sps:$4 sm:$0xff]   ;;  %v12530_v10 = vld [vmem:[%s17100_s2 + $0x1ab4] ss:$72 sps:$4 sm:$0xff]  }
 0x343   :  { %6297 = vmatmul.mubr.bf16.vlgmr.msra.gmra.mrb[16].mxu0 %v13302_v9  ;;  %v12446_v9 = vld [vmem:[%s17100_s2 + $0xaf4] ss:$72 sps:$4 sm:$0xff]  }
 0x344   :  { %6308 = vmatpush1.bf16.msra.mxu0 %v12435_v21  ;;  %6339 = vmatprep.mubr.bf16.mxu0 %v13384_v36  ;;  %v12444_v36 = vld [vmem:[%s17100_s2 + $0xaf0] ss:$72 sps:$4 sm:$0xff]  }
 0x345   :  { %6309 = vmatprep.subr.bf16.mxu0 %v12440_v22  ;;  %v12528_v21 = vld [vmem:[%s17100_s2 + $0x1ab0] ss:$72 sps:$4 sm:$0xff]  }
 0x348   :  { %6310 = vmatpush1.bf16.msra.mxu0 %v12438_v13 }
 0x349   :  { %6311 = vmatprep.subr.bf16.mxu0 %v12443_v14 }
 0x34c   :  { %6312 = vmatpush1.bf16.msra.mxu0 %v12441_v23 }
 0x34d   :  { %6686 = vmatmul.mubr.bf16.vlgmr.msra.gmra.mrb[20].mxu1 %v6403_v50  ;;  %6313 = vmatprep.subr.bf16.mxu0 %v12446_v9 }
 0x350   :  { %6314 = vmatpush1.bf16.msra.mxu0 %v12444_v36 }
 0x351   :  { %6315 = vmatprep.subr.bf16.mxu0 %v12449_v0 }
 0x354   :  { %6316 = vmatpush1.bf16.msra.mxu0 %v12447_v24 }
 0x355   :  { %6317 = vmatprep.subr.bf16.mxu0 %v12452_v3 }
 0x358   :  { %6318 = vmatpush1.bf16.msra.mxu0 %v12450_v27 }
 0x359   :  { %6319 = vmatprep.subr.bf16.mxu0 %v12455_v28 }
 0x35c   :  { %6320 = vmatpush1.bf16.msra.mxu0 %v12453_v7 }
 0x35d   :  { %6321 = vmatprep.subr.bf16.mxu0 %v12458_v11  ;;  %v6442_v11 = vlaneseq }
 0x360   :  { %6322 = vmatpush1.bf16.msra.mxu0 %v12456_v29 }
 0x361   :  { %6323 = vmatprep.subr.bf16.mxu0 %v12461_v30  ;;  %v15857_v30 = vshrl.u32 %v6442_v11, 7 }
 0x364   :  { %6324 = vmatpush1.bf16.msra.mxu0 %v12459_v31 }
 0x365   :  { %6325 = vmatprep.subr.bf16.mxu0 %v12464_v32  ;;  %v10705_v32 = vld.sshfl [vmem:[%s17102_s1] sm:$0x11 pattern:$0x75316420] }
 0x368   :  { %6326 = vmatpush1.bf16.msra.mxu0 %v12462_v33 }
 0x369   :  { %6327 = vmatprep.subr.bf16.mxu0 %v12467_v34  ;;  %v15864_v34 = vsub.s32 0, %v15857_v30 }
 0x36c   :  { %6328 = vmatpush1.bf16.msra.mxu0 %v12465_v35 }
 0x36d   :  { %6329 = vmatprep.subr.bf16.mxu0 %v12470_v37 }
 0x370   :  { %6330 = vmatpush1.bf16.msra.mxu0 %v12468_v38 }
 0x371   :  { %6331 = vmatprep.subr.bf16.mxu0 %v12473_v39 }
 0x374   :  { %6332 = vmatpush1.bf16.msra.mxu0 %v12471_v40 }
 0x375   :  { %6333 = vmatprep.subr.bf16.mxu0 %v12476_v41 }
 0x378   :  { %6334 = vmatpush1.bf16.msra.mxu0 %v12474_v42 }
 0x379   :  { %6335 = vmatprep.subr.bf16.mxu0 %v12479_v43 }
 0x37c   :  { %6336 = vmatpush1.bf16.msra.mxu0 %v12477_v44  ;;  %v6438_v44 = vcombine.high %v10705_v32, %v10705_v32 }
 0x37d   :  { %6337 = vmatprep.subr.bf16.mxu0 %v12482_v45 }
 0x380   :  { %6338 = vmatpush1.bf16.msra.mxu0 %v12480_v46 }
 0x381   :  { %6350 = vmatprep.subr.bf16.mxu0 %v12485_v47 }
 0x383   :  { %6340 = vmatmul.mubr.bf16.vlgmr.msra.gmra.mrb[16].mxu0 %v13514_v17  ;;  %v12494_v17 = vld [vmem:[%s17100_s2 + $0x13f4] ss:$72 sps:$4 sm:$0xff]  }
 0x384   :  { %6351 = vmatpush1.bf16.msra.mxu0 %v12483_v48  ;;  %6382 = vmatprep.mubr.bf16.mxu0 %v13539_v25  ;;  %v12492_v25 = vld [vmem:[%s17100_s2 + $0x13f0] ss:$72 sps:$4 sm:$0xff]  }
 0x385   :  { %6352 = vmatprep.subr.bf16.mxu0 %v12488_v49 }
 0x388   :  { %6353 = vmatpush1.bf16.msra.mxu0 %v12486_v51 }
 0x389   :  { %6354 = vmatprep.subr.bf16.mxu0 %v12491_v8 }
 0x38c   :  { %6355 = vmatpush1.bf16.msra.mxu0 %v12489_v1 }
 0x38d   :  { %6356 = vmatprep.subr.bf16.mxu0 %v12494_v17 }
 0x390   :  { %6357 = vmatpush1.bf16.msra.mxu0 %v12492_v25 }
 0x391   :  { %6358 = vmatprep.subr.bf16.mxu0 %v12497_v52 }
 0x394   :  { %6359 = vmatpush1.bf16.msra.mxu0 %v12495_v15 }
 0x395   :  { %6360 = vmatprep.subr.bf16.mxu0 %v12500_v53 }
 0x398   :  { %6361 = vmatpush1.bf16.msra.mxu0 %v12498_v54 }
 0x399   :  { %6362 = vmatprep.subr.bf16.mxu0 %v12503_v55 }
 0x39c   :  { %6363 = vmatpush1.bf16.msra.mxu0 %v12501_v56 }
 0x39d   :  { %6364 = vmatprep.subr.bf16.mxu0 %v12506_v57 }
 0x3a0   :  { %6365 = vmatpush1.bf16.msra.mxu0 %v12504_v58 }
 0x3a1   :  { %6366 = vmatprep.subr.bf16.mxu0 %v12509_v63 }
 0x3a4   :  { %6367 = vmatpush1.bf16.msra.mxu0 %v12507_v16 }
 0x3a5   :  { %6368 = vmatprep.subr.bf16.mxu0 %v12512_v4 }
 0x3a8   :  { %6369 = vmatpush1.bf16.msra.mxu0 %v12510_v59  ;;  %v13036_v59 = vmov 0  }
 0x3a9   :  { %6370 = vmatprep.subr.bf16.mxu0 %v12515_v60  ;;  %6786 = vmatprep.mubr.bf16.mxu1 %v13036_v59 }
 0x3ac   :  { %6371 = vmatpush1.bf16.msra.mxu0 %v12513_v61 }
 0x3ad   :  { %6372 = vmatprep.subr.bf16.mxu0 %v12518_v62  ;;  %v12534_v62 = vld [vmem:[%s17103_s3 + $0x8] ss:$24 sps:$4 sm:$0xff]  }
 0x3b0   :  { %6373 = vmatpush1.bf16.msra.mxu0 %v12516_v5  ;;  %v12536_v5 = vld [vmem:[%s17103_s3 + $0xc] ss:$24 sps:$4 sm:$0xff]  }
 0x3b1   :  { %6374 = vmatprep.subr.bf16.mxu0 %v12521_v12  ;;  %v12540_v12 = vld [vmem:[%s17103_s3 + $0x38] ss:$24 sps:$4 sm:$0xff]  }
 0x3b4   :  { %6375 = vmatpush1.bf16.msra.mxu0 %v12519_v18  ;;  %v12542_v18 = vld [vmem:[%s17103_s3 + $0x3c] ss:$24 sps:$4 sm:$0xff]  }
 0x3b5   :  { %6376 = vmatprep.subr.bf16.mxu0 %v12524_v6  ;;  %v12548_v6 = vld [vmem:[%s17103_s3 + $0x6c] ss:$24 sps:$4 sm:$0xff]  }
 0x3b8   :  { %6377 = vmatpush1.bf16.msra.mxu0 %v12522_v19  ;;  %v12546_v19 = vld [vmem:[%s17103_s3 + $0x68] ss:$24 sps:$4 sm:$0xff]  }
 0x3b9   :  { %6378 = vmatprep.subr.bf16.mxu0 %v12527_v2  ;;  %v12554_v2 = vld [vmem:[%s17103_s3 + $0x9c] ss:$24 sps:$4 sm:$0xff]  }
 0x3bc   :  { %6379 = vmatpush1.bf16.msra.mxu0 %v12525_v20  ;;  %v12552_v20 = vld [vmem:[%s17103_s3 + $0x98] ss:$24 sps:$4 sm:$0xff]  }
 0x3bd   :  { %6380 = vmatprep.subr.bf16.mxu0 %v12530_v10  ;;  %v12560_v10 = vld [vmem:[%s17103_s3 + $0xcc] ss:$24 sps:$4 sm:$0xff]  }
 0x3c0   :  { %6381 = vmatpush1.bf16.msra.mxu0 %v12528_v21  ;;  %v12558_v21 = vld [vmem:[%s17103_s3 + $0xc8] ss:$24 sps:$4 sm:$0xff]  }
 0x3c1   :  { %8884 = vmatprep.subr.bf16.mxu0 %v12536_v5  ;;  %v12593_v5 = vld [vmem:[%s17103_s3 + $0x1e4] ss:$24 sps:$4 sm:$0xff]  }
 0x3c3   :  { %6383 = vmatmul.mubr.bf16.vlgmr.msra.gmra.mrb[16].mxu0 %v13720_v26  ;;  %v13035_v26 = vmov 1966171168  }
 0x3c4   :  { %v6440_v7 = vunpack.c.l.s4 %v13035_v26  ;;  %8885 = vmatpush1.bf16.msra.mxu0 %v12534_v62  ;;  %v12591_v62 = vld [vmem:[%s17103_s3 + $0x1e0] ss:$24 sps:$4 sm:$0xff]  }
 0x3c5   :  { %8886 = vmatprep.subr.bf16.mxu0 %v12542_v18  ;;  %v12596_v18 = vld [vmem:[%s17103_s3 + $0x1ec] ss:$24 sps:$4 sm:$0xff]  }
 0x3c6   :  { %v6441_v29 = vunpack.c.0.s8 %v6440_v7 }
 0x3c8   :  { %v6444_v31 = vsub.s32 %v6441_v29, %v15857_v30  ;;  %8887 = vmatpush1.bf16.msra.mxu0 %v12540_v12  ;;  %v12594_v12 = vld [vmem:[%s17103_s3 + $0x1e8] ss:$24 sps:$4 sm:$0xff]  }
 0x3c9   :  { %8888 = vmatprep.subr.bf16.mxu0 %v12548_v6  ;;  %v12599_v6 = vld [vmem:[%s17103_s3 + $0x214] ss:$24 sps:$4 sm:$0xff]  }
 0x3ca   :  { %v6445_v33 = vrot.slane %v10705_v32, %v6444_v31  ;;  %v6452_v45 = vrot.slane %v6438_v44, %v6444_v31  ;;  %v12531_v44 = vld [vmem:[%s17103_s3] ss:$24 sps:$4 sm:$0xff]  }
 0x3cc   :  { %v6698_v35 = vrot.slane %v6445_v33, %v15864_v34  ;;  %v6702_v46 = vrot.slane %v6452_v45, %v15864_v34  ;;  %8889 = vmatpush1.bf16.msra.mxu0 %v12546_v19  ;;  %v12539_v45 = vld [vmem:[%s17103_s3 + $0x34] ss:$24 sps:$4 sm:$0xff]  }
 0x3cd   :  { %8890 = vmatprep.subr.bf16.mxu0 %v12554_v2  ;;  %v12602_v19 = vld [vmem:[%s17103_s3 + $0x21c] ss:$24 sps:$4 sm:$0xff]   ;;  %v12597_v2 = vld [vmem:[%s17103_s3 + $0x210] ss:$24 sps:$4 sm:$0xff]  }
 0x3d0   :  { %8891 = vmatpush1.bf16.msra.mxu0 %v12552_v20  ;;  %v12600_v20 = vld [vmem:[%s17103_s3 + $0x218] ss:$24 sps:$4 sm:$0xff]  }
 0x3d1   :  { %8892 = vmatprep.subr.bf16.mxu0 %v12560_v10  ;;  %v12603_v10 = vld [vmem:[%s17103_s3 + $0x240] ss:$24 sps:$4 sm:$0xff]  }
 0x3d4   :  { %8893 = vmatpush1.bf16.msra.mxu0 %v12558_v21  ;;  %v12605_v21 = vld [vmem:[%s17103_s3 + $0x244] ss:$24 sps:$4 sm:$0xff]  }
 0x3d5   :  { %v6126_v22 = vpop.f32.mrb[12].mxu0 }
 0x3d6   :  { %v15844_v13 = vpop.f32.mrb[12].mxu1  ;;  %v6417_v14 = vpack.c.bf16 %v6126_v22, %v6126_v22  ;;  %v6128_v23 = vpop.f32.mrb[13].mxu0  ;;  %v12566_v22 = vld [vmem:[%s17103_s3 + $0xfc] ss:$24 sps:$4 sm:$0xff]  }
 0x3d7   :  { %v6257_v9 = vpop.f32.mrb[13].mxu1  ;;  %v6418_v50 = vpack.c.bf16 %v6128_v23, %v6128_v23  ;;  %v15848_v0 = vpop.f32.mrb[14].mxu0  ;;  %v12572_v23 = vld [vmem:[%s17103_s3 + $0x12c] ss:$24 sps:$4 sm:$0xff]   ;;  %8894 = vmatprep.subr.bf16.mxu0 %v12566_v22  ;;  %v12606_v22 = vld [vmem:[%s17103_s3 + $0x248] ss:$24 sps:$4 sm:$0xff]  }
 0x3d8   :  { %v15846_v36 = vpop.f32.mrb[14].mxu1  ;;  %v6737_v24 = vsel %vm6735_vm0, %v6417_v14, 0  ;;  %v15853_v27 = vpop.f32.mrb[15].mxu0  ;;  %v6420_v28 = vpack.c.bf16 %v6257_v9, %v6257_v9  ;;  %v12564_v14 = vld [vmem:[%s17103_s3 + $0xf8] ss:$24 sps:$4 sm:$0xff]  }
 0x3d9   :  { %v15851_v3 = vpop.f32.mrb[15].mxu1  ;;  %10706 = vmatprep.subr.msk.bf16.mxu1 %vm6735_vm0, %v6418_v50  ;;  %v12570_v9 = vld [vmem:[%s17103_s3 + $0x128] ss:$24 sps:$4 sm:$0xff]   ;;  %8895 = vmatpush1.bf16.msra.mxu0 %v12564_v14  ;;  %v6424_v32 = vpack.c.bf16 %v15853_v27, %v15853_v27  ;;  %v12608_v14 = vld [vmem:[%s17103_s3 + $0x24c] ss:$24 sps:$4 sm:$0xff]  }
 0x3da   :  { %6755 = vmatpush1.bf16.msra.mxu1 %v6737_v24  ;;  %8896 = vmatprep.subr.bf16.mxu0 %v12572_v23  ;;  %v12611_v23 = vld [vmem:[%s17103_s3 + $0x274] ss:$24 sps:$4 sm:$0xff]  }
 0x3db   :  { %10708 = vmatprep.subr.msk.bf16.mxu1 %vm6735_vm0, %v6420_v28  ;;  %v6419_v28 = vpack.c.bf16 %v15844_v13, %v15844_v13  ;;  %v6423_v13 = vpack.c.bf16 %v15848_v0, %v15848_v0 }
 0x3dd   :  { %8897 = vmatpush1.bf16.msra.mxu0 %v12570_v9  ;;  %v6743_v11 = vsel %vm6735_vm0, %v6419_v28, 0  ;;  %v12614_v9 = vld [vmem:[%s17103_s3 + $0x27c] ss:$24 sps:$4 sm:$0xff]  }
 0x3de   :  { %v12617_v28 = vld [vmem:[%s17103_s3 + $0x2a4] ss:$24 sps:$4 sm:$0xff]  }
 0x400   :  { %v6567_v37 = vpop.f32.mrb[16].mxu1 }
 0x401   :  { %v6693_v38 = vmul.f32 0.03608439, %v6567_v37  ;;  %v6569_v39 = vpop.f32.mrb[17].mxu1  ;;  %v6881_v37 = vsel %vm6735_vm0, %v6423_v13, 0  ;;  %v12629_v13 = vld [vmem:[%s17103_s3 + $0x304] ss:$24 sps:$4 sm:$0xff]  }
 0x402   :  { %v6570_v40 = vpop.f32.mrb[18].mxu1  ;;  %v6425_v39 = vpack.c.bf16 %v15846_v36, %v15846_v36  ;;  %v12533_v36 = vld [vmem:[%s17103_s3 + $0x4] ss:$24 sps:$4 sm:$0xff]  }
 0x403   :  { %v6571_v41 = vpop.f32.mrb[19].mxu1  ;;  %v6705_v42 = vadd.f32 %v6698_v35, %v6693_v38  ;;  %v6426_v35 = vpack.c.bf16 %v15851_v3, %v15851_v3 }
 0x404   :  { %v6887_v41 = vsel %vm6735_vm0, %v6425_v39, 0 }
 0x405   :  { %v6708_v43 = vsel %vm6707_vm1, %v6705_v42, -inf }
 0x406   :  { %6709 = vmax.xlane.f32.xlu0 %v6708_v43 }
 0x420   :  { %v6687_v47 = vpop.f32.mrb[20].mxu1 }
 0x421   :  { %v6694_v48 = vmul.f32 0.03608439, %v6687_v47  ;;  %v6689_v49 = vpop.f32.mrb[21].mxu1  ;;  %v12545_v47 = vld [vmem:[%s17103_s3 + $0x64] ss:$24 sps:$4 sm:$0xff]  }
 0x422   :  { %v6690_v51 = vpop.f32.mrb[22].mxu1  ;;  %v12551_v49 = vld [vmem:[%s17103_s3 + $0x94] ss:$24 sps:$4 sm:$0xff]  }
 0x423   :  { %v6691_v8 = vpop.f32.mrb[23].mxu1  ;;  %v6706_v1 = vadd.f32 %v6702_v46, %v6694_v48  ;;  %v12537_v46 = vld [vmem:[%s17103_s3 + $0x30] ss:$24 sps:$4 sm:$0xff]   ;;  %v12543_v48 = vld [vmem:[%s17103_s3 + $0x60] ss:$24 sps:$4 sm:$0xff]  }
 0x424   :  { %v12549_v51 = vld [vmem:[%s17103_s3 + $0x90] ss:$24 sps:$4 sm:$0xff]   ;;  %v12557_v8 = vld [vmem:[%s17103_s3 + $0xc4] ss:$24 sps:$4 sm:$0xff]  }
 0x425   :  { %v6711_v17 = vsel %vm6707_vm1, %v6706_v1, -inf }
 0x426   :  { %6712 = vmax.xlane.f32.xlu0 %v6711_v17  ;;  %v12563_v17 = vld [vmem:[%s17103_s3 + $0xf4] ss:$24 sps:$4 sm:$0xff]  }
 0x493   :  { %v6710_v25 = vpop.xlane.xlu0 %6709 }
 0x494   :  { %v6714_v52 = vsub.f32 %v6705_v42, %v6710_v25  ;;  %v12561_v25 = vld [vmem:[%s17103_s3 + $0xf0] ss:$24 sps:$4 sm:$0xff]  }
 0x496   :  { %v6716_v15 = vmul.f32 1.442695, %v6714_v52  ;;  %v6384_v53 = vpop.f32.mrb[16].mxu0  ;;  %v12569_v52 = vld [vmem:[%s17103_s3 + $0x124] ss:$24 sps:$4 sm:$0xff]  }
 0x497   :  { %v6386_v54 = vpop.f32.mrb[17].mxu0  ;;  %v6421_v31 = vpack.c.bf16 %v6384_v53, %v6384_v53  ;;  %v12575_v53 = vld [vmem:[%s17103_s3 + $0x154] ss:$24 sps:$4 sm:$0xff]  }
 0x498   :  { %13011 = vpow2.f32 %v6716_v15  ;;  %v15870_v55 = vpop.f32.mrb[18].mxu0  ;;  %v6422_v29 = vpack.c.bf16 %v6386_v54, %v6386_v54  ;;  %v12567_v15 = vld [vmem:[%s17103_s3 + $0x120] ss:$24 sps:$4 sm:$0xff]   ;;  %v12578_v54 = vld [vmem:[%s17103_s3 + $0x15c] ss:$24 sps:$4 sm:$0xff]  }
 0x499   :  { %v15872_v56 = vpop.f32.mrb[19].mxu0  ;;  %v6749_v33 = vsel %vm6735_vm0, %v6421_v31, 0  ;;  %v6427_v42 = vpack.c.bf16 %v15870_v55, %v15870_v55  ;;  %v12573_v55 = vld [vmem:[%s17103_s3 + $0x150] ss:$24 sps:$4 sm:$0xff]   ;;  %8898 = vmatprep.subr.bf16.mxu0 %v12578_v54  ;;  %v12626_v31 = vld [vmem:[%s17103_s3 + $0x2dc] ss:$24 sps:$4 sm:$0xff]  }
 0x49a   :  { %v6428_v3 = vpack.c.bf16 %v15872_v56, %v15872_v56  ;;  %v12576_v56 = vld [vmem:[%s17103_s3 + $0x158] ss:$24 sps:$4 sm:$0xff]   ;;  %v12644_v54 = vld [vmem:[%s17103_s3 + $0x36c] ss:$24 sps:$4 sm:$0xff]  }
 0x49b   :  { %v6893_v43 = vsel %vm6735_vm0, %v6427_v42, 0  ;;  %8899 = vmatpush1.bf16.msra.mxu0 %v12576_v56 }
 0x4a2   :  { %v13012_v57 = vpop.eup %13011 }
 0x4a3   :  { %v6720_v58 = vsel %vm6707_vm1, %v13012_v57, 0.0 }
 0x4a4   :  { %6721 = vadd.xlane.f32.xlu1 %v6720_v58  ;;  %v12581_v58 = vld [vmem:[%s17103_s3 + $0x184] ss:$24 sps:$4 sm:$0xff]  }
 0x4b3   :  { %v6713_v63 = vpop.xlane.xlu0 %6712 }
 0x4b4   :  { %v6715_v16 = vsub.f32 %v6706_v1, %v6713_v63  ;;  %v12555_v1 = vld [vmem:[%s17103_s3 + $0xc0] ss:$24 sps:$4 sm:$0xff]  }
 0x4b5   :  { %v12582_v63 = vld [vmem:[%s17103_s3 + $0x188] ss:$24 sps:$4 sm:$0xff]  }
 0x4b6   :  { %v6718_v4 = vmul.f32 1.442695, %v6715_v16  ;;  %v12584_v16 = vld [vmem:[%s17103_s3 + $0x18c] ss:$24 sps:$4 sm:$0xff]  }
 0x4b7   :  { %8900 = vmatprep.subr.bf16.mxu0 %v12584_v16  ;;  %v12639_v16 = vld [vmem:[%s17103_s3 + $0x360] ss:$24 sps:$4 sm:$0xff]  }
 0x4b8   :  { %13013 = vpow2.f32 %v6718_v4  ;;  %8901 = vmatpush1.bf16.msra.mxu0 %v12582_v63  ;;  %v12587_v4 = vld [vmem:[%s17103_s3 + $0x1b4] ss:$24 sps:$4 sm:$0xff]  }
 0x4c2   :  { %v13014_v60 = vpop.eup %13013 }
 0x4c3   :  { %v6723_v61 = vsel %vm6707_vm1, %v13014_v60, 0.0 }
 0x4c4   :  { %6724 = vadd.xlane.f32.xlu1 %v6723_v61  ;;  %v12588_v61 = vld [vmem:[%s17103_s3 + $0x1b8] ss:$24 sps:$4 sm:$0xff]  }
 0x531   :  { %v6722_v50 = vpop.xlane.xlu1 %6721 }
 0x532   :  { %13015 = vrcp.f32 %v6722_v50  ;;  %v12609_v50 = vld [vmem:[%s17103_s3 + $0x270] ss:$24 sps:$4 sm:$0xff]  }
 0x53c   :  { %v13016_v24 = vpop.eup %13015 }
 0x53d   :  { %v6728_v26 = vmul.f32 %v13016_v24, %v13012_v57  ;;  %v12579_v57 = vld [vmem:[%s17103_s3 + $0x180] ss:$24 sps:$4 sm:$0xff]  }
 0x53e   :  { %v12612_v24 = vld [vmem:[%s17103_s3 + $0x278] ss:$24 sps:$4 sm:$0xff]  }
 0x53f   :  { %v6730_v7 = vpack.c.bf16 %v6728_v26, %v6728_v26  ;;  %v12620_v26 = vld [vmem:[%s17103_s3 + $0x2ac] ss:$24 sps:$4 sm:$0xff]  }
 0x541   :  { %10707 = vmatmul.mubr.msk.bf16.vlgmr.msra.gmra.mrb[24].mxu1 %vm6707_vm1, %v6730_v7 }
 0x542   :  { %6796 = vmatpush1.bf16.msra.mxu1 %v6743_v11  ;;  %6827 = vmatprep.mubr.bf16.mxu1 %v13036_v59  ;;  %v12618_v11 = vld [vmem:[%s17103_s3 + $0x2a8] ss:$24 sps:$4 sm:$0xff]  }
 0x543   :  { %10710 = vmatprep.subr.msk.bf16.mxu1 %vm6735_vm0, %v6422_v29  ;;  %v12623_v29 = vld [vmem:[%s17103_s3 + $0x2d4] ss:$24 sps:$4 sm:$0xff]  }
 0x549   :  { %10709 = vmatmul.mubr.msk.bf16.vlgmr.msra.gmra.mrb[28].mxu1 %vm6707_vm1, %v6730_v7 }
 0x54a   :  { %6837 = vmatpush1.bf16.msra.mxu1 %v6749_v33  ;;  %6868 = vmatprep.mubr.bf16.mxu1 %v13036_v59  ;;  %v12624_v33 = vld [vmem:[%s17103_s3 + $0x2d8] ss:$24 sps:$4 sm:$0xff]  }
 0x54b   :  { %10712 = vmatprep.subr.msk.bf16.mxu1 %vm6735_vm0, %v6424_v32  ;;  %v12621_v32 = vld [vmem:[%s17103_s3 + $0x2d0] ss:$24 sps:$4 sm:$0xff]  }
 0x551   :  { %v6725_v38 = vpop.xlane.xlu1 %6724  ;;  %10711 = vmatmul.mubr.msk.bf16.vlgmr.msra.gmra.mrb[32].mxu1 %vm6707_vm1, %v6730_v7  ;;  %v12615_v7 = vld [vmem:[%s17103_s3 + $0x2a0] ss:$24 sps:$4 sm:$0xff]  }
 0x552   :  { %13017 = vrcp.f32 %v6725_v38  ;;  %6899 = vmatpush1.bf16.msra.mxu1 %v6881_v37  ;;  %6930 = vmatprep.mubr.bf16.mxu1 %v13036_v59 }
 0x553   :  { %10714 = vmatprep.subr.msk.bf16.mxu1 %vm6735_vm0, %v6426_v35  ;;  %v12632_v35 = vld [vmem:[%s17103_s3 + $0x30c] ss:$24 sps:$4 sm:$0xff]  }
 0x55c   :  { %v13018_v27 = vpop.eup %13017 }
 0x55d   :  { %v6729_v40 = vmul.f32 %v13018_v27, %v13014_v60  ;;  %v12585_v60 = vld [vmem:[%s17103_s3 + $0x1b0] ss:$24 sps:$4 sm:$0xff]  }
 0x55f   :  { %v6731_v0 = vpack.c.bf16 %v6729_v40, %v6729_v40 }
 0x561   :  { %10713 = vmatmul.mubr.msk.bf16.vlgmr.msra.gmra.mrb[36].mxu1 %vm6707_vm1, %v6731_v0 }
 0x562   :  { %6940 = vmatpush1.bf16.msra.mxu1 %v6887_v41  ;;  %6971 = vmatprep.mubr.bf16.mxu1 %v13036_v59 }
 0x563   :  { %10716 = vmatprep.subr.msk.bf16.mxu1 %vm6735_vm0, %v6428_v3 }
 0x569   :  { %10715 = vmatmul.mubr.msk.bf16.vlgmr.msra.gmra.mrb[40].mxu1 %vm6707_vm1, %v6731_v0 }
 0x56a   :  { %6981 = vmatpush1.bf16.msra.mxu1 %v6893_v43  ;;  %7012 = vmatprep.mubr.bf16.mxu1 %v13036_v59  ;;  %v12590_v59 = vld [vmem:[%s17103_s3 + $0x1bc] ss:$24 sps:$4 sm:$0xff]  }
 0x56b   :  { %8755 = vmatprep.subr.bf16.mxu1 %v12533_v36  ;;  %8902 = vmatprep.subr.bf16.mxu0 %v12590_v59 }
 0x56c   :  { %8903 = vmatpush1.bf16.msra.mxu0 %v12588_v61  ;;  %v12650_v61 = vld [vmem:[%s17103_s3 + $0x39c] ss:$24 sps:$4 sm:$0xff]  }
 0x56d   :  { %8904 = vmatprep.subr.bf16.mxu0 %v12596_v18  ;;  %v12656_v18 = vld [vmem:[%s17103_s3 + $0x3cc] ss:$24 sps:$4 sm:$0xff]  }
 0x570   :  { %8905 = vmatpush1.bf16.msra.mxu0 %v12594_v12  ;;  %v12653_v12 = vld [vmem:[%s17103_s3 + $0x3c4] ss:$24 sps:$4 sm:$0xff]  }
 0x571   :  { %10717 = vmatmul.mubr.msk.bf16.vlgmr.msra.gmra.mrb[44].mxu1 %vm6707_vm1, %v6731_v0  ;;  %8906 = vmatprep.subr.bf16.mxu0 %v12602_v19 }
 0x572   :  { %8756 = vmatpush1.bf16.msra.mxu1 %v12531_v44 }
 0x573   :  { %8757 = vmatprep.subr.bf16.mxu1 %v12539_v45 }
 0x574   :  { %8907 = vmatpush1.bf16.msra.mxu0 %v12600_v20 }
 0x575   :  { %8908 = vmatprep.subr.bf16.mxu0 %v12608_v14 }
 0x576   :  { %8758 = vmatpush1.bf16.msra.mxu1 %v12537_v46 }
 0x577   :  { %8759 = vmatprep.subr.bf16.mxu1 %v12545_v47 }
 0x578   :  { %8909 = vmatpush1.bf16.msra.mxu0 %v12606_v22  ;;  %v12654_v22 = vld [vmem:[%s17103_s3 + $0x3c8] ss:$24 sps:$4 sm:$0xff]  }
 0x579   :  { %8910 = vmatprep.subr.bf16.mxu0 %v12614_v9  ;;  %v12662_v9 = vld [vmem:[%s17103_s3 + $0x3fc] ss:$24 sps:$4 sm:$0xff]  }
 0x57a   :  { %8760 = vmatpush1.bf16.msra.mxu1 %v12543_v48 }
 0x57b   :  { %8761 = vmatprep.subr.bf16.mxu1 %v12551_v49 }
 0x57c   :  { %8911 = vmatpush1.bf16.msra.mxu0 %v12612_v24  ;;  %v12660_v24 = vld [vmem:[%s17103_s3 + $0x3f8] ss:$24 sps:$4 sm:$0xff]  }
 0x57d   :  { %8912 = vmatprep.subr.bf16.mxu0 %v12620_v26  ;;  %v12668_v26 = vld [vmem:[%s17103_s3 + $0x42c] ss:$24 sps:$4 sm:$0xff]  }
 0x57e   :  { %8762 = vmatpush1.bf16.msra.mxu1 %v12549_v51  ;;  %v12627_v51 = vld [vmem:[%s17103_s3 + $0x300] ss:$24 sps:$4 sm:$0xff]  }
 0x57f   :  { %8763 = vmatprep.subr.bf16.mxu1 %v12557_v8  ;;  %v12630_v8 = vld [vmem:[%s17103_s3 + $0x308] ss:$24 sps:$4 sm:$0xff]  }
 0x580   :  { %8913 = vmatpush1.bf16.msra.mxu0 %v12618_v11  ;;  %v12666_v11 = vld [vmem:[%s17103_s3 + $0x428] ss:$24 sps:$4 sm:$0xff]  }
 0x581   :  { %8914 = vmatprep.subr.bf16.mxu0 %v12626_v31  ;;  %v12674_v31 = vld [vmem:[%s17103_s3 + $0x45c] ss:$24 sps:$4 sm:$0xff]  }
 0x582   :  { %8764 = vmatpush1.bf16.msra.mxu1 %v12555_v1 }
 0x583   :  { %8765 = vmatprep.subr.bf16.mxu1 %v12563_v17  ;;  %v12635_v17 = vld [vmem:[%s17103_s3 + $0x334] ss:$24 sps:$4 sm:$0xff]  }
 0x584   :  { %8915 = vmatpush1.bf16.msra.mxu0 %v12624_v33  ;;  %v12672_v33 = vld [vmem:[%s17103_s3 + $0x458] ss:$24 sps:$4 sm:$0xff]  }
 0x585   :  { %8927 = vmatprep.subr.bf16.mxu0 %v12632_v35  ;;  %v12680_v35 = vld [vmem:[%s17103_s3 + $0x48c] ss:$24 sps:$4 sm:$0xff]  }
 0x586   :  { %8766 = vmatpush1.bf16.msra.mxu1 %v12561_v25  ;;  %v12638_v25 = vld [vmem:[%s17103_s3 + $0x33c] ss:$24 sps:$4 sm:$0xff]  }
 0x587   :  { %8767 = vmatprep.subr.bf16.mxu1 %v12569_v52  ;;  %v12633_v52 = vld [vmem:[%s17103_s3 + $0x330] ss:$24 sps:$4 sm:$0xff]  }
 0x58a   :  { %8768 = vmatpush1.bf16.msra.mxu1 %v12567_v15  ;;  %v12636_v15 = vld [vmem:[%s17103_s3 + $0x338] ss:$24 sps:$4 sm:$0xff]  }
 0x58b   :  { %8769 = vmatprep.subr.bf16.mxu1 %v12575_v53  ;;  %v12641_v53 = vld [vmem:[%s17103_s3 + $0x364] ss:$24 sps:$4 sm:$0xff]  }
 0x58e   :  { %8770 = vmatpush1.bf16.msra.mxu1 %v12573_v55 }
 0x58f   :  { %8771 = vmatprep.subr.bf16.mxu1 %v12581_v58 }
 0x592   :  { %8772 = vmatpush1.bf16.msra.mxu1 %v12579_v57 }
 0x593   :  { %8773 = vmatprep.subr.bf16.mxu1 %v12587_v4  ;;  %v12642_v4 = vld [vmem:[%s17103_s3 + $0x368] ss:$24 sps:$4 sm:$0xff]  }
 0x596   :  { %8774 = vmatpush1.bf16.msra.mxu1 %v12585_v60  ;;  %v12647_v60 = vld [vmem:[%s17103_s3 + $0x394] ss:$24 sps:$4 sm:$0xff]  }
 0x597   :  { %8775 = vmatprep.subr.bf16.mxu1 %v12593_v5  ;;  %v12648_v5 = vld [vmem:[%s17103_s3 + $0x398] ss:$24 sps:$4 sm:$0xff]  }
 0x59a   :  { %8776 = vmatpush1.bf16.msra.mxu1 %v12591_v62  ;;  %v12645_v62 = vld [vmem:[%s17103_s3 + $0x390] ss:$24 sps:$4 sm:$0xff]  }
 0x59b   :  { %8777 = vmatprep.subr.bf16.mxu1 %v12599_v6 }
 0x59e   :  { %8778 = vmatpush1.bf16.msra.mxu1 %v12597_v2 }
 0x59f   :  { %8779 = vmatprep.subr.bf16.mxu1 %v12605_v21  ;;  %v12651_v21 = vld [vmem:[%s17103_s3 + $0x3c0] ss:$24 sps:$4 sm:$0xff]  }
 0x5a2   :  { %8780 = vmatpush1.bf16.msra.mxu1 %v12603_v10 }
 0x5a3   :  { %8781 = vmatprep.subr.bf16.mxu1 %v12611_v23  ;;  %v12659_v23 = vld [vmem:[%s17103_s3 + $0x3f4] ss:$24 sps:$4 sm:$0xff]  }
 0x5a6   :  { %8782 = vmatpush1.bf16.msra.mxu1 %v12609_v50  ;;  %v12657_v50 = vld [vmem:[%s17103_s3 + $0x3f0] ss:$24 sps:$4 sm:$0xff]  }
 0x5a7   :  { %8783 = vmatprep.subr.bf16.mxu1 %v12617_v28  ;;  %v12665_v28 = vld [vmem:[%s17103_s3 + $0x424] ss:$24 sps:$4 sm:$0xff]  }
 0x5aa   :  { %8784 = vmatpush1.bf16.msra.mxu1 %v12615_v7  ;;  %v12663_v7 = vld [vmem:[%s17103_s3 + $0x420] ss:$24 sps:$4 sm:$0xff]  }
 0x5ab   :  { %8785 = vmatprep.subr.bf16.mxu1 %v12623_v29  ;;  %v12671_v29 = vld [vmem:[%s17103_s3 + $0x454] ss:$24 sps:$4 sm:$0xff]  }
 0x5ae   :  { %8786 = vmatpush1.bf16.msra.mxu1 %v12621_v32  ;;  %v12669_v32 = vld [vmem:[%s17103_s3 + $0x450] ss:$24 sps:$4 sm:$0xff]  }
 0x5af   :  { %8798 = vmatprep.subr.bf16.mxu1 %v12629_v13  ;;  %v12677_v13 = vld [vmem:[%s17103_s3 + $0x484] ss:$24 sps:$4 sm:$0xff]  }
 0x614   :  { %v6788_v37 = vpop.f32.mrb[24].mxu1 }
 0x615   :  { %v6790_v38 = vpop.f32.mrb[25].mxu1 }
 0x616   :  { %v6792_v27 = vpop.f32.mrb[26].mxu1 }
 0x617   :  { %v6793_v39 = vpop.f32.mrb[27].mxu1  ;;  %v12683_v27 = vld [vmem:[%s17103_s3 + $0x4b4] ss:$24 sps:$4 sm:$0xff]  }
 0x618   :  { %v12686_v39 = vld [vmem:[%s17103_s3 + $0x4bc] ss:$24 sps:$4 sm:$0xff]  }
 0x61c   :  { %v6829_v40 = vpop.f32.mrb[28].mxu1 }
 0x61d   :  { %v6831_v0 = vpop.f32.mrb[29].mxu1 }
 0x61e   :  { %v6833_v41 = vpop.f32.mrb[30].mxu1 }
 0x61f   :  { %v6834_v3 = vpop.f32.mrb[31].mxu1  ;;  %v12689_v41 = vld [vmem:[%s17103_s3 + $0x4e4] ss:$24 sps:$4 sm:$0xff]  }
 0x620   :  { %v12692_v3 = vld [vmem:[%s17103_s3 + $0x4ec] ss:$24 sps:$4 sm:$0xff]  }
 0x624   :  { %v6870_v42 = vpop.f32.mrb[32].mxu1 }
 0x625   :  { %v6872_v36 = vpop.f32.mrb[33].mxu1 }
 0x626   :  { %v6874_v43 = vpop.f32.mrb[34].mxu1 }
 0x627   :  { %v6875_v44 = vpop.f32.mrb[35].mxu1  ;;  %v12695_v43 = vld [vmem:[%s17103_s3 + $0x514] ss:$24 sps:$4 sm:$0xff]  }
 0x628   :  { %v12698_v44 = vld [vmem:[%s17103_s3 + $0x51c] ss:$24 sps:$4 sm:$0xff]  }
 0x634   :  { %v6932_v45 = vpop.f32.mrb[36].mxu1 }
 0x635   :  { %v16109_v46 = vpack.c.bf16 %v6932_v45, %v6788_v37  ;;  %v6934_v47 = vpop.f32.mrb[37].mxu1  ;;  %v12675_v37 = vld [vmem:[%s17103_s3 + $0x480] ss:$24 sps:$4 sm:$0xff]   ;;  %v12693_v45 = vld [vmem:[%s17103_s3 + $0x510] ss:$24 sps:$4 sm:$0xff]  }
 0x636   :  { %v16111_v48 = vpack.c.bf16 %v6934_v47, %v6790_v38  ;;  %v6936_v49 = vpop.f32.mrb[38].mxu1  ;;  %v12678_v38 = vld [vmem:[%s17103_s3 + $0x488] ss:$24 sps:$4 sm:$0xff]   ;;  %v12696_v47 = vld [vmem:[%s17103_s3 + $0x518] ss:$24 sps:$4 sm:$0xff]  }
 0x637   :  { %v6937_v1 = vpop.f32.mrb[39].mxu1  ;;  %v12701_v49 = vld [vmem:[%s17103_s3 + $0x544] ss:$24 sps:$4 sm:$0xff]  }
 0x638   :  { %8787 = vmatprep.mubr.bf16.mxu1 %v16111_v48  ;;  %8916 = vmatprep.mubr.bf16.mxu0 %v16111_v48  ;;  %v12702_v1 = vld [vmem:[%s17103_s3 + $0x548] ss:$24 sps:$4 sm:$0xff]  }
 0x639   :  { %8788 = vmatmul.mubr.bf16.vlgmr.msra.gmra.mrb[48].mxu1 %v16109_v46  ;;  %8917 = vmatmul.mubr.bf16.vlgmr.msra.gmra.mrb[20].mxu0 %v16109_v46 }
 0x63a   :  { %8799 = vmatpush1.bf16.msra.mxu1 %v12627_v51  ;;  %8928 = vmatpush1.bf16.msra.mxu0 %v12630_v8  ;;  %v12704_v51 = vld [vmem:[%s17103_s3 + $0x54c] ss:$24 sps:$4 sm:$0xff]   ;;  %v12699_v8 = vld [vmem:[%s17103_s3 + $0x540] ss:$24 sps:$4 sm:$0xff]  }
 0x63b   :  { %8800 = vmatprep.subr.bf16.mxu1 %v12635_v17  ;;  %8929 = vmatprep.subr.bf16.mxu0 %v12638_v25  ;;  %v12707_v17 = vld [vmem:[%s17103_s3 + $0x574] ss:$24 sps:$4 sm:$0xff]  }
 0x63c   :  { %v6973_v55 = vpop.f32.mrb[40].mxu1  ;;  %v12710_v25 = vld [vmem:[%s17103_s3 + $0x57c] ss:$24 sps:$4 sm:$0xff]  }
 0x63d   :  { %v16141_v56 = vpack.c.bf16 %v6973_v55, %v6829_v40  ;;  %v6975_v57 = vpop.f32.mrb[41].mxu1  ;;  %v12681_v40 = vld [vmem:[%s17103_s3 + $0x4b0] ss:$24 sps:$4 sm:$0xff]   ;;  %v12711_v55 = vld [vmem:[%s17103_s3 + $0x5a0] ss:$24 sps:$4 sm:$0xff]  }
 0x63e   :  { %v16143_v58 = vpack.c.bf16 %v6975_v57, %v6831_v0  ;;  %8801 = vmatpush1.bf16.msra.mxu1 %v12633_v52  ;;  %8930 = vmatpush1.bf16.msra.mxu0 %v12636_v15  ;;  %v6977_v63 = vpop.f32.mrb[42].mxu1  ;;  %v12684_v0 = vld [vmem:[%s17103_s3 + $0x4b8] ss:$24 sps:$4 sm:$0xff]   ;;  %v12714_v57 = vld [vmem:[%s17103_s3 + $0x5a8] ss:$24 sps:$4 sm:$0xff]  }
 0x63f   :  { %v6978_v59 = vpop.f32.mrb[43].mxu1  ;;  %8802 = vmatprep.subr.bf16.mxu1 %v12641_v53  ;;  %8931 = vmatprep.subr.bf16.mxu0 %v12644_v54  ;;  %v12705_v52 = vld [vmem:[%s17103_s3 + $0x570] ss:$24 sps:$4 sm:$0xff]   ;;  %v12713_v53 = vld [vmem:[%s17103_s3 + $0x5a4] ss:$24 sps:$4 sm:$0xff]  }
 0x640   :  { %8830 = vmatprep.mubr.bf16.mxu1 %v16143_v58  ;;  %8959 = vmatprep.mubr.bf16.mxu0 %v16143_v58  ;;  %v12708_v15 = vld [vmem:[%s17103_s3 + $0x578] ss:$24 sps:$4 sm:$0xff]   ;;  %v12716_v54 = vld [vmem:[%s17103_s3 + $0x5ac] ss:$24 sps:$4 sm:$0xff]  }
 0x641   :  { %v12719_v63 = vld [vmem:[%s17103_s3 + $0x5d4] ss:$24 sps:$4 sm:$0xff]   ;;  %v12720_v59 = vld [vmem:[%s17103_s3 + $0x5d8] ss:$24 sps:$4 sm:$0xff]  }
 0x642   :  { %8803 = vmatpush1.bf16.msra.mxu1 %v12639_v16  ;;  %8932 = vmatpush1.bf16.msra.mxu0 %v12642_v4  ;;  %v12722_v16 = vld [vmem:[%s17103_s3 + $0x5dc] ss:$24 sps:$4 sm:$0xff]   ;;  %v12717_v4 = vld [vmem:[%s17103_s3 + $0x5d0] ss:$24 sps:$4 sm:$0xff]  }
 0x643   :  { %8804 = vmatprep.subr.bf16.mxu1 %v12647_v60  ;;  %8933 = vmatprep.subr.bf16.mxu0 %v12650_v61  ;;  %v12725_v60 = vld [vmem:[%s17103_s3 + $0x604] ss:$24 sps:$4 sm:$0xff]  }
 0x644   :  { %v7014_v6 = vpop.f32.mrb[44].mxu1  ;;  %v12728_v61 = vld [vmem:[%s17103_s3 + $0x60c] ss:$24 sps:$4 sm:$0xff]  }
 0x645   :  { %v16171_v19 = vpack.c.bf16 %v7014_v6, %v6870_v42  ;;  %v7016_v2 = vpop.f32.mrb[45].mxu1  ;;  %v12687_v42 = vld [vmem:[%s17103_s3 + $0x4e0] ss:$24 sps:$4 sm:$0xff]   ;;  %v12729_v6 = vld [vmem:[%s17103_s3 + $0x630] ss:$24 sps:$4 sm:$0xff]  }
 0x646   :  { %v16173_v20 = vpack.c.bf16 %v7016_v2, %v6872_v36  ;;  %8805 = vmatpush1.bf16.msra.mxu1 %v12645_v62  ;;  %8934 = vmatpush1.bf16.msra.mxu0 %v12648_v5  ;;  %v7018_v10 = vpop.f32.mrb[46].mxu1  ;;  %v12690_v36 = vld [vmem:[%s17103_s3 + $0x4e8] ss:$24 sps:$4 sm:$0xff]   ;;  %v12732_v2 = vld [vmem:[%s17103_s3 + $0x638] ss:$24 sps:$4 sm:$0xff]  }
 0x647   :  { %v7019_v14 = vpop.f32.mrb[47].mxu1  ;;  %8806 = vmatprep.subr.bf16.mxu1 %v12653_v12  ;;  %8935 = vmatprep.subr.bf16.mxu0 %v12656_v18  ;;  %v12723_v62 = vld [vmem:[%s17103_s3 + $0x600] ss:$24 sps:$4 sm:$0xff]   ;;  %v12731_v12 = vld [vmem:[%s17103_s3 + $0x634] ss:$24 sps:$4 sm:$0xff]  }
 0x648   :  { %v12726_v5 = vld [vmem:[%s17103_s3 + $0x608] ss:$24 sps:$4 sm:$0xff]   ;;  %v12734_v18 = vld [vmem:[%s17103_s3 + $0x63c] ss:$24 sps:$4 sm:$0xff]  }
 0x649   :  { %v12737_v10 = vld [vmem:[%s17103_s3 + $0x664] ss:$24 sps:$4 sm:$0xff]   ;;  %v12738_v14 = vld [vmem:[%s17103_s3 + $0x668] ss:$24 sps:$4 sm:$0xff]  }
 0x64a   :  { %8807 = vmatpush1.bf16.msra.mxu1 %v12651_v21  ;;  %8936 = vmatpush1.bf16.msra.mxu0 %v12654_v22  ;;  %v12740_v21 = vld [vmem:[%s17103_s3 + $0x66c] ss:$24 sps:$4 sm:$0xff]   ;;  %v12735_v22 = vld [vmem:[%s17103_s3 + $0x660] ss:$24 sps:$4 sm:$0xff]  }
 0x64b   :  { %8808 = vmatprep.subr.bf16.mxu1 %v12659_v23  ;;  %8937 = vmatprep.subr.bf16.mxu0 %v12662_v9  ;;  %v12743_v23 = vld [vmem:[%s17103_s3 + $0x694] ss:$24 sps:$4 sm:$0xff]  }
 0x64c   :  { %v12746_v9 = vld [vmem:[%s17103_s3 + $0x69c] ss:$24 sps:$4 sm:$0xff]  }
 0x64e   :  { %8809 = vmatpush1.bf16.msra.mxu1 %v12657_v50  ;;  %8938 = vmatpush1.bf16.msra.mxu0 %v12660_v24  ;;  %v12741_v50 = vld [vmem:[%s17103_s3 + $0x690] ss:$24 sps:$4 sm:$0xff]  }
 0x64f   :  { %8810 = vmatprep.subr.bf16.mxu1 %v12665_v28  ;;  %8939 = vmatprep.subr.bf16.mxu0 %v12668_v26  ;;  %v12744_v24 = vld [vmem:[%s17103_s3 + $0x698] ss:$24 sps:$4 sm:$0xff]   ;;  %v12749_v28 = vld [vmem:[%s17103_s3 + $0x6c4] ss:$24 sps:$4 sm:$0xff]  }
 0x650   :  { %v12752_v26 = vld [vmem:[%s17103_s3 + $0x6cc] ss:$24 sps:$4 sm:$0xff]  }
 0x652   :  { %8811 = vmatpush1.bf16.msra.mxu1 %v12663_v7  ;;  %8940 = vmatpush1.bf16.msra.mxu0 %v12666_v11  ;;  %v12747_v7 = vld [vmem:[%s17103_s3 + $0x6c0] ss:$24 sps:$4 sm:$0xff]  }
 0x653   :  { %8812 = vmatprep.subr.bf16.mxu1 %v12671_v29  ;;  %8941 = vmatprep.subr.bf16.mxu0 %v12674_v31  ;;  %v12750_v11 = vld [vmem:[%s17103_s3 + $0x6c8] ss:$24 sps:$4 sm:$0xff]   ;;  %v12755_v29 = vld [vmem:[%s17103_s3 + $0x6f4] ss:$24 sps:$4 sm:$0xff]  }
 0x654   :  { %v12758_v31 = vld [vmem:[%s17103_s3 + $0x6fc] ss:$24 sps:$4 sm:$0xff]  }
 0x656   :  { %8813 = vmatpush1.bf16.msra.mxu1 %v12669_v32  ;;  %8942 = vmatpush1.bf16.msra.mxu0 %v12672_v33  ;;  %v12753_v32 = vld [vmem:[%s17103_s3 + $0x6f0] ss:$24 sps:$4 sm:$0xff]  }
 0x657   :  { %8814 = vmatprep.subr.bf16.mxu1 %v12677_v13  ;;  %8943 = vmatprep.subr.bf16.mxu0 %v12680_v35  ;;  %v12756_v33 = vld [vmem:[%s17103_s3 + $0x6f8] ss:$24 sps:$4 sm:$0xff]   ;;  %v12761_v13 = vld [vmem:[%s17103_s3 + $0x724] ss:$24 sps:$4 sm:$0xff]  }
 0x658   :  { %v12764_v35 = vld [vmem:[%s17103_s3 + $0x72c] ss:$24 sps:$4 sm:$0xff]  }
 0x65a   :  { %8815 = vmatpush1.bf16.msra.mxu1 %v12675_v37  ;;  %8944 = vmatpush1.bf16.msra.mxu0 %v12678_v38  ;;  %v12759_v37 = vld [vmem:[%s17103_s3 + $0x720] ss:$24 sps:$4 sm:$0xff]  }
 0x65b   :  { %8816 = vmatprep.subr.bf16.mxu1 %v12683_v27  ;;  %8945 = vmatprep.subr.bf16.mxu0 %v12686_v39  ;;  %v12762_v38 = vld [vmem:[%s17103_s3 + $0x728] ss:$24 sps:$4 sm:$0xff]   ;;  %v12767_v27 = vld [vmem:[%s17103_s3 + $0x754] ss:$24 sps:$4 sm:$0xff]  }
 0x65c   :  { %v12770_v39 = vld [vmem:[%s17103_s3 + $0x75c] ss:$24 sps:$4 sm:$0xff]  }
 0x65e   :  { %8817 = vmatpush1.bf16.msra.mxu1 %v12681_v40  ;;  %8946 = vmatpush1.bf16.msra.mxu0 %v12684_v0  ;;  %v12765_v40 = vld [vmem:[%s17103_s3 + $0x750] ss:$24 sps:$4 sm:$0xff]  }
 0x65f   :  { %8818 = vmatprep.subr.bf16.mxu1 %v12689_v41  ;;  %8947 = vmatprep.subr.bf16.mxu0 %v12692_v3  ;;  %v12768_v0 = vld [vmem:[%s17103_s3 + $0x758] ss:$24 sps:$4 sm:$0xff]   ;;  %v12773_v41 = vld [vmem:[%s17103_s3 + $0x784] ss:$24 sps:$4 sm:$0xff]  }
 0x660   :  { %v12776_v3 = vld [vmem:[%s17103_s3 + $0x78c] ss:$24 sps:$4 sm:$0xff]  }
 0x662   :  { %8819 = vmatpush1.bf16.msra.mxu1 %v12687_v42  ;;  %8948 = vmatpush1.bf16.msra.mxu0 %v12690_v36  ;;  %v12771_v42 = vld [vmem:[%s17103_s3 + $0x780] ss:$24 sps:$4 sm:$0xff]  }
 0x663   :  { %8820 = vmatprep.subr.bf16.mxu1 %v12695_v43  ;;  %8949 = vmatprep.subr.bf16.mxu0 %v12698_v44  ;;  %v12774_v36 = vld [vmem:[%s17103_s3 + $0x788] ss:$24 sps:$4 sm:$0xff]   ;;  %v12779_v43 = vld [vmem:[%s17103_s3 + $0x7b4] ss:$24 sps:$4 sm:$0xff]  }
 0x664   :  { %v12782_v44 = vld [vmem:[%s17103_s3 + $0x7bc] ss:$24 sps:$4 sm:$0xff]  }
 0x666   :  { %8821 = vmatpush1.bf16.msra.mxu1 %v12693_v45  ;;  %8950 = vmatpush1.bf16.msra.mxu0 %v12696_v47  ;;  %v12777_v45 = vld [vmem:[%s17103_s3 + $0x7b0] ss:$24 sps:$4 sm:$0xff]  }
 0x667   :  { %8822 = vmatprep.subr.bf16.mxu1 %v12701_v49  ;;  %8951 = vmatprep.subr.bf16.mxu0 %v12704_v51  ;;  %v12780_v47 = vld [vmem:[%s17103_s3 + $0x7b8] ss:$24 sps:$4 sm:$0xff]   ;;  %v12785_v49 = vld [vmem:[%s17103_s3 + $0x7e4] ss:$24 sps:$4 sm:$0xff]  }
 0x668   :  { %v12788_v51 = vld [vmem:[%s17103_s3 + $0x7ec] ss:$24 sps:$4 sm:$0xff]  }
 0x66a   :  { %8823 = vmatpush1.bf16.msra.mxu1 %v12699_v8  ;;  %8952 = vmatpush1.bf16.msra.mxu0 %v12702_v1  ;;  %v12783_v8 = vld [vmem:[%s17103_s3 + $0x7e0] ss:$24 sps:$4 sm:$0xff]  }
 0x66b   :  { %8824 = vmatprep.subr.bf16.mxu1 %v12707_v17  ;;  %8953 = vmatprep.subr.bf16.mxu0 %v12710_v25  ;;  %v12786_v1 = vld [vmem:[%s17103_s3 + $0x7e8] ss:$24 sps:$4 sm:$0xff]   ;;  %v12791_v17 = vld [vmem:[%s17103_s3 + $0x814] ss:$24 sps:$4 sm:$0xff]  }
 0x66c   :  { %v12794_v25 = vld [vmem:[%s17103_s3 + $0x81c] ss:$24 sps:$4 sm:$0xff]  }
 0x66e   :  { %8825 = vmatpush1.bf16.msra.mxu1 %v12705_v52  ;;  %8954 = vmatpush1.bf16.msra.mxu0 %v12708_v15  ;;  %v12789_v52 = vld [vmem:[%s17103_s3 + $0x810] ss:$24 sps:$4 sm:$0xff]  }
 0x66f   :  { %8826 = vmatprep.subr.bf16.mxu1 %v12713_v53  ;;  %8955 = vmatprep.subr.bf16.mxu0 %v12716_v54  ;;  %v12792_v15 = vld [vmem:[%s17103_s3 + $0x818] ss:$24 sps:$4 sm:$0xff]   ;;  %v12797_v53 = vld [vmem:[%s17103_s3 + $0x844] ss:$24 sps:$4 sm:$0xff]  }
 0x670   :  { %v12800_v54 = vld [vmem:[%s17103_s3 + $0x84c] ss:$24 sps:$4 sm:$0xff]  }
 0x672   :  { %8827 = vmatpush1.bf16.msra.mxu1 %v12711_v55  ;;  %8956 = vmatpush1.bf16.msra.mxu0 %v12714_v57  ;;  %v12795_v55 = vld [vmem:[%s17103_s3 + $0x840] ss:$24 sps:$4 sm:$0xff]  }
 0x673   :  { %8828 = vmatprep.subr.bf16.mxu1 %v12719_v63  ;;  %8957 = vmatprep.subr.bf16.mxu0 %v12722_v16  ;;  %v12798_v57 = vld [vmem:[%s17103_s3 + $0x848] ss:$24 sps:$4 sm:$0xff]   ;;  %v12803_v63 = vld [vmem:[%s17103_s3 + $0x874] ss:$24 sps:$4 sm:$0xff]  }
 0x674   :  { %v12806_v16 = vld [vmem:[%s17103_s3 + $0x87c] ss:$24 sps:$4 sm:$0xff]  }
 0x676   :  { %8829 = vmatpush1.bf16.msra.mxu1 %v12717_v4  ;;  %8958 = vmatpush1.bf16.msra.mxu0 %v12720_v59  ;;  %v12801_v4 = vld [vmem:[%s17103_s3 + $0x870] ss:$24 sps:$4 sm:$0xff]  }
 0x677   :  { %8841 = vmatprep.subr.bf16.mxu1 %v12725_v60  ;;  %8970 = vmatprep.subr.bf16.mxu0 %v12728_v61  ;;  %v12804_v59 = vld [vmem:[%s17103_s3 + $0x878] ss:$24 sps:$4 sm:$0xff]   ;;  %v12809_v60 = vld [vmem:[%s17103_s3 + $0x8a4] ss:$24 sps:$4 sm:$0xff]  }
 0x678   :  { %v12812_v61 = vld [vmem:[%s17103_s3 + $0x8ac] ss:$24 sps:$4 sm:$0xff]  }
 0x679   :  { %8831 = vmatmul.mubr.bf16.vlgmr.msra.gmra.mrb[48].mxu1 %v16141_v56  ;;  %8960 = vmatmul.mubr.bf16.vlgmr.msra.gmra.mrb[20].mxu0 %v16141_v56 }
 0x67a   :  { %8842 = vmatpush1.bf16.msra.mxu1 %v12723_v62  ;;  %8873 = vmatprep.mubr.bf16.mxu1 %v16173_v20  ;;  %v12807_v62 = vld [vmem:[%s17103_s3 + $0x8a0] ss:$24 sps:$4 sm:$0xff]  }
 0x67b   :  { %8971 = vmatpush1.bf16.msra.mxu0 %v12726_v5  ;;  %9002 = vmatprep.mubr.bf16.mxu0 %v16173_v20  ;;  %v12810_v5 = vld [vmem:[%s17103_s3 + $0x8a8] ss:$24 sps:$4 sm:$0xff]  }
 0x67c   :  { %8843 = vmatprep.subr.bf16.mxu1 %v12731_v12  ;;  %8972 = vmatprep.subr.bf16.mxu0 %v12734_v18  ;;  %v12815_v12 = vld [vmem:[%s17103_s3 + $0x8d4] ss:$24 sps:$4 sm:$0xff]  }
 0x67d   :  { %v12818_v18 = vld [vmem:[%s17103_s3 + $0x8dc] ss:$24 sps:$4 sm:$0xff]  }
 0x67e   :  { %8844 = vmatpush1.bf16.msra.mxu1 %v12729_v6  ;;  %v12813_v6 = vld [vmem:[%s17103_s3 + $0x8d0] ss:$24 sps:$4 sm:$0xff]  }
 0x67f   :  { %8973 = vmatpush1.bf16.msra.mxu0 %v12732_v2  ;;  %8845 = vmatprep.subr.bf16.mxu1 %v12737_v10  ;;  %v12816_v2 = vld [vmem:[%s17103_s3 + $0x8d8] ss:$24 sps:$4 sm:$0xff]   ;;  %v12821_v10 = vld [vmem:[%s17103_s3 + $0x14] ss:$24 sps:$4 sm:$0xff]  }
 0x680   :  { %8974 = vmatprep.subr.bf16.mxu0 %v12740_v21  ;;  %v12819_v21 = vld [vmem:[%s17103_s3 + $0x10] ss:$24 sps:$4 sm:$0xff]  }
 0x682   :  { %8846 = vmatpush1.bf16.msra.mxu1 %v12735_v22  ;;  %v12824_v22 = vld [vmem:[%s17103_s3 + $0x44] ss:$24 sps:$4 sm:$0xff]  }
 0x683   :  { %8975 = vmatpush1.bf16.msra.mxu0 %v12738_v14  ;;  %8847 = vmatprep.subr.bf16.mxu1 %v12743_v23  ;;  %v12822_v14 = vld [vmem:[%s17103_s3 + $0x40] ss:$24 sps:$4 sm:$0xff]   ;;  %v12827_v23 = vld [vmem:[%s17103_s3 + $0x74] ss:$24 sps:$4 sm:$0xff]  }
 0x684   :  { %8976 = vmatprep.subr.bf16.mxu0 %v12746_v9  ;;  %v12825_v9 = vld [vmem:[%s17103_s3 + $0x70] ss:$24 sps:$4 sm:$0xff]  }
 0x686   :  { %8848 = vmatpush1.bf16.msra.mxu1 %v12741_v50  ;;  %v12830_v50 = vld [vmem:[%s17103_s3 + $0xa4] ss:$24 sps:$4 sm:$0xff]  }
 0x687   :  { %8977 = vmatpush1.bf16.msra.mxu0 %v12744_v24  ;;  %8849 = vmatprep.subr.bf16.mxu1 %v12749_v28  ;;  %v12833_v24 = vld [vmem:[%s17103_s3 + $0xd4] ss:$24 sps:$4 sm:$0xff]   ;;  %v12831_v28 = vld [vmem:[%s17103_s3 + $0xd0] ss:$24 sps:$4 sm:$0xff]  }
 0x688   :  { %8978 = vmatprep.subr.bf16.mxu0 %v12752_v26  ;;  %v12836_v26 = vld [vmem:[%s17103_s3 + $0x104] ss:$24 sps:$4 sm:$0xff]  }
 0x68a   :  { %8850 = vmatpush1.bf16.msra.mxu1 %v12747_v7  ;;  %v12834_v7 = vld [vmem:[%s17103_s3 + $0x100] ss:$24 sps:$4 sm:$0xff]  }
 0x68b   :  { %8979 = vmatpush1.bf16.msra.mxu0 %v12750_v11  ;;  %8851 = vmatprep.subr.bf16.mxu1 %v12755_v29  ;;  %v12839_v11 = vld [vmem:[%s17103_s3 + $0x134] ss:$24 sps:$4 sm:$0xff]   ;;  %v12837_v29 = vld [vmem:[%s17103_s3 + $0x130] ss:$24 sps:$4 sm:$0xff]  }
 0x68c   :  { %8980 = vmatprep.subr.bf16.mxu0 %v12758_v31  ;;  %v12842_v31 = vld [vmem:[%s17103_s3 + $0x164] ss:$24 sps:$4 sm:$0xff]  }
 0x68e   :  { %8852 = vmatpush1.bf16.msra.mxu1 %v12753_v32  ;;  %v12840_v32 = vld [vmem:[%s17103_s3 + $0x160] ss:$24 sps:$4 sm:$0xff]  }
 0x68f   :  { %8981 = vmatpush1.bf16.msra.mxu0 %v12756_v33  ;;  %8853 = vmatprep.subr.bf16.mxu1 %v12761_v13  ;;  %v12845_v33 = vld [vmem:[%s17103_s3 + $0x194] ss:$24 sps:$4 sm:$0xff]   ;;  %v12843_v13 = vld [vmem:[%s17103_s3 + $0x190] ss:$24 sps:$4 sm:$0xff]  }
 0x690   :  { %8982 = vmatprep.subr.bf16.mxu0 %v12764_v35  ;;  %v12848_v35 = vld [vmem:[%s17103_s3 + $0x1c4] ss:$24 sps:$4 sm:$0xff]  }
 0x692   :  { %8854 = vmatpush1.bf16.msra.mxu1 %v12759_v37  ;;  %v12846_v37 = vld [vmem:[%s17103_s3 + $0x1c0] ss:$24 sps:$4 sm:$0xff]  }
 0x693   :  { %8983 = vmatpush1.bf16.msra.mxu0 %v12762_v38  ;;  %8855 = vmatprep.subr.bf16.mxu1 %v12767_v27  ;;  %v12851_v38 = vld [vmem:[%s17103_s3 + $0x1f4] ss:$24 sps:$4 sm:$0xff]   ;;  %v12849_v27 = vld [vmem:[%s17103_s3 + $0x1f0] ss:$24 sps:$4 sm:$0xff]  }
 0x694   :  { %8984 = vmatprep.subr.bf16.mxu0 %v12770_v39  ;;  %v12854_v39 = vld [vmem:[%s17103_s3 + $0x224] ss:$24 sps:$4 sm:$0xff]  }
 0x696   :  { %8856 = vmatpush1.bf16.msra.mxu1 %v12765_v40  ;;  %v12852_v40 = vld [vmem:[%s17103_s3 + $0x220] ss:$24 sps:$4 sm:$0xff]  }
 0x697   :  { %8985 = vmatpush1.bf16.msra.mxu0 %v12768_v0  ;;  %8857 = vmatprep.subr.bf16.mxu1 %v12773_v41  ;;  %v12857_v0 = vld [vmem:[%s17103_s3 + $0x254] ss:$24 sps:$4 sm:$0xff]   ;;  %v12855_v41 = vld [vmem:[%s17103_s3 + $0x250] ss:$24 sps:$4 sm:$0xff]  }
 0x698   :  { %8986 = vmatprep.subr.bf16.mxu0 %v12776_v3  ;;  %v12860_v3 = vld [vmem:[%s17103_s3 + $0x284] ss:$24 sps:$4 sm:$0xff]  }
 0x69a   :  { %8858 = vmatpush1.bf16.msra.mxu1 %v12771_v42  ;;  %v12858_v42 = vld [vmem:[%s17103_s3 + $0x280] ss:$24 sps:$4 sm:$0xff]  }
 0x69b   :  { %8987 = vmatpush1.bf16.msra.mxu0 %v12774_v36  ;;  %8859 = vmatprep.subr.bf16.mxu1 %v12779_v43  ;;  %v12863_v36 = vld [vmem:[%s17103_s3 + $0x2b4] ss:$24 sps:$4 sm:$0xff]   ;;  %v12861_v43 = vld [vmem:[%s17103_s3 + $0x2b0] ss:$24 sps:$4 sm:$0xff]  }
 0x69c   :  { %8988 = vmatprep.subr.bf16.mxu0 %v12782_v44  ;;  %v12866_v44 = vld [vmem:[%s17103_s3 + $0x2e4] ss:$24 sps:$4 sm:$0xff]  }
 0x69e   :  { %8860 = vmatpush1.bf16.msra.mxu1 %v12777_v45  ;;  %v12864_v45 = vld [vmem:[%s17103_s3 + $0x2e0] ss:$24 sps:$4 sm:$0xff]  }
 0x69f   :  { %8989 = vmatpush1.bf16.msra.mxu0 %v12780_v47  ;;  %8861 = vmatprep.subr.bf16.mxu1 %v12785_v49  ;;  %v12869_v47 = vld [vmem:[%s17103_s3 + $0x314] ss:$24 sps:$4 sm:$0xff]   ;;  %v12867_v49 = vld [vmem:[%s17103_s3 + $0x310] ss:$24 sps:$4 sm:$0xff]  }
 0x6a0   :  { %8990 = vmatprep.subr.bf16.mxu0 %v12788_v51  ;;  %v12872_v51 = vld [vmem:[%s17103_s3 + $0x344] ss:$24 sps:$4 sm:$0xff]  }
 0x6a2   :  { %8862 = vmatpush1.bf16.msra.mxu1 %v12783_v8  ;;  %v12870_v8 = vld [vmem:[%s17103_s3 + $0x340] ss:$24 sps:$4 sm:$0xff]  }
 0x6a3   :  { %8991 = vmatpush1.bf16.msra.mxu0 %v12786_v1  ;;  %8863 = vmatprep.subr.bf16.mxu1 %v12791_v17  ;;  %v12875_v1 = vld [vmem:[%s17103_s3 + $0x374] ss:$24 sps:$4 sm:$0xff]   ;;  %v12873_v17 = vld [vmem:[%s17103_s3 + $0x370] ss:$24 sps:$4 sm:$0xff]  }
 0x6a4   :  { %8992 = vmatprep.subr.bf16.mxu0 %v12794_v25  ;;  %v12881_v25 = vld [vmem:[%s17103_s3 + $0x3d4] ss:$24 sps:$4 sm:$0xff]  }
 0x6a6   :  { %8864 = vmatpush1.bf16.msra.mxu1 %v12789_v52  ;;  %v12879_v52 = vld [vmem:[%s17103_s3 + $0x3d0] ss:$24 sps:$4 sm:$0xff]  }
 0x6a7   :  { %8993 = vmatpush1.bf16.msra.mxu0 %v12792_v15  ;;  %8865 = vmatprep.subr.bf16.mxu1 %v12797_v53  ;;  %v12884_v15 = vld [vmem:[%s17103_s3 + $0x404] ss:$24 sps:$4 sm:$0xff]   ;;  %v12882_v53 = vld [vmem:[%s17103_s3 + $0x400] ss:$24 sps:$4 sm:$0xff]  }
 0x6a8   :  { %8994 = vmatprep.subr.bf16.mxu0 %v12800_v54  ;;  %v12887_v54 = vld [vmem:[%s17103_s3 + $0x434] ss:$24 sps:$4 sm:$0xff]  }
 0x6aa   :  { %8866 = vmatpush1.bf16.msra.mxu1 %v12795_v55  ;;  %v12885_v55 = vld [vmem:[%s17103_s3 + $0x430] ss:$24 sps:$4 sm:$0xff]  }
 0x6ab   :  { %8995 = vmatpush1.bf16.msra.mxu0 %v12798_v57  ;;  %8867 = vmatprep.subr.bf16.mxu1 %v12803_v63  ;;  %v12890_v57 = vld [vmem:[%s17103_s3 + $0x464] ss:$24 sps:$4 sm:$0xff]   ;;  %v12888_v63 = vld [vmem:[%s17103_s3 + $0x460] ss:$24 sps:$4 sm:$0xff]  }
 0x6ac   :  { %8996 = vmatprep.subr.bf16.mxu0 %v12806_v16  ;;  %v12893_v16 = vld [vmem:[%s17103_s3 + $0x494] ss:$24 sps:$4 sm:$0xff]  }
 0x6ae   :  { %8868 = vmatpush1.bf16.msra.mxu1 %v12801_v4  ;;  %v12891_v4 = vld [vmem:[%s17103_s3 + $0x490] ss:$24 sps:$4 sm:$0xff]  }
 0x6af   :  { %8997 = vmatpush1.bf16.msra.mxu0 %v12804_v59  ;;  %8869 = vmatprep.subr.bf16.mxu1 %v12809_v60  ;;  %v12896_v59 = vld [vmem:[%s17103_s3 + $0x4c4] ss:$24 sps:$4 sm:$0xff]   ;;  %v12894_v60 = vld [vmem:[%s17103_s3 + $0x4c0] ss:$24 sps:$4 sm:$0xff]  }
 0x6b0   :  { %8998 = vmatprep.subr.bf16.mxu0 %v12812_v61  ;;  %v12899_v61 = vld [vmem:[%s17103_s3 + $0x4f4] ss:$24 sps:$4 sm:$0xff]  }
 0x6b2   :  { %8870 = vmatpush1.bf16.msra.mxu1 %v12807_v62  ;;  %v12897_v62 = vld [vmem:[%s17103_s3 + $0x4f0] ss:$24 sps:$4 sm:$0xff]  }
 0x6b3   :  { %8999 = vmatpush1.bf16.msra.mxu0 %v12810_v5  ;;  %8871 = vmatprep.subr.bf16.mxu1 %v12815_v12  ;;  %v12902_v5 = vld [vmem:[%s17103_s3 + $0x524] ss:$24 sps:$4 sm:$0xff]   ;;  %v12900_v12 = vld [vmem:[%s17103_s3 + $0x520] ss:$24 sps:$4 sm:$0xff]  }
 0x6b4   :  { %9000 = vmatprep.subr.bf16.mxu0 %v12818_v18  ;;  %v12905_v18 = vld [vmem:[%s17103_s3 + $0x554] ss:$24 sps:$4 sm:$0xff]  }
 0x6b6   :  { %8872 = vmatpush1.bf16.msra.mxu1 %v12813_v6  ;;  %v12903_v6 = vld [vmem:[%s17103_s3 + $0x550] ss:$24 sps:$4 sm:$0xff]  }
 0x6b7   :  { %9001 = vmatpush1.bf16.msra.mxu0 %v12816_v2  ;;  %9013 = vmatprep.subr.bf16.mxu1 %v12821_v10  ;;  %v12908_v2 = vld [vmem:[%s17103_s3 + $0x584] ss:$24 sps:$4 sm:$0xff]   ;;  %v12906_v10 = vld [vmem:[%s17103_s3 + $0x580] ss:$24 sps:$4 sm:$0xff]  }
 0x6b9   :  { %8874 = vmatmul.mubr.bf16.vlgmr.msra.gmra.mrb[48].mxu1 %v16171_v19 }
 0x6ba   :  { %9003 = vmatmul.mubr.bf16.vlgmr.msra.gmra.mrb[20].mxu0 %v16171_v19  ;;  %9014 = vmatpush1.bf16.msra.mxu1 %v12819_v21  ;;  %v12911_v21 = vld [vmem:[%s17103_s3 + $0x5b4] ss:$24 sps:$4 sm:$0xff]  }
 0x6bb   :  { %9045 = vmatprep.mubr.bf16.mxu1 %v16111_v48  ;;  %9015 = vmatprep.subr.bf16.mxu1 %v12824_v22  ;;  %v12828_v48 = vld [vmem:[%s17103_s3 + $0xa0] ss:$24 sps:$4 sm:$0xff]   ;;  %v12909_v22 = vld [vmem:[%s17103_s3 + $0x5b0] ss:$24 sps:$4 sm:$0xff]  }
 0x6be   :  { %9016 = vmatpush1.bf16.msra.mxu1 %v12822_v14  ;;  %v12914_v14 = vld [vmem:[%s17103_s3 + $0x5e4] ss:$24 sps:$4 sm:$0xff]  }
 0x6bf   :  { %9017 = vmatprep.subr.bf16.mxu1 %v12827_v23  ;;  %v12912_v23 = vld [vmem:[%s17103_s3 + $0x5e0] ss:$24 sps:$4 sm:$0xff]  }
 0x6c2   :  { %9018 = vmatpush1.bf16.msra.mxu1 %v12825_v9  ;;  %v12917_v9 = vld [vmem:[%s17103_s3 + $0x614] ss:$24 sps:$4 sm:$0xff]  }
 0x6c3   :  { %9019 = vmatprep.subr.bf16.mxu1 %v12830_v50  ;;  %v12915_v50 = vld [vmem:[%s17103_s3 + $0x610] ss:$24 sps:$4 sm:$0xff]  }
 0x6c6   :  { %9020 = vmatpush1.bf16.msra.mxu1 %v12828_v48  ;;  %v12920_v48 = vld [vmem:[%s17103_s3 + $0x644] ss:$24 sps:$4 sm:$0xff]  }
 0x6c7   :  { %9021 = vmatprep.subr.bf16.mxu1 %v12833_v24  ;;  %v12918_v24 = vld [vmem:[%s17103_s3 + $0x640] ss:$24 sps:$4 sm:$0xff]  }
 0x6ca   :  { %9022 = vmatpush1.bf16.msra.mxu1 %v12831_v28  ;;  %v12923_v28 = vld [vmem:[%s17103_s3 + $0x674] ss:$24 sps:$4 sm:$0xff]  }
 0x6cb   :  { %9023 = vmatprep.subr.bf16.mxu1 %v12836_v26  ;;  %v12921_v26 = vld [vmem:[%s17103_s3 + $0x670] ss:$24 sps:$4 sm:$0xff]  }
 0x6ce   :  { %9024 = vmatpush1.bf16.msra.mxu1 %v12834_v7  ;;  %v12929_v7 = vld [vmem:[%s17103_s3 + $0x6d4] ss:$24 sps:$4 sm:$0xff]  }
 0x6cf   :  { %9025 = vmatprep.subr.bf16.mxu1 %v12839_v11  ;;  %v12927_v11 = vld [vmem:[%s17103_s3 + $0x6d0] ss:$24 sps:$4 sm:$0xff]  }
 0x6d2   :  { %9026 = vmatpush1.bf16.msra.mxu1 %v12837_v29  ;;  %v12932_v29 = vld [vmem:[%s17103_s3 + $0x704] ss:$24 sps:$4 sm:$0xff]  }
 0x6d3   :  { %9027 = vmatprep.subr.bf16.mxu1 %v12842_v31  ;;  %v12930_v31 = vld [vmem:[%s17103_s3 + $0x700] ss:$24 sps:$4 sm:$0xff]  }
 0x6d6   :  { %9028 = vmatpush1.bf16.msra.mxu1 %v12840_v32  ;;  %v12935_v32 = vld [vmem:[%s17103_s3 + $0x734] ss:$24 sps:$4 sm:$0xff]  }
 0x6d7   :  { %9029 = vmatprep.subr.bf16.mxu1 %v12845_v33  ;;  %v12933_v33 = vld [vmem:[%s17103_s3 + $0x730] ss:$24 sps:$4 sm:$0xff]  }
 0x6da   :  { %9030 = vmatpush1.bf16.msra.mxu1 %v12843_v13  ;;  %v12938_v13 = vld [vmem:[%s17103_s3 + $0x764] ss:$24 sps:$4 sm:$0xff]  }
 0x6db   :  { %9031 = vmatprep.subr.bf16.mxu1 %v12848_v35  ;;  %v12936_v35 = vld [vmem:[%s17103_s3 + $0x760] ss:$24 sps:$4 sm:$0xff]  }
 0x6de   :  { %9032 = vmatpush1.bf16.msra.mxu1 %v12846_v37  ;;  %v12941_v37 = vld [vmem:[%s17103_s3 + $0x794] ss:$24 sps:$4 sm:$0xff]  }
 0x6df   :  { %9033 = vmatprep.subr.bf16.mxu1 %v12851_v38  ;;  %v12939_v38 = vld [vmem:[%s17103_s3 + $0x790] ss:$24 sps:$4 sm:$0xff]  }
 0x6e2   :  { %9034 = vmatpush1.bf16.msra.mxu1 %v12849_v27  ;;  %v12944_v27 = vld [vmem:[%s17103_s3 + $0x7c4] ss:$24 sps:$4 sm:$0xff]  }
 0x6e3   :  { %9035 = vmatprep.subr.bf16.mxu1 %v12854_v39  ;;  %v12942_v39 = vld [vmem:[%s17103_s3 + $0x7c0] ss:$24 sps:$4 sm:$0xff]  }
 0x6e6   :  { %9036 = vmatpush1.bf16.msra.mxu1 %v12852_v40  ;;  %v12947_v40 = vld [vmem:[%s17103_s3 + $0x7f4] ss:$24 sps:$4 sm:$0xff]  }
 0x6e7   :  { %9037 = vmatprep.subr.bf16.mxu1 %v12857_v0  ;;  %v12945_v0 = vld [vmem:[%s17103_s3 + $0x7f0] ss:$24 sps:$4 sm:$0xff]  }
 0x6ea   :  { %9038 = vmatpush1.bf16.msra.mxu1 %v12855_v41  ;;  %v12950_v41 = vld [vmem:[%s17103_s3 + $0x824] ss:$24 sps:$4 sm:$0xff]  }
 0x6eb   :  { %9039 = vmatprep.subr.bf16.mxu1 %v12860_v3  ;;  %v12948_v3 = vld [vmem:[%s17103_s3 + $0x820] ss:$24 sps:$4 sm:$0xff]  }
 0x6ee   :  { %9040 = vmatpush1.bf16.msra.mxu1 %v12858_v42  ;;  %v12953_v42 = vld [vmem:[%s17103_s3 + $0x854] ss:$24 sps:$4 sm:$0xff]  }
 0x6ef   :  { %9041 = vmatprep.subr.bf16.mxu1 %v12863_v36  ;;  %v12951_v36 = vld [vmem:[%s17103_s3 + $0x850] ss:$24 sps:$4 sm:$0xff]  }
 0x6f2   :  { %9042 = vmatpush1.bf16.msra.mxu1 %v12861_v43  ;;  %v12956_v43 = vld [vmem:[%s17103_s3 + $0x884] ss:$24 sps:$4 sm:$0xff]  }
 0x6f3   :  { %9043 = vmatprep.subr.bf16.mxu1 %v12866_v44  ;;  %v12954_v44 = vld [vmem:[%s17103_s3 + $0x880] ss:$24 sps:$4 sm:$0xff]  }
 0x6f6   :  { %9044 = vmatpush1.bf16.msra.mxu1 %v12864_v45  ;;  %v12959_v45 = vld [vmem:[%s17103_s3 + $0x8b4] ss:$24 sps:$4 sm:$0xff]  }
 0x6f7   :  { %9056 = vmatprep.subr.bf16.mxu1 %v12869_v47  ;;  %v12957_v47 = vld [vmem:[%s17103_s3 + $0x8b0] ss:$24 sps:$4 sm:$0xff]  }
 0x6f9   :  { %9046 = vmatmul.mubr.bf16.vlgmr.msra.gmra.mrb[52].mxu1 %v16109_v46  ;;  %v12878_v46 = vld [vmem:[%s17103_s3 + $0x3a4] ss:$24 sps:$4 sm:$0xff]  }
 0x6fa   :  { %9057 = vmatpush1.bf16.msra.mxu1 %v12867_v49  ;;  %9088 = vmatprep.mubr.bf16.mxu1 %v16143_v58  ;;  %v12876_v58 = vld [vmem:[%s17103_s3 + $0x3a0] ss:$24 sps:$4 sm:$0xff]   ;;  %v12962_v49 = vld [vmem:[%s17103_s3 + $0x8e4] ss:$24 sps:$4 sm:$0xff]  }
 0x6fb   :  { %9058 = vmatprep.subr.bf16.mxu1 %v12872_v51  ;;  %v12960_v51 = vld [vmem:[%s17103_s3 + $0x8e0] ss:$24 sps:$4 sm:$0xff]  }
 0x6fe   :  { %9059 = vmatpush1.bf16.msra.mxu1 %v12870_v8 }
 0x6ff   :  { %9060 = vmatprep.subr.bf16.mxu1 %v12875_v1 }
 0x702   :  { %9061 = vmatpush1.bf16.msra.mxu1 %v12873_v17 }
 0x703   :  { %9062 = vmatprep.subr.bf16.mxu1 %v12878_v46 }
 0x706   :  { %9063 = vmatpush1.bf16.msra.mxu1 %v12876_v58 }
 0x707   :  { %9064 = vmatprep.subr.bf16.mxu1 %v12881_v25 }
 0x70a   :  { %9065 = vmatpush1.bf16.msra.mxu1 %v12879_v52 }
 0x70b   :  { %9066 = vmatprep.subr.bf16.mxu1 %v12884_v15 }
 0x70e   :  { %9067 = vmatpush1.bf16.msra.mxu1 %v12882_v53  ;;  %v13023_v53 = vld [vmem:[%s17101_s0] sm:$0xff] }
 0x70f   :  { %9068 = vmatprep.subr.bf16.mxu1 %v12887_v54 }
 0x712   :  { %9069 = vmatpush1.bf16.msra.mxu1 %v12885_v55  ;;  %v13024_v55 = vld [vmem:[%s17101_s0 + $0x8] sm:$0xff] }
 0x713   :  { %9070 = vmatprep.subr.bf16.mxu1 %v12890_v57 }
 0x716   :  { %9071 = vmatpush1.bf16.msra.mxu1 %v12888_v63 }
 0x717   :  { %9072 = vmatprep.subr.bf16.mxu1 %v12893_v16  ;;  %v13026_v16 = vld [vmem:[%s17101_s0 + $0x38] sm:$0xff] }
 0x71a   :  { %9073 = vmatpush1.bf16.msra.mxu1 %v12891_v4 }
 0x71b   :  { %9074 = vmatprep.subr.bf16.mxu1 %v12896_v59 }
 0x71e   :  { %9075 = vmatpush1.bf16.msra.mxu1 %v12894_v60  ;;  %v13027_v60 = vld [vmem:[%s17101_s0 + $0x10] sm:$0xff] }
 0x71f   :  { %9076 = vmatprep.subr.bf16.mxu1 %v12899_v61 }
 0x722   :  { %9077 = vmatpush1.bf16.msra.mxu1 %v12897_v62 }
 0x723   :  { %9078 = vmatprep.subr.bf16.mxu1 %v12902_v5 }
 0x726   :  { %9079 = vmatpush1.bf16.msra.mxu1 %v12900_v12  ;;  %v13028_v12 = vld [vmem:[%s17101_s0 + $0x40] sm:$0xff] }
 0x727   :  { %9080 = vmatprep.subr.bf16.mxu1 %v12905_v18 }
 0x72a   :  { %9081 = vmatpush1.bf16.msra.mxu1 %v12903_v6  ;;  %v13029_v6 = vld [vmem:[%s17101_s0 + $0x18] sm:$0xff] }
 0x72b   :  { %9082 = vmatprep.subr.bf16.mxu1 %v12908_v2 }
 0x72e   :  { %9083 = vmatpush1.bf16.msra.mxu1 %v12906_v10 }
 0x72f   :  { %9084 = vmatprep.subr.bf16.mxu1 %v12911_v21 }
 0x732   :  { %9085 = vmatpush1.bf16.msra.mxu1 %v12909_v22 }
 0x733   :  { %9086 = vmatprep.subr.bf16.mxu1 %v12914_v14  ;;  %v13030_v14 = vld [vmem:[%s17101_s0 + $0x48] sm:$0xff] }
 0x736   :  { %9087 = vmatpush1.bf16.msra.mxu1 %v12912_v23 }
 0x737   :  { %9099 = vmatprep.subr.bf16.mxu1 %v12917_v9  ;;  %v13031_v9 = vld [vmem:[%s17101_s0 + $0x20] sm:$0xff] }
 0x739   :  { %9089 = vmatmul.mubr.bf16.vlgmr.msra.gmra.mrb[52].mxu1 %v16141_v56  ;;  %v12926_v56 = vld [vmem:[%s17103_s3 + $0x6a4] ss:$24 sps:$4 sm:$0xff]  }
 0x73a   :  { %9100 = vmatpush1.bf16.msra.mxu1 %v12915_v50  ;;  %9131 = vmatprep.mubr.bf16.mxu1 %v16173_v20  ;;  %v12924_v20 = vld [vmem:[%s17103_s3 + $0x6a0] ss:$24 sps:$4 sm:$0xff]  }
 0x73b   :  { %9101 = vmatprep.subr.bf16.mxu1 %v12920_v48 }
 0x73e   :  { %9102 = vmatpush1.bf16.msra.mxu1 %v12918_v24  ;;  %v13032_v24 = vld [vmem:[%s17101_s0 + $0x28] sm:$0xff] }
 0x73f   :  { %9103 = vmatprep.subr.bf16.mxu1 %v12923_v28 }
 0x742   :  { %9104 = vmatpush1.bf16.msra.mxu1 %v12921_v26 }
 0x743   :  { %9105 = vmatprep.subr.bf16.mxu1 %v12926_v56 }
 0x746   :  { %9106 = vmatpush1.bf16.msra.mxu1 %v12924_v20 }
 0x747   :  { %9107 = vmatprep.subr.bf16.mxu1 %v12929_v7  ;;  %v13033_v7 = vld [vmem:[%s17101_s0 + $0x50] sm:$0xff] }
 0x74a   :  { %9108 = vmatpush1.bf16.msra.mxu1 %v12927_v11 }
 0x74b   :  { %9109 = vmatprep.subr.bf16.mxu1 %v12932_v29 }
 0x74e   :  { %9110 = vmatpush1.bf16.msra.mxu1 %v12930_v31  ;;  %v13034_v31 = vld [vmem:[%s17101_s0 + $0x58] sm:$0xff] }
 0x74f   :  { %9111 = vmatprep.subr.bf16.mxu1 %v12935_v32 }
 0x752   :  { %9112 = vmatpush1.bf16.msra.mxu1 %v12933_v33 }
 0x753   :  { %9113 = vmatprep.subr.bf16.mxu1 %v12938_v13 }
 0x756   :  { %9114 = vmatpush1.bf16.msra.mxu1 %v12936_v35 }
 0x757   :  { %9115 = vmatprep.subr.bf16.mxu1 %v12941_v37  ;;  %v12963_v37 = vld [vmem:[%s17104_s6 + $0x40] sm:$0xff]  }
 0x758   :  { %11055 = vmatprep.subr.bf16.mxu0 %v12963_v37  ;;  %v16944_v37 = vld [vmem:[%s17105_s4] sm:$0x3f] }
 0x75a   :  { %9116 = vmatpush1.bf16.msra.mxu1 %v12939_v38  ;;  %v12964_v38 = vld [vmem:[%s17104_s6] sm:$0xff]  }
 0x75b   :  { %9117 = vmatprep.subr.bf16.mxu1 %v12944_v27  ;;  %v12965_v27 = vld [vmem:[%s17104_s6 + $0x48] sm:$0xff]   ;;  %11056 = vmatpush3.bf16.msra.mxu0 %v12964_v38  ;;  %v9243_v38 = vsub.s32 3, %v15857_v30 }
 0x75c   :  { %11057 = vmatprep.subr.bf16.mxu0 %v12965_v27  ;;  %v9247_v27 = vsub.s32 4, %v15857_v30 }
 0x75e   :  { %9118 = vmatpush1.bf16.msra.mxu1 %v12942_v39  ;;  %v12966_v39 = vld [vmem:[%s17104_s6 + $0x8] sm:$0xff]  }
 0x75f   :  { %9119 = vmatprep.subr.bf16.mxu1 %v12947_v40  ;;  %11058 = vmatpush3.bf16.msra.mxu0 %v12966_v39 }
 0x762   :  { %9120 = vmatpush1.bf16.msra.mxu1 %v12945_v0 }
 0x763   :  { %9121 = vmatprep.subr.bf16.mxu1 %v12950_v41 }
 0x766   :  { %9122 = vmatpush1.bf16.msra.mxu1 %v12948_v3 }
 0x767   :  { %9123 = vmatprep.subr.bf16.mxu1 %v12953_v42 }
 0x76a   :  { %9124 = vmatpush1.bf16.msra.mxu1 %v12951_v36 }
 0x76b   :  { %9125 = vmatprep.subr.bf16.mxu1 %v12956_v43 }
 0x76e   :  { %9126 = vmatpush1.bf16.msra.mxu1 %v12954_v44 }
 0x76f   :  { %9127 = vmatprep.subr.bf16.mxu1 %v12959_v45 }
 0x772   :  { %9128 = vmatpush1.bf16.msra.mxu1 %v12957_v47 }
 0x773   :  { %9129 = vmatprep.subr.bf16.mxu1 %v12962_v49 }
 0x776   :  { %9130 = vmatpush1.bf16.msra.mxu1 %v12960_v51 }
 0x779   :  { %9132 = vmatmul.mubr.bf16.vlgmr.msra.gmra.mrb[52].mxu1 %v16171_v19  ;;  %v13025_v19 = vld [vmem:[%s17101_s0 + $0x30] sm:$0xff] }
 0x78c   :  { %v8875_v8 = vpop.f32.mrb[48].mxu1 }
 0x78d   :  { %v9004_v1 = vpop.f32.mrb[20].mxu0  ;;  %v8877_v17 = vpop.f32.mrb[49].mxu1  ;;  %v9142_v54 = vadd.f32 %v13023_v53, %v8875_v8 }
 0x78e   :  { %v9006_v46 = vpop.f32.mrb[21].mxu0  ;;  %v8879_v58 = vpop.f32.mrb[50].mxu1  ;;  %v9143_v57 = vadd.f32 %v13024_v55, %v8877_v17  ;;  %v9144_v61 = vadd.f32 %v13027_v60, %v9004_v1 }
 0x78f   :  { %v9008_v25 = vpop.f32.mrb[22].mxu0  ;;  %v8881_v52 = vpop.f32.mrb[51].mxu1  ;;  %v9148_v63 = vadd.f32 %v13025_v19, %v8879_v58  ;;  %v9145_v2 = vadd.f32 %v13029_v6, %v9006_v46 }
 0x790   :  { %v9010_v15 = vpop.f32.mrb[23].mxu0  ;;  %v9149_v4 = vadd.f32 %v13026_v16, %v8881_v52  ;;  %v9154_v59 = vadd.f32 %v9143_v57, %v9142_v54  ;;  %v9150_v18 = vadd.f32 %v13028_v12, %v9008_v25 }
 0x791   :  { %v9151_v23 = vadd.f32 %v13030_v14, %v9010_v15  ;;  %v12969_v14 = vld [vmem:[%s17104_s6 + $0x58] sm:$0xff]  }
 0x792   :  { %v9161_v62 = vadd.f32 %v9149_v4, %v9148_v63  ;;  %v9155_v5 = vadd.f32 %v9154_v59, %v9144_v61 }
 0x794   :  { %v9162_v10 = vadd.f32 %v9161_v62, %v9150_v18  ;;  %v9156_v22 = vadd.f32 %v9155_v5, %v9145_v2 }
 0x796   :  { %v9163_v56 = vadd.f32 %v9162_v10, %v9151_v23 }
 0x84c   :  { %v9133_v21 = vpop.f32.mrb[52].mxu1 }
 0x84d   :  { %v9146_v50 = vadd.f32 %v13031_v9, %v9133_v21  ;;  %v9135_v48 = vpop.f32.mrb[53].mxu1  ;;  %v12967_v21 = vld [vmem:[%s17104_s6 + $0x50] sm:$0xff]   ;;  %v12971_v9 = vld [vmem:[%s17104_s6 + $0x60] sm:$0xff]  }
 0x84e   :  { %v9147_v28 = vadd.f32 %v13032_v24, %v9135_v48  ;;  %v9137_v26 = vpop.f32.mrb[54].mxu1  ;;  %11059 = vmatprep.subr.bf16.mxu0 %v12967_v21  ;;  %v12973_v48 = vld [vmem:[%s17104_s6 + $0x68] sm:$0xff]   ;;  %v12980_v21 = vld [vmem:[%s17104_s6 + $0x80] sm:$0xff]  }
 0x84f   :  { %v9157_v20 = vadd.f32 %v9156_v22, %v9146_v50  ;;  %v9152_v11 = vadd.f32 %v13033_v7, %v9137_v26  ;;  %v9139_v29 = vpop.f32.mrb[55].mxu1  ;;  %v12968_v22 = vld [vmem:[%s17104_s6 + $0x10] sm:$0xff]   ;;  %v12974_v24 = vld [vmem:[%s17104_s6 + $0x28] sm:$0xff]   ;;  %v12979_v7 = vld [vmem:[%s17104_s6 + $0xc0] sm:$0xff]  }
 0x850   :  { %v9153_v32 = vadd.f32 %v13034_v31, %v9139_v29  ;;  %11060 = vmatpush3.bf16.msra.mxu0 %v12968_v22  ;;  %v12976_v26 = vld [vmem:[%s17104_s6 + $0x30] sm:$0xff]  }
 0x851   :  { %v9164_v33 = vadd.f32 %v9163_v56, %v9152_v11  ;;  %v9158_v13 = vadd.f32 %v9157_v20, %v9147_v28  ;;  %11061 = vmatprep.subr.bf16.mxu0 %v12969_v14  ;;  %v12977_v56 = vld [vmem:[%s17104_s6 + $0x78] sm:$0xff]   ;;  %v12981_v14 = vld [vmem:[%s17104_s6 + $0xc8] sm:$0xff]  }
 0x852   :  { %v12978_v20 = vld [vmem:[%s17104_s6 + $0x38] sm:$0xff]  }
 0x853   :  { %9159 = vadd.xlane.f32.xlu0 %v9158_v13  ;;  %v9165_v35 = vadd.f32 %v9164_v33, %v9153_v32 }
 0x855   :  { %9166 = vadd.xlane.f32.xlu1 %v9165_v35  ;;  %v9235_v35 = vsub.s32 1, %v15857_v30 }
 0x857   :  { %v9236_v39 = vrot.slane %v16944_v37, %v9235_v35 }
 0x8e0   :  { %v9160_v40 = vpop.xlane.xlu0 %9159 }
 0x8e1   :  { %v9169_v0 = vmul.f32 0.0013020834, %v9160_v40 }
 0x8e2   :  { %v9167_v41 = vpop.xlane.xlu1 %9166 }
 0x8e3   :  { %v9170_v3 = vmul.f32 0.0013020834, %v9167_v41  ;;  %v16853_v42 = vsub.f32 %v9142_v54, %v9169_v0  ;;  %v16855_v36 = vsub.f32 %v9143_v57, %v9169_v0  ;;  %v16857_v43 = vsub.f32 %v9144_v61, %v9169_v0 }
 0x8e4   :  { %v16859_v44 = vsub.f32 %v9145_v2, %v9169_v0  ;;  %v16869_v8 = vsub.f32 %v9146_v50, %v9169_v0  ;;  %v16881_v15 = vsub.f32 %v9147_v28, %v9169_v0  ;;  %v12972_v50 = vld [vmem:[%s17104_s6 + $0x20] sm:$0xff]   ;;  %v12975_v28 = vld [vmem:[%s17104_s6 + $0x70] sm:$0xff]   ;;  %v9232_v41 = vrot.slane %v16944_v37, %v15864_v34 }
 0x8e5   :  { %v9183_v45 = vmul.f32 %v16853_v42, %v16853_v42  ;;  %v9184_v47 = vmul.f32 %v16855_v36, %v16855_v36  ;;  %v16865_v49 = vsub.f32 %v9148_v63, %v9170_v3  ;;  %v16867_v51 = vsub.f32 %v9149_v4, %v9170_v3  ;;  %v16954_v0 = vld [vmem:[%s17106_s5] sm:$0x3f] }
 0x8e6   :  { %v9185_v1 = vmul.f32 %v16857_v43, %v16857_v43  ;;  %v16873_v46 = vsub.f32 %v9150_v18, %v9170_v3  ;;  %v16875_v58 = vsub.f32 %v9151_v23, %v9170_v3  ;;  %v9186_v53 = vmul.f32 %v16859_v44, %v16859_v44  ;;  %v12970_v23 = vld [vmem:[%s17104_s6 + $0x18] sm:$0xff]  }
 0x8e7   :  { %v9195_v17 = vadd.f32 %v9184_v47, %v9183_v45  ;;  %v9189_v25 = vmul.f32 %v16865_v49, %v16865_v49  ;;  %v9190_v52 = vmul.f32 %v16867_v51, %v16867_v51  ;;  %v16885_v55 = vsub.f32 %v9152_v11, %v9170_v3  ;;  %11062 = vmatpush3.bf16.msra.mxu0 %v12970_v23 }
 0x8e8   :  { %v9191_v57 = vmul.f32 %v16873_v46, %v16873_v46  ;;  %v9187_v63 = vmul.f32 %v16869_v8, %v16869_v8  ;;  %v16891_v4 = vsub.f32 %v9153_v32, %v9170_v3  ;;  %v9192_v59 = vmul.f32 %v16875_v58, %v16875_v58  ;;  %11063 = vmatprep.subr.bf16.mxu0 %v12971_v9 }
 0x8e9   :  { %v9196_v54 = vadd.f32 %v9195_v17, %v9185_v1  ;;  %v9202_v19 = vadd.f32 %v9190_v52, %v9189_v25  ;;  %v9188_v61 = vmul.f32 %v16881_v15, %v16881_v15  ;;  %v9193_v5 = vmul.f32 %v16885_v55, %v16885_v55 }
 0x8ea   :  { %v9194_v6 = vmul.f32 %v16891_v4, %v16891_v4  ;;  %v9244_v1 = vrot.slane %v16944_v37, %v9243_v38  ;;  %v9248_v17 = vrot.slane %v16944_v37, %v9247_v27 }
 0x8eb   :  { %v9197_v16 = vadd.f32 %v9196_v54, %v9186_v53  ;;  %v9203_v60 = vadd.f32 %v9202_v19, %v9191_v57  ;;  %11064 = vmatpush3.bf16.msra.mxu0 %v12972_v50  ;;  %v9280_v53 = vrot.slane %v16954_v0, %v9235_v35  ;;  %v9276_v54 = vrot.slane %v16954_v0, %v15864_v34  ;;  %v12982_v50 = vld [vmem:[%s17104_s6 + $0x88] sm:$0xff]  }
 0x8ec   :  { %11065 = vmatprep.subr.bf16.mxu0 %v12973_v48  ;;  %v12983_v48 = vld [vmem:[%s17104_s6 + $0xd0] sm:$0xff]  }
 0x8ed   :  { %v9198_v62 = vadd.f32 %v9197_v16, %v9187_v63  ;;  %v9204_v12 = vadd.f32 %v9203_v60, %v9192_v59  ;;  %v9288_v63 = vrot.slane %v16954_v0, %v9243_v38  ;;  %v9292_v16 = vrot.slane %v16954_v0, %v9247_v27  ;;  %v12992_v27 = vld [vmem:[%s17104_s6 + $0xb0] sm:$0xff]  }
 0x8ef   :  { %v9199_v18 = vadd.f32 %v9198_v62, %v9188_v61  ;;  %v9205_v2 = vadd.f32 %v9204_v12, %v9193_v5  ;;  %11066 = vmatpush3.bf16.msra.mxu0 %v12974_v24  ;;  %v12984_v24 = vld [vmem:[%s17104_s6 + $0x90] sm:$0xff]  }
 0x8f0   :  { %11067 = vmatprep.subr.bf16.mxu0 %v12975_v28  ;;  %v12985_v28 = vld [vmem:[%s17104_s6 + $0xd8] sm:$0xff]  }
 0x8f1   :  { %9200 = vadd.xlane.f32.xlu0 %v9199_v18  ;;  %v9206_v10 = vadd.f32 %v9205_v2, %v9194_v6 }
 0x8f3   :  { %9207 = vadd.xlane.f32.xlu1 %v9206_v10  ;;  %11068 = vmatpush3.bf16.msra.mxu0 %v12976_v26  ;;  %v12986_v26 = vld [vmem:[%s17104_s6 + $0x98] sm:$0xff]  }
 0x8f4   :  { %11069 = vmatprep.subr.bf16.mxu0 %v12977_v56  ;;  %v12987_v56 = vld [vmem:[%s17104_s6 + $0xe0] sm:$0xff]  }
 0x8f7   :  { %11070 = vmatpush3.bf16.msra.mxu0 %v12978_v20  ;;  %v12988_v20 = vld [vmem:[%s17104_s6 + $0xa0] sm:$0xff]  }
 0x8f8   :  { %11077 = vmatprep.subr.bf16.mxu0 %v12979_v7  ;;  %v12989_v7 = vld [vmem:[%s17104_s6 + $0xe8] sm:$0xff]  }
 0x97e   :  { %v9201_v11 = vpop.xlane.xlu0 %9200 }
 0x97f   :  { %v9209_v29 = vmul.f32 0.0013020834, %v9201_v11  ;;  %v9239_v11 = vsub.s32 2, %v15857_v30 }
 0x980   :  { %v9208_v32 = vpop.xlane.xlu1 %9207 }
 0x981   :  { %v9211_v31 = vadd.f32 1e-05, %v9209_v29  ;;  %v9210_v33 = vmul.f32 0.0013020834, %v9208_v32  ;;  %v12990_v29 = vld [vmem:[%s17104_s6 + $0xa8] sm:$0xff]   ;;  %v12991_v32 = vld [vmem:[%s17104_s6 + $0xf0] sm:$0xff]   ;;  %v9240_v38 = vrot.slane %v16944_v37, %v9239_v11 }
 0x983   :  { %13019 = vrsqrt.f32 %v9211_v31  ;;  %v9212_v13 = vadd.f32 1e-05, %v9210_v33  ;;  %v9251_v31 = vsub.s32 5, %v15857_v30 }
 0x985   :  { %13021 = vrsqrt.f32 %v9212_v13 }
 0x98d   :  { %v16949_v40 = vpop.eup %13019 }
 0x98e   :  { %v9216_v3 = vmul.f32 %v16949_v40, %v16855_v36  ;;  %v9215_v45 = vmul.f32 %v16949_v40, %v16853_v42  ;;  %v9218_v47 = vmul.f32 %v16949_v40, %v16859_v44  ;;  %v9219_v36 = vmul.f32 %v16949_v40, %v16869_v8 }
 0x98f   :  { %v13022_v25 = vpop.eup %13021  ;;  %v9217_v35 = vmul.f32 %v16949_v40, %v16857_v43  ;;  %v9220_v30 = vmul.f32 %v16949_v40, %v16881_v15  ;;  %v9296_v15 = vrot.slane %v16954_v0, %v9251_v31  ;;  %v12995_v40 = vld [vmem:[%s17104_s6 + $0x140] sm:$0xff]  }
 0x990   :  { %v9260_v52 = vmul.f32 %v9236_v39, %v9216_v3  ;;  %v9222_v57 = vmul.f32 %v13022_v25, %v16867_v51  ;;  %v9221_v42 = vmul.f32 %v13022_v25, %v16865_v49  ;;  %v9259_v19 = vmul.f32 %v9232_v41, %v9215_v45  ;;  %v12994_v45 = vld [vmem:[%s17104_s6 + $0xb8] sm:$0xff]  }
 0x991   :  { %v9224_v44 = vmul.f32 %v13022_v25, %v16875_v58  ;;  %v9262_v61 = vmul.f32 %v9244_v1, %v9218_v47  ;;  %v9225_v34 = vmul.f32 %v13022_v25, %v16885_v55  ;;  %v9263_v12 = vmul.f32 %v9248_v17, %v9219_v36  ;;  %v12998_v36 = vld [vmem:[%s17104_s6 + $0x108] sm:$0xff]  }
 0x992   :  { %v9266_v59 = vmul.f32 %v9236_v39, %v9222_v57  ;;  %v9265_v60 = vmul.f32 %v9232_v41, %v9221_v42  ;;  %v9304_v5 = vadd.f32 %v9280_v53, %v9260_v52  ;;  %v9303_v18 = vadd.f32 %v9276_v54, %v9259_v19  ;;  %v12999_v57 = vld [vmem:[%s17104_s6 + $0x150] sm:$0xff]   ;;  %v13001_v19 = vld [vmem:[%s17104_s6 + $0x158] sm:$0xff]  }
 0x993   :  { %v9268_v62 = vmul.f32 %v9244_v1, %v9224_v44  ;;  %v9269_v49 = vmul.f32 %v9248_v17, %v9225_v34  ;;  %v16977_v2 = vadd.f32 %v9292_v16, %v9263_v12  ;;  %v9306_v22 = vadd.f32 %v9288_v63, %v9262_v61  ;;  %v13000_v42 = vld [vmem:[%s17104_s6 + $0x110] sm:$0xff]   ;;  %v13002_v44 = vld [vmem:[%s17104_s6 + $0x118] sm:$0xff]  }
 0x994   :  { %v9310_v8 = vadd.f32 %v9280_v53, %v9266_v59  ;;  %v9309_v51 = vadd.f32 %v9276_v54, %v9265_v60  ;;  %v9223_v33 = vmul.f32 %v13022_v25, %v16873_v46  ;;  %v9226_v13 = vmul.f32 %v13022_v25, %v16891_v4  ;;  %v12993_v46 = vld [vmem:[%s17104_s6 + $0xf8] sm:$0xff]   ;;  %v12996_v25 = vld [vmem:[%s17104_s6 + $0x100] sm:$0xff]   ;;  %v13005_v59 = vld [vmem:[%s17104_s6 + $0x168] sm:$0xff]  }
 0x995   :  { %v9312_v6 = vadd.f32 %v9288_v63, %v9268_v62  ;;  %v16985_v55 = vadd.f32 %v9292_v16, %v9269_v49  ;;  %v9252_v39 = vrot.slane %v16944_v37, %v9251_v31  ;;  %v9261_v43 = vmul.f32 %v9240_v38, %v9217_v35  ;;  %v13003_v63 = vld [vmem:[%s17104_s6 + $0x160] sm:$0xff]   ;;  %v13006_v60 = vld [vmem:[%s17104_s6 + $0x128] sm:$0xff]   ;;  %v13007_v61 = vld [vmem:[%s17104_s6 + $0x170] sm:$0xff]  }
 0x996   :  { %v9316_v58 = vpack.c.bf16 %v9310_v8, %v9304_v5  ;;  %v9315_v10 = vpack.c.bf16 %v9309_v51, %v9303_v18  ;;  %v9267_v4 = vmul.f32 %v9240_v38, %v9223_v33  ;;  %v9284_v3 = vrot.slane %v16954_v0, %v9239_v11  ;;  %v12997_v0 = vld [vmem:[%s17104_s6 + $0x148] sm:$0xff]   ;;  %v13004_v16 = vld [vmem:[%s17104_s6 + $0x120] sm:$0xff]   ;;  %v13008_v62 = vld [vmem:[%s17104_s6 + $0x130] sm:$0xff]  }
 0x997   :  { %v9318_v23 = vpack.c.bf16 %v9312_v6, %v9306_v22  ;;  %v9319_v9 = vpack.c.bf16 %v16985_v55, %v16977_v2  ;;  %v9270_v41 = vmul.f32 %v9252_v39, %v9226_v13  ;;  %v9264_v47 = vmul.f32 %v9252_v39, %v9220_v30  ;;  %v13009_v5 = vld [vmem:[%s17104_s6 + $0x178] sm:$0xff]  }
 0x998   :  { %9744 = vmatprep.mubr.bf16.mxu0 %v9316_v58  ;;  %v9311_v37 = vadd.f32 %v9284_v3, %v9267_v4  ;;  %v9305_v17 = vadd.f32 %v9284_v3, %v9261_v43  ;;  %v13010_v34 = vld [vmem:[%s17104_s6 + $0x138] sm:$0xff]   ;;  %v11006_v58 = vld [vmem:[%s17107_s7] ss:$0 sm:$0xff] }
 0x999   :  { %9745 = vmatmul.mubr.bf16.vlgmr.msra.gmra.mrb[24].mxu0 %v9315_v10  ;;  %v9314_v1 = vadd.f32 %v9296_v15, %v9270_v41  ;;  %v9308_v52 = vadd.f32 %v9296_v15, %v9264_v47 }
 0x99a   :  { %11078 = vmatpush3.bf16.msra.mxu0 %v12980_v21  ;;  %9785 = vmatprep.mubr.bf16.mxu0 %v9318_v23  ;;  %v9317_v53 = vpack.c.bf16 %v9311_v37, %v9305_v17 }
 0x99b   :  { %11079 = vmatprep.subr.bf16.mxu0 %v12981_v14  ;;  %v9320_v54 = vpack.c.bf16 %v9314_v1, %v9308_v52 }
 0x99e   :  { %11080 = vmatpush3.bf16.msra.mxu0 %v12982_v50 }
 0x99f   :  { %11081 = vmatprep.subr.bf16.mxu0 %v12983_v48 }
 0x9a2   :  { %11082 = vmatpush3.bf16.msra.mxu0 %v12984_v24 }
 0x9a3   :  { %11083 = vmatprep.subr.bf16.mxu0 %v12985_v28 }
 0x9a6   :  { %11084 = vmatpush3.bf16.msra.mxu0 %v12986_v26 }
 0x9a7   :  { %11085 = vmatprep.subr.bf16.mxu0 %v12987_v56 }
 0x9aa   :  { %11086 = vmatpush3.bf16.msra.mxu0 %v12988_v20 }
 0x9ab   :  { %11087 = vmatprep.subr.bf16.mxu0 %v12989_v7 }
 0x9ae   :  { %11088 = vmatpush3.bf16.msra.mxu0 %v12990_v29 }
 0x9af   :  { %11089 = vmatprep.subr.bf16.mxu0 %v12991_v32 }
 0x9b2   :  { %11090 = vmatpush3.bf16.msra.mxu0 %v12992_v27 }
 0x9b3   :  { %11091 = vmatprep.subr.bf16.mxu0 %v12993_v46 }
 0x9b6   :  { %11092 = vmatpush3.bf16.msra.mxu0 %v12994_v45 }
 0x9b7   :  { %11099 = vmatprep.subr.bf16.mxu0 %v12995_v40 }
 0x9b9   :  { %9786 = vmatmul.mubr.bf16.vlgmr.msra.gmra.mrb[28].mxu0 %v9317_v53 }
 0x9ba   :  { %11100 = vmatpush3.bf16.msra.mxu0 %v12996_v25  ;;  %9826 = vmatprep.mubr.bf16.mxu0 %v9320_v54 }
 0x9bb   :  { %11101 = vmatprep.subr.bf16.mxu0 %v12997_v0 }
 0x9be   :  { %11102 = vmatpush3.bf16.msra.mxu0 %v12998_v36 }
 0x9bf   :  { %11103 = vmatprep.subr.bf16.mxu0 %v12999_v57 }
 0x9c2   :  { %11104 = vmatpush3.bf16.msra.mxu0 %v13000_v42 }
 0x9c3   :  { %11105 = vmatprep.subr.bf16.mxu0 %v13001_v19 }
 0x9c6   :  { %11106 = vmatpush3.bf16.msra.mxu0 %v13002_v44 }
 0x9c7   :  { %11107 = vmatprep.subr.bf16.mxu0 %v13003_v63 }
 0x9ca   :  { %11108 = vmatpush3.bf16.msra.mxu0 %v13004_v16 }
 0x9cb   :  { %11109 = vmatprep.subr.bf16.mxu0 %v13005_v59 }
 0x9ce   :  { %11110 = vmatpush3.bf16.msra.mxu0 %v13006_v60 }
 0x9cf   :  { %11111 = vmatprep.subr.bf16.mxu0 %v13007_v61 }
 0x9d2   :  { %11112 = vmatpush3.bf16.msra.mxu0 %v13008_v62 }
 0x9d3   :  { %11113 = vmatprep.subr.bf16.mxu0 %v13009_v5 }
 0x9d6   :  { %11114 = vmatpush3.bf16.msra.mxu0 %v13010_v34 }
 0x9d9   :  { %9827 = vmatmul.mubr.bf16.vlgmr.msra.gmra.mrb[32].mxu0 %v9319_v9 }
 0xa6c   :  { %v11071_v12 = vpop.f32.mrb[24].mxu0 }
 0xa6d   :  { %v11072_v8 = vpop.f32.mrb[25].mxu0 }
 0xa6e   :  { %v11073_v18 = vadd.f32 %v11072_v8, %v11071_v12  ;;  %v11074_v51 = vpop.f32.mrb[26].mxu0 }
 0xa6f   :  { %v11075_v6 = vpop.f32.mrb[27].mxu0 }
 0xa70   :  { %v11076_v49 = vadd.f32 %v11075_v6, %v11074_v51  ;;  %v9747_v22 = vadd.f32 %v11073_v18, %v11006_v58 }
 0xa72   :  { %v9750_v48 = vadd.f32 %v11076_v49, %v11006_v58 }
 0xa8c   :  { %v11093_v10 = vpop.f32.mrb[28].mxu0 }
 0xa8d   :  { %v11094_v21 = vpop.f32.mrb[29].mxu0 }
 0xa8e   :  { %v11095_v14 = vadd.f32 %v11094_v21, %v11093_v10  ;;  %v11096_v23 = vpop.f32.mrb[30].mxu0 }
 0xa8f   :  { %v11097_v50 = vpop.f32.mrb[31].mxu0 }
 0xa90   :  { %v9788_v24 = vadd.f32 %v11095_v14, %v9747_v22  ;;  %v11098_v2 = vadd.f32 %v11097_v50, %v11096_v23 }
 0xa92   :  { %v9791_v55 = vadd.f32 %v11098_v2, %v9750_v48 }
 0xaac   :  { %v11115_v9 = vpop.f32.mrb[32].mxu0 }
 0xaad   :  { %v11116_v28 = vpop.f32.mrb[33].mxu0 }
 0xaae   :  { %v11117_v26 = vadd.f32 %v11116_v28, %v11115_v9  ;;  %v11118_v56 = vpop.f32.mrb[34].mxu0 }
 0xaaf   :  { %v11119_v20 = vpop.f32.mrb[35].mxu0 }
 0xab0   :  { %v9829_v7 = vadd.f32 %v11117_v26, %v9788_v24  ;;  %v11120_v11 = vadd.f32 %v11119_v20, %v11118_v56 }
 0xab2   :  { %9835 = vst [vmem:[%s17108_s8] sm:$0xff] %v9829_v7  ;;  %v9832_v29 = vadd.f32 %v11120_v11, %v9791_v55 }
 0xab4   :  { %9836 = vst [vmem:[%s17108_s8 + $0x8] sm:$0xff] %v9832_v29 }

</bundles_post_ra>
